<compile_context>
chip_gen: v6e
topology: v6e:2x2x1
jax: 0.10.0
libtpu: 0.0.40
codegen_flags: <defaults>
</compile_context>

<pallas_src>
import functools

import jax
import jax.numpy as jnp
from jax import lax
from jax.experimental import pallas as pl
from jax.experimental.pallas import tpu as pltpu

N_HIDDEN = 128
N_LAYERS = 2
FC1_OUT = 150
FC2_OUT = 76
FC1_PAD = 256   # 150 padded up to a lane multiple
FC2_PAD = 128   # 76 padded up to a lane multiple

MAX_TIME_CHUNK = 64   # timesteps processed per grid iteration


def _round_up(x, m):
    return (x + m - 1) // m * m


# --------------------------------------------------------------------------
# Fused bidirectional LSTM layer.
# Grid = (direction, time_chunk); h/c carry lives in VMEM scratch, reset at
# the first chunk of each direction.  Input projection for the whole chunk is
# a single matmul; the sequential loop only adds h @ Whh.
# --------------------------------------------------------------------------
def _lstm_bidir_kernel(x_ref, wih_ref, whh_ref, b_ref, out_ref,
                       gates_scr, h_scr, c_scr, *,
                       chunk, n_chunks, t_real, t_pad, hidden):
    d = pl.program_id(0)   # 0 = forward, 1 = backward
    c = pl.program_id(1)   # time-chunk index (sequential per direction)

    @pl.when(c == 0)
    def _init():
        h_scr[...] = jnp.zeros_like(h_scr)
        c_scr[...] = jnp.zeros_like(c_scr)

    H = hidden
    cb, bp, din = x_ref.shape          # (chunk, B_pad, D_in)

    # ---- hoisted input projection: one big MXU matmul for the whole chunk --
    x2d = x_ref[...].reshape(cb * bp, din).astype(jnp.bfloat16)
    gx = jnp.dot(x2d, wih_ref[...], preferred_element_type=jnp.float32)
    gx = gx + b_ref[...]
    gx = gx.reshape(cb, bp, 4 * H)
    if t_pad > t_real:
        # Zero the gates of zero-padded timesteps so the carried state stays
        # exactly zero through the padded region (needed for the bwd pass,
        # which processes padded steps first).
        tci = jnp.where(d == 0, c, (n_chunks - 1) - c)
        ids = tci * chunk + lax.broadcasted_iota(jnp.int32, gx.shape, 0)
        gx = jnp.where(ids < t_real, gx, 0.0)
    gates_scr[...] = gx

    whh = whh_ref[...]                 # (H, 4H) bf16, resident for the chunk

    def step(s, carry):
        h_prev, c_prev = carry
        # forward walks the chunk 0..cb-1, backward walks it cb-1..0
        t = jnp.where(d == 0, s, (cb - 1) - s)
        g = gates_scr[t] + jnp.dot(h_prev.astype(jnp.bfloat16), whh,
                                   preferred_element_type=jnp.float32)
        i = jax.nn.sigmoid(g[:, 0 * H:1 * H])
        f = jax.nn.sigmoid(g[:, 1 * H:2 * H])
        gg = jnp.tanh(g[:, 2 * H:3 * H])
        o = jax.nn.sigmoid(g[:, 3 * H:4 * H])
        c_new = f * c_prev + i * gg
        h_new = o * jnp.tanh(c_new)
        out_ref[t] = h_new.astype(out_ref.dtype)
        return h_new, c_new

    h_fin, c_fin = lax.fori_loop(0, cb, step, (h_scr[...], c_scr[...]),
                                 unroll=(cb <= 16))
    h_scr[...] = h_fin
    c_scr[...] = c_fin


def lstm_bidir_layer(x_tm, wih_all, whh_all, b_all, *, chunk, t_real):
    """x_tm: (T_pad, B_pad, D) f32 time-major.  Returns (T_pad, B_pad, 2H) f32."""
    t_pad, b_pad, d_in = x_tm.shape
    H = whh_all.shape[1]
    n_chunks = t_pad // chunk

    def time_block(di, ci):
        # forward direction consumes chunks 0..n-1, backward n-1..0
        return jnp.where(di == 0, ci, (n_chunks - 1) - ci)

    kernel = functools.partial(
        _lstm_bidir_kernel, chunk=chunk, n_chunks=n_chunks,
        t_real=t_real, t_pad=t_pad, hidden=H)

    return pl.pallas_call(
        kernel,
        out_shape=jax.ShapeDtypeStruct((t_pad, b_pad, 2 * H), jnp.float32),
        grid_spec=pltpu.PrefetchScalarGridSpec(
            num_scalar_prefetch=0,
            grid=(2, n_chunks),
            in_specs=[
                pl.BlockSpec((chunk, b_pad, d_in),
                             lambda di, ci: (time_block(di, ci), 0, 0)),
                pl.BlockSpec((None, d_in, 4 * H), lambda di, ci: (di, 0, 0)),
                pl.BlockSpec((None, H, 4 * H), lambda di, ci: (di, 0, 0)),
                pl.BlockSpec((None, 1, 4 * H), lambda di, ci: (di, 0, 0)),
            ],
            out_specs=pl.BlockSpec((chunk, b_pad, H),
                                   lambda di, ci: (time_block(di, ci), 0, di)),
            scratch_shapes=[
                pltpu.VMEM((chunk, b_pad, 4 * H), jnp.float32),  # chunk gates
                pltpu.VMEM((b_pad, H), jnp.float32),             # h carry
                pltpu.VMEM((b_pad, H), jnp.float32),             # c carry
            ],
        ),
        compiler_params=pltpu.CompilerParams(
            # direction axis is independent (v7x: one direction per core);
            # the time-chunk axis carries state -> arbitrary.
            dimension_semantics=("parallel", "arbitrary")),
    )(x_tm, wih_all, whh_all, b_all)


# --------------------------------------------------------------------------
# Dense head: relu(dropout(fc1(x))) -> fc2, row-tiled, lane-padded outputs.
# --------------------------------------------------------------------------
def _fc_head_kernel(x_ref, w1_ref, b1_ref, w2_ref, b2_ref, o_ref):
    x = x_ref[...].astype(jnp.bfloat16)
    h = jnp.dot(x, w1_ref[...], preferred_element_type=jnp.float32) + b1_ref[...]
    # TODO(synk): dropout (p=0.3) is stochastic only in train mode; identity here.
    h = jnp.maximum(h, 0.0)
    o_ref[...] = (jnp.dot(h.astype(jnp.bfloat16), w2_ref[...],
                          preferred_element_type=jnp.float32)
                  + b2_ref[...]).astype(o_ref.dtype)


def _pick_row_tile(n_rows):
    for t in (1024, 512, 256, 128, 64, 32, 16, 8):
        if n_rows % t == 0:
            return t
    return n_rows


def fc_head(x2d, w1p, b1p, w2p, b2p):
    n_rows, d_in = x2d.shape
    row_tile = _pick_row_tile(n_rows)
    return pl.pallas_call(
        _fc_head_kernel,
        out_shape=jax.ShapeDtypeStruct((n_rows, FC2_PAD), jnp.float32),
        grid_spec=pltpu.PrefetchScalarGridSpec(
            num_scalar_prefetch=0,
            grid=(n_rows // row_tile,),
            in_specs=[
                pl.BlockSpec((row_tile, d_in), lambda r: (r, 0)),
                pl.BlockSpec((d_in, FC1_PAD), lambda r: (0, 0)),
                pl.BlockSpec((1, FC1_PAD), lambda r: (0, 0)),
                pl.BlockSpec((FC1_PAD, FC2_PAD), lambda r: (0, 0)),
                pl.BlockSpec((1, FC2_PAD), lambda r: (0, 0)),
            ],
            out_specs=pl.BlockSpec((row_tile, FC2_PAD), lambda r: (r, 0)),
        ),
        compiler_params=pltpu.CompilerParams(
            dimension_semantics=("parallel",)),
    )(x2d, w1p, b1p, w2p, b2p)


# --------------------------------------------------------------------------
# Full forward pass.
# --------------------------------------------------------------------------
def mimic_lstm_predictor_forward(x, params):
    """x: (B, T, input_dim) float32 -> (B, T, 76) float32 (eval mode)."""
    B, T, _ = x.shape
    b_pad = _round_up(B, 8)                      # f32 sublane multiple
    chunk = T if T <= MAX_TIME_CHUNK else MAX_TIME_CHUNK
    t_pad = _round_up(T, chunk)

    # One transpose/pad to time-major, padded layout; every layer stays there.
    h_tm = jnp.transpose(x, (1, 0, 2))
    h_tm = jnp.pad(h_tm, ((0, t_pad - T), (0, b_pad - B), (0, 0)))

    for layer in params["lstm"]:
        h_tm = lstm_bidir_layer(h_tm, layer["wih"], layer["whh"], layer["b"],
                                chunk=chunk, t_real=T)
        # TODO(synk): inter-layer LSTM dropout (p=0.3) is identity in eval mode.

    w1p, b1p = params["fc1"]
    w2p, b2p = params["fc2"]
    out2d = fc_head(h_tm.reshape(t_pad * b_pad, 2 * N_HIDDEN), w1p, b1p, w2p, b2p)
    out = out2d.reshape(t_pad, b_pad, FC2_PAD)[:T, :B, :FC2_OUT]
    return jnp.transpose(out, (1, 0, 2))


# --------------------------------------------------------------------------
# Deterministic parameter init (PyTorch shapes, pre-packed for the kernels:
# directions stacked, weights pre-transposed for x @ W, matmul weights bf16,
# FC weights zero-padded to lane multiples).
# --------------------------------------------------------------------------
def init_params(key, input_dim, n_hidden=N_HIDDEN, n_layers=N_LAYERS):
    keys = iter(jax.random.split(key, 8 * n_layers + 4))
    params = {"lstm": []}
    k_lstm = 1.0 / (n_hidden ** 0.5)
    d_in = input_dim
    for _ in range(n_layers):
        wih, whh, b = [], [], []
        for _direction in range(2):
            wih.append(jax.random.uniform(next(keys), (d_in, 4 * n_hidden),
                                          jnp.float32, -k_lstm, k_lstm))
            whh.append(jax.random.uniform(next(keys), (n_hidden, 4 * n_hidden),
                                          jnp.float32, -k_lstm, k_lstm))
            bih = jax.random.uniform(next(keys), (1, 4 * n_hidden),
                                     jnp.float32, -k_lstm, k_lstm)
            bhh = jax.random.uniform(next(keys), (1, 4 * n_hidden),
                                     jnp.float32, -k_lstm, k_lstm)
            b.append(bih + bhh)
        params["lstm"].append({
            "wih": jnp.stack(wih).astype(jnp.bfloat16),   # (2, d_in, 4H)
            "whh": jnp.stack(whh).astype(jnp.bfloat16),   # (2, H, 4H)
            "b": jnp.stack(b),                            # (2, 1, 4H) f32
        })
        d_in = 2 * n_hidden

    k1 = 1.0 / ((2 * n_hidden) ** 0.5)
    w1 = jax.random.uniform(next(keys), (2 * n_hidden, FC1_OUT), jnp.float32, -k1, k1)
    b1 = jax.random.uniform(next(keys), (1, FC1_OUT), jnp.float32, -k1, k1)
    k2 = 1.0 / (FC1_OUT ** 0.5)
    w2 = jax.random.uniform(next(keys), (FC1_OUT, FC2_OUT), jnp.float32, -k2, k2)
    b2 = jax.random.uniform(next(keys), (1, FC2_OUT), jnp.float32, -k2, k2)

    w1p = jnp.zeros((2 * n_hidden, FC1_PAD), jnp.float32).at[:, :FC1_OUT].set(w1)
    b1p = jnp.zeros((1, FC1_PAD), jnp.float32).at[:, :FC1_OUT].set(b1)
    w2p = jnp.zeros((FC1_PAD, FC2_PAD), jnp.float32).at[:FC1_OUT, :FC2_OUT].set(w2)
    b2p = jnp.zeros((1, FC2_PAD), jnp.float32).at[:, :FC2_OUT].set(b2)
    params["fc1"] = (w1p.astype(jnp.bfloat16), b1p)
    params["fc2"] = (w2p.astype(jnp.bfloat16), b2p)
    return params


if __name__ == "__main__":
    key = jax.random.PRNGKey(0)
    kx, kp = jax.random.split(key)
    B, T, input_dim = 2, 8, 16
    x = jax.random.normal(kx, (B, T, input_dim), jnp.float32)
    params = init_params(kp, input_dim)

    fwd = jax.jit(mimic_lstm_predictor_forward)
    out = jax.block_until_ready(fwd(x, params))
    assert out.shape == (B, T, FC2_OUT), out.shape
    assert out.dtype == jnp.float32
    print("KERNEL_OK")
</pallas_src>

<mosaic_0001>
module attributes {stable_mosaic.version = 11 : i64} {
  func.func @_lstm_bidir_kernel(%arg0: i32, %arg1: i32, %arg2: memref<8x8x256xf32, #tpu.memory_space<vmem>>, %arg3: memref<1x256x512xbf16, #tpu.memory_space<vmem>>, %arg4: memref<1x128x512xbf16, #tpu.memory_space<vmem>>, %arg5: memref<1x1x512xf32, #tpu.memory_space<vmem>>, %arg6: memref<8x8x128xf32, #tpu.memory_space<vmem>>, %arg7: memref<8x8x512xf32, #tpu.memory_space<vmem>>, %arg8: memref<8x128xf32, #tpu.memory_space<vmem>>, %arg9: memref<8x128xf32, #tpu.memory_space<vmem>>) attributes {dimension_semantics = [#tpu.dimension_semantics<parallel>, #tpu.dimension_semantics<arbitrary>], iteration_bounds = array<i64: 2, 1>, scalar_prefetch = 0 : i64, scratch_operands = 3 : i64, tpu.core_type = #tpu.core_type<tc>, window_params = [{transform_indices = @transform_0, window_bounds = array<i64: 8, 8, 256>}, {transform_indices = @transform_1, window_bounds = array<i64: 1, 256, 512>}, {transform_indices = @transform_2, window_bounds = array<i64: 1, 128, 512>}, {transform_indices = @transform_3, window_bounds = array<i64: 1, 1, 512>}, {transform_indices = @transform_4, window_bounds = array<i64: 8, 8, 128>}]} {
    %c0_i32 = arith.constant 0 : i32
    %0 = arith.cmpi eq, %arg1, %c0_i32 : i32
    %1 = arith.extui %0 : i1 to i32
    %c0_i32_0 = arith.constant 0 : i32
    %2 = arith.cmpi ne, %1, %c0_i32_0 : i32
    scf.if %2 {
      %cst_104 = arith.constant 0.000000e+00 : f32
      %325 = vector.broadcast %cst_104 : f32 to vector<8x128xf32>
      %c0_105 = arith.constant 0 : index
      %c0_106 = arith.constant 0 : index
      %326 = vector.load %arg8[%c0_105, %c0_106] : memref<8x128xf32, #tpu.memory_space<vmem>>, vector<8x128xf32>
      tpu.vector_store %arg8[%c0_105, %c0_106], %325 {strides = array<i32>} : memref<8x128xf32, #tpu.memory_space<vmem>>, vector<8x128xf32>,
      %cst_107 = arith.constant 0.000000e+00 : f32
      %327 = vector.broadcast %cst_107 : f32 to vector<8x128xf32>
      %c0_108 = arith.constant 0 : index
      %c0_109 = arith.constant 0 : index
      %328 = vector.load %arg9[%c0_108, %c0_109] : memref<8x128xf32, #tpu.memory_space<vmem>>, vector<8x128xf32>
      tpu.vector_store %arg9[%c0_108, %c0_109], %327 {strides = array<i32>} : memref<8x128xf32, #tpu.memory_space<vmem>>, vector<8x128xf32>,
    } else {
    }
    %c0 = arith.constant 0 : index
    %c0_1 = arith.constant 0 : index
    %c0_2 = arith.constant 0 : index
    %3 = vector.load %arg2[%c0, %c0_1, %c0_2] : memref<8x8x256xf32, #tpu.memory_space<vmem>>, vector<8x8x256xf32>
    %4 = vector.shape_cast %3 : vector<8x8x256xf32> to vector<64x256xf32>
    %5 = arith.truncf %4 : vector<64x256xf32> to vector<64x256xbf16>
    %c0_3 = arith.constant 0 : index
    %c0_4 = arith.constant 0 : index
    %c0_5 = arith.constant 0 : index
    %6 = vector.load %arg3[%c0_3, %c0_4, %c0_5] : memref<1x256x512xbf16, #tpu.memory_space<vmem>>, vector<1x256x512xbf16>
    %7 = vector.shape_cast %6 : vector<1x256x512xbf16> to vector<256x512xbf16>
    %cst = arith.constant dense<0.000000e+00> : vector<64x512xf32>
    %8 = tpu.matmul %5, %7, %cst {dimension_numbers = #tpu.dot_dimension_numbers<[1], [0], [0], [1], [0, 0, 1, 1], [], []>} : vector<64x256xbf16>, vector<256x512xbf16>, vector<64x512xf32> -> vector<64x512xf32>
    %c0_6 = arith.constant 0 : index
    %c0_7 = arith.constant 0 : index
    %c0_8 = arith.constant 0 : index
    %9 = vector.load %arg5[%c0_6, %c0_7, %c0_8] : memref<1x1x512xf32, #tpu.memory_space<vmem>>, vector<1x1x512xf32>
    %10 = vector.shape_cast %9 : vector<1x1x512xf32> to vector<1x512xf32>
    %11 = vector.broadcast %10 : vector<1x512xf32> to vector<64x512xf32>
    %12 = arith.addf %8, %11 : vector<64x512xf32>
    %13 = vector.shape_cast %12 : vector<64x512xf32> to vector<8x8x512xf32>
    %c0_9 = arith.constant 0 : index
    %c0_10 = arith.constant 0 : index
    %c0_11 = arith.constant 0 : index
    %14 = vector.load %arg7[%c0_9, %c0_10, %c0_11] : memref<8x8x512xf32, #tpu.memory_space<vmem>>, vector<8x8x512xf32>
    tpu.vector_store %arg7[%c0_9, %c0_10, %c0_11], %13 {strides = array<i32>} : memref<8x8x512xf32, #tpu.memory_space<vmem>>, vector<8x8x512xf32>,
    %c0_12 = arith.constant 0 : index
    %c0_13 = arith.constant 0 : index
    %c0_14 = arith.constant 0 : index
    %15 = vector.load %arg4[%c0_12, %c0_13, %c0_14] : memref<1x128x512xbf16, #tpu.memory_space<vmem>>, vector<1x128x512xbf16>
    %16 = vector.shape_cast %15 : vector<1x128x512xbf16> to vector<128x512xbf16>
    %c0_15 = arith.constant 0 : index
    %c0_16 = arith.constant 0 : index
    %17 = vector.load %arg8[%c0_15, %c0_16] : memref<8x128xf32, #tpu.memory_space<vmem>>, vector<8x128xf32>
    %c0_17 = arith.constant 0 : index
    %c0_18 = arith.constant 0 : index
    %18 = vector.load %arg9[%c0_17, %c0_18] : memref<8x128xf32, #tpu.memory_space<vmem>>, vector<8x128xf32>
    %c0_i32_19 = arith.constant 0 : i32
    %c0_i32_20 = arith.constant 0 : i32
    %19 = arith.cmpi eq, %arg0, %c0_i32_20 : i32
    %c7_i32 = arith.constant 7 : i32
    %20 = arith.subi %c7_i32, %c0_i32_19 : i32
    %21 = arith.select %19, %c0_i32_19, %20 : i32
    %22 = arith.index_cast %21 : i32 to index
    %c0_21 = arith.constant 0 : index
    %c0_22 = arith.constant 0 : index
    %23 = vector.load %arg7[%22, %c0_21, %c0_22] : memref<8x8x512xf32, #tpu.memory_space<vmem>>, vector<1x8x512xf32>
    %24 = vector.shape_cast %23 : vector<1x8x512xf32> to vector<8x512xf32>
    %25 = arith.truncf %17 : vector<8x128xf32> to vector<8x128xbf16>
    %cst_23 = arith.constant dense<0.000000e+00> : vector<8x512xf32>
    %26 = tpu.matmul %25, %16, %cst_23 {dimension_numbers = #tpu.dot_dimension_numbers<[1], [0], [0], [1], [0, 0, 1, 1], [], []>} : vector<8x128xbf16>, vector<128x512xbf16>, vector<8x512xf32> -> vector<8x512xf32>
    %27 = arith.addf %24, %26 : vector<8x512xf32>
    %28 = vector.extract_strided_slice %27 {offsets = [0, 0], sizes = [8, 128], strides = [1, 1]} : vector<8x512xf32> to vector<8x128xf32>
    %29 = arith.negf %28 : vector<8x128xf32>
    %30 = math.exp %29 : vector<8x128xf32>
    %cst_24 = arith.constant 1.000000e+00 : f32
    %31 = vector.broadcast %cst_24 : f32 to vector<8x128xf32>
    %32 = arith.addf %31, %30 : vector<8x128xf32>
    %33 = arith.divf %31, %32 : vector<8x128xf32>
    %34 = vector.extract_strided_slice %27 {offsets = [0, 128], sizes = [8, 128], strides = [1, 1]} : vector<8x512xf32> to vector<8x128xf32>
    %35 = arith.negf %34 : vector<8x128xf32>
    %36 = math.exp %35 : vector<8x128xf32>
    %cst_25 = arith.constant 1.000000e+00 : f32
    %37 = vector.broadcast %cst_25 : f32 to vector<8x128xf32>
    %38 = arith.addf %37, %36 : vector<8x128xf32>
    %39 = arith.divf %37, %38 : vector<8x128xf32>
    %40 = vector.extract_strided_slice %27 {offsets = [0, 256], sizes = [8, 128], strides = [1, 1]} : vector<8x512xf32> to vector<8x128xf32>
    %41 = math.tanh %40 : vector<8x128xf32>
    %42 = vector.extract_strided_slice %27 {offsets = [0, 384], sizes = [8, 128], strides = [1, 1]} : vector<8x512xf32> to vector<8x128xf32>
    %43 = arith.negf %42 : vector<8x128xf32>
    %44 = math.exp %43 : vector<8x128xf32>
    %cst_26 = arith.constant 1.000000e+00 : f32
    %45 = vector.broadcast %cst_26 : f32 to vector<8x128xf32>
    %46 = arith.addf %45, %44 : vector<8x128xf32>
    %47 = arith.divf %45, %46 : vector<8x128xf32>
    %48 = arith.mulf %39, %18 : vector<8x128xf32>
    %49 = arith.mulf %33, %41 : vector<8x128xf32>
    %50 = arith.addf %48, %49 : vector<8x128xf32>
    %51 = math.tanh %50 : vector<8x128xf32>
    %52 = arith.mulf %47, %51 : vector<8x128xf32>
    %53 = arith.index_cast %21 : i32 to index
    %c0_27 = arith.constant 0 : index
    %c0_28 = arith.constant 0 : index
    %54 = vector.load %arg6[%53, %c0_27, %c0_28] : memref<8x8x128xf32, #tpu.memory_space<vmem>>, vector<1x8x128xf32>
    %55 = vector.shape_cast %54 : vector<1x8x128xf32> to vector<8x128xf32>
    %56 = vector.shape_cast %52 : vector<8x128xf32> to vector<1x8x128xf32>
    tpu.vector_store %arg6[%53, %c0_27, %c0_28], %56 {strides = array<i32>} : memref<8x8x128xf32, #tpu.memory_space<vmem>>, vector<1x8x128xf32>,
    %c1_i32 = arith.constant 1 : i32
    %c0_i32_29 = arith.constant 0 : i32
    %57 = arith.cmpi eq, %arg0, %c0_i32_29 : i32
    %c7_i32_30 = arith.constant 7 : i32
    %58 = arith.subi %c7_i32_30, %c1_i32 : i32
    %59 = arith.select %57, %c1_i32, %58 : i32
    %60 = arith.index_cast %59 : i32 to index
    %c0_31 = arith.constant 0 : index
    %c0_32 = arith.constant 0 : index
    %61 = vector.load %arg7[%60, %c0_31, %c0_32] : memref<8x8x512xf32, #tpu.memory_space<vmem>>, vector<1x8x512xf32>
    %62 = vector.shape_cast %61 : vector<1x8x512xf32> to vector<8x512xf32>
    %63 = arith.truncf %52 : vector<8x128xf32> to vector<8x128xbf16>
    %cst_33 = arith.constant dense<0.000000e+00> : vector<8x512xf32>
    %64 = tpu.matmul %63, %16, %cst_33 {dimension_numbers = #tpu.dot_dimension_numbers<[1], [0], [0], [1], [0, 0, 1, 1], [], []>} : vector<8x128xbf16>, vector<128x512xbf16>, vector<8x512xf32> -> vector<8x512xf32>
    %65 = arith.addf %62, %64 : vector<8x512xf32>
    %66 = vector.extract_strided_slice %65 {offsets = [0, 0], sizes = [8, 128], strides = [1, 1]} : vector<8x512xf32> to vector<8x128xf32>
    %67 = arith.negf %66 : vector<8x128xf32>
    %68 = math.exp %67 : vector<8x128xf32>
    %cst_34 = arith.constant 1.000000e+00 : f32
    %69 = vector.broadcast %cst_34 : f32 to vector<8x128xf32>
    %70 = arith.addf %69, %68 : vector<8x128xf32>
    %71 = arith.divf %69, %70 : vector<8x128xf32>
    %72 = vector.extract_strided_slice %65 {offsets = [0, 128], sizes = [8, 128], strides = [1, 1]} : vector<8x512xf32> to vector<8x128xf32>
    %73 = arith.negf %72 : vector<8x128xf32>
    %74 = math.exp %73 : vector<8x128xf32>
    %cst_35 = arith.constant 1.000000e+00 : f32
    %75 = vector.broadcast %cst_35 : f32 to vector<8x128xf32>
    %76 = arith.addf %75, %74 : vector<8x128xf32>
    %77 = arith.divf %75, %76 : vector<8x128xf32>
    %78 = vector.extract_strided_slice %65 {offsets = [0, 256], sizes = [8, 128], strides = [1, 1]} : vector<8x512xf32> to vector<8x128xf32>
    %79 = math.tanh %78 : vector<8x128xf32>
    %80 = vector.extract_strided_slice %65 {offsets = [0, 384], sizes = [8, 128], strides = [1, 1]} : vector<8x512xf32> to vector<8x128xf32>
    %81 = arith.negf %80 : vector<8x128xf32>
    %82 = math.exp %81 : vector<8x128xf32>
    %cst_36 = arith.constant 1.000000e+00 : f32
    %83 = vector.broadcast %cst_36 : f32 to vector<8x128xf32>
    %84 = arith.addf %83, %82 : vector<8x128xf32>
    %85 = arith.divf %83, %84 : vector<8x128xf32>
    %86 = arith.mulf %77, %50 : vector<8x128xf32>
    %87 = arith.mulf %71, %79 : vector<8x128xf32>
    %88 = arith.addf %86, %87 : vector<8x128xf32>
    %89 = math.tanh %88 : vector<8x128xf32>
    %90 = arith.mulf %85, %89 : vector<8x128xf32>
    %91 = arith.index_cast %59 : i32 to index
    %c0_37 = arith.constant 0 : index
    %c0_38 = arith.constant 0 : index
    %92 = vector.load %arg6[%91, %c0_37, %c0_38] : memref<8x8x128xf32, #tpu.memory_space<vmem>>, vector<1x8x128xf32>
    %93 = vector.shape_cast %92 : vector<1x8x128xf32> to vector<8x128xf32>
    %94 = vector.shape_cast %90 : vector<8x128xf32> to vector<1x8x128xf32>
    tpu.vector_store %arg6[%91, %c0_37, %c0_38], %94 {strides = array<i32>} : memref<8x8x128xf32, #tpu.memory_space<vmem>>, vector<1x8x128xf32>,
    %c2_i32 = arith.constant 2 : i32
    %c0_i32_39 = arith.constant 0 : i32
    %95 = arith.cmpi eq, %arg0, %c0_i32_39 : i32
    %c7_i32_40 = arith.constant 7 : i32
    %96 = arith.subi %c7_i32_40, %c2_i32 : i32
    %97 = arith.select %95, %c2_i32, %96 : i32
    %98 = arith.index_cast %97 : i32 to index
    %c0_41 = arith.constant 0 : index
    %c0_42 = arith.constant 0 : index
    %99 = vector.load %arg7[%98, %c0_41, %c0_42] : memref<8x8x512xf32, #tpu.memory_space<vmem>>, vector<1x8x512xf32>
    %100 = vector.shape_cast %99 : vector<1x8x512xf32> to vector<8x512xf32>
    %101 = arith.truncf %90 : vector<8x128xf32> to vector<8x128xbf16>
    %cst_43 = arith.constant dense<0.000000e+00> : vector<8x512xf32>
    %102 = tpu.matmul %101, %16, %cst_43 {dimension_numbers = #tpu.dot_dimension_numbers<[1], [0], [0], [1], [0, 0, 1, 1], [], []>} : vector<8x128xbf16>, vector<128x512xbf16>, vector<8x512xf32> -> vector<8x512xf32>
    %103 = arith.addf %100, %102 : vector<8x512xf32>
    %104 = vector.extract_strided_slice %103 {offsets = [0, 0], sizes = [8, 128], strides = [1, 1]} : vector<8x512xf32> to vector<8x128xf32>
    %105 = arith.negf %104 : vector<8x128xf32>
    %106 = math.exp %105 : vector<8x128xf32>
    %cst_44 = arith.constant 1.000000e+00 : f32
    %107 = vector.broadcast %cst_44 : f32 to vector<8x128xf32>
    %108 = arith.addf %107, %106 : vector<8x128xf32>
    %109 = arith.divf %107, %108 : vector<8x128xf32>
    %110 = vector.extract_strided_slice %103 {offsets = [0, 128], sizes = [8, 128], strides = [1, 1]} : vector<8x512xf32> to vector<8x128xf32>
    %111 = arith.negf %110 : vector<8x128xf32>
    %112 = math.exp %111 : vector<8x128xf32>
    %cst_45 = arith.constant 1.000000e+00 : f32
    %113 = vector.broadcast %cst_45 : f32 to vector<8x128xf32>
    %114 = arith.addf %113, %112 : vector<8x128xf32>
    %115 = arith.divf %113, %114 : vector<8x128xf32>
    %116 = vector.extract_strided_slice %103 {offsets = [0, 256], sizes = [8, 128], strides = [1, 1]} : vector<8x512xf32> to vector<8x128xf32>
    %117 = math.tanh %116 : vector<8x128xf32>
    %118 = vector.extract_strided_slice %103 {offsets = [0, 384], sizes = [8, 128], strides = [1, 1]} : vector<8x512xf32> to vector<8x128xf32>
    %119 = arith.negf %118 : vector<8x128xf32>
    %120 = math.exp %119 : vector<8x128xf32>
    %cst_46 = arith.constant 1.000000e+00 : f32
    %121 = vector.broadcast %cst_46 : f32 to vector<8x128xf32>
    %122 = arith.addf %121, %120 : vector<8x128xf32>
    %123 = arith.divf %121, %122 : vector<8x128xf32>
    %124 = arith.mulf %115, %88 : vector<8x128xf32>
    %125 = arith.mulf %109, %117 : vector<8x128xf32>
    %126 = arith.addf %124, %125 : vector<8x128xf32>
    %127 = math.tanh %126 : vector<8x128xf32>
    %128 = arith.mulf %123, %127 : vector<8x128xf32>
    %129 = arith.index_cast %97 : i32 to index
    %c0_47 = arith.constant 0 : index
    %c0_48 = arith.constant 0 : index
    %130 = vector.load %arg6[%129, %c0_47, %c0_48] : memref<8x8x128xf32, #tpu.memory_space<vmem>>, vector<1x8x128xf32>
    %131 = vector.shape_cast %130 : vector<1x8x128xf32> to vector<8x128xf32>
    %132 = vector.shape_cast %128 : vector<8x128xf32> to vector<1x8x128xf32>
    tpu.vector_store %arg6[%129, %c0_47, %c0_48], %132 {strides = array<i32>} : memref<8x8x128xf32, #tpu.memory_space<vmem>>, vector<1x8x128xf32>,
    %c3_i32 = arith.constant 3 : i32
    %c0_i32_49 = arith.constant 0 : i32
    %133 = arith.cmpi eq, %arg0, %c0_i32_49 : i32
    %c7_i32_50 = arith.constant 7 : i32
    %134 = arith.subi %c7_i32_50, %c3_i32 : i32
    %135 = arith.select %133, %c3_i32, %134 : i32
    %136 = arith.index_cast %135 : i32 to index
    %c0_51 = arith.constant 0 : index
    %c0_52 = arith.constant 0 : index
    %137 = vector.load %arg7[%136, %c0_51, %c0_52] : memref<8x8x512xf32, #tpu.memory_space<vmem>>, vector<1x8x512xf32>
    %138 = vector.shape_cast %137 : vector<1x8x512xf32> to vector<8x512xf32>
    %139 = arith.truncf %128 : vector<8x128xf32> to vector<8x128xbf16>
    %cst_53 = arith.constant dense<0.000000e+00> : vector<8x512xf32>
    %140 = tpu.matmul %139, %16, %cst_53 {dimension_numbers = #tpu.dot_dimension_numbers<[1], [0], [0], [1], [0, 0, 1, 1], [], []>} : vector<8x128xbf16>, vector<128x512xbf16>, vector<8x512xf32> -> vector<8x512xf32>
    %141 = arith.addf %138, %140 : vector<8x512xf32>
    %142 = vector.extract_strided_slice %141 {offsets = [0, 0], sizes = [8, 128], strides = [1, 1]} : vector<8x512xf32> to vector<8x128xf32>
    %143 = arith.negf %142 : vector<8x128xf32>
    %144 = math.exp %143 : vector<8x128xf32>
    %cst_54 = arith.constant 1.000000e+00 : f32
    %145 = vector.broadcast %cst_54 : f32 to vector<8x128xf32>
    %146 = arith.addf %145, %144 : vector<8x128xf32>
    %147 = arith.divf %145, %146 : vector<8x128xf32>
    %148 = vector.extract_strided_slice %141 {offsets = [0, 128], sizes = [8, 128], strides = [1, 1]} : vector<8x512xf32> to vector<8x128xf32>
    %149 = arith.negf %148 : vector<8x128xf32>
    %150 = math.exp %149 : vector<8x128xf32>
    %cst_55 = arith.constant 1.000000e+00 : f32
    %151 = vector.broadcast %cst_55 : f32 to vector<8x128xf32>
    %152 = arith.addf %151, %150 : vector<8x128xf32>
    %153 = arith.divf %151, %152 : vector<8x128xf32>
    %154 = vector.extract_strided_slice %141 {offsets = [0, 256], sizes = [8, 128], strides = [1, 1]} : vector<8x512xf32> to vector<8x128xf32>
    %155 = math.tanh %154 : vector<8x128xf32>
    %156 = vector.extract_strided_slice %141 {offsets = [0, 384], sizes = [8, 128], strides = [1, 1]} : vector<8x512xf32> to vector<8x128xf32>
    %157 = arith.negf %156 : vector<8x128xf32>
    %158 = math.exp %157 : vector<8x128xf32>
    %cst_56 = arith.constant 1.000000e+00 : f32
    %159 = vector.broadcast %cst_56 : f32 to vector<8x128xf32>
    %160 = arith.addf %159, %158 : vector<8x128xf32>
    %161 = arith.divf %159, %160 : vector<8x128xf32>
    %162 = arith.mulf %153, %126 : vector<8x128xf32>
    %163 = arith.mulf %147, %155 : vector<8x128xf32>
    %164 = arith.addf %162, %163 : vector<8x128xf32>
    %165 = math.tanh %164 : vector<8x128xf32>
    %166 = arith.mulf %161, %165 : vector<8x128xf32>
    %167 = arith.index_cast %135 : i32 to index
    %c0_57 = arith.constant 0 : index
    %c0_58 = arith.constant 0 : index
    %168 = vector.load %arg6[%167, %c0_57, %c0_58] : memref<8x8x128xf32, #tpu.memory_space<vmem>>, vector<1x8x128xf32>
    %169 = vector.shape_cast %168 : vector<1x8x128xf32> to vector<8x128xf32>
    %170 = vector.shape_cast %166 : vector<8x128xf32> to vector<1x8x128xf32>
    tpu.vector_store %arg6[%167, %c0_57, %c0_58], %170 {strides = array<i32>} : memref<8x8x128xf32, #tpu.memory_space<vmem>>, vector<1x8x128xf32>,
    %c4_i32 = arith.constant 4 : i32
    %c0_i32_59 = arith.constant 0 : i32
    %171 = arith.cmpi eq, %arg0, %c0_i32_59 : i32
    %c7_i32_60 = arith.constant 7 : i32
    %172 = arith.subi %c7_i32_60, %c4_i32 : i32
    %173 = arith.select %171, %c4_i32, %172 : i32
    %174 = arith.index_cast %173 : i32 to index
    %c0_61 = arith.constant 0 : index
    %c0_62 = arith.constant 0 : index
    %175 = vector.load %arg7[%174, %c0_61, %c0_62] : memref<8x8x512xf32, #tpu.memory_space<vmem>>, vector<1x8x512xf32>
    %176 = vector.shape_cast %175 : vector<1x8x512xf32> to vector<8x512xf32>
    %177 = arith.truncf %166 : vector<8x128xf32> to vector<8x128xbf16>
    %cst_63 = arith.constant dense<0.000000e+00> : vector<8x512xf32>
    %178 = tpu.matmul %177, %16, %cst_63 {dimension_numbers = #tpu.dot_dimension_numbers<[1], [0], [0], [1], [0, 0, 1, 1], [], []>} : vector<8x128xbf16>, vector<128x512xbf16>, vector<8x512xf32> -> vector<8x512xf32>
    %179 = arith.addf %176, %178 : vector<8x512xf32>
    %180 = vector.extract_strided_slice %179 {offsets = [0, 0], sizes = [8, 128], strides = [1, 1]} : vector<8x512xf32> to vector<8x128xf32>
    %181 = arith.negf %180 : vector<8x128xf32>
    %182 = math.exp %181 : vector<8x128xf32>
    %cst_64 = arith.constant 1.000000e+00 : f32
    %183 = vector.broadcast %cst_64 : f32 to vector<8x128xf32>
    %184 = arith.addf %183, %182 : vector<8x128xf32>
    %185 = arith.divf %183, %184 : vector<8x128xf32>
    %186 = vector.extract_strided_slice %179 {offsets = [0, 128], sizes = [8, 128], strides = [1, 1]} : vector<8x512xf32> to vector<8x128xf32>
    %187 = arith.negf %186 : vector<8x128xf32>
    %188 = math.exp %187 : vector<8x128xf32>
    %cst_65 = arith.constant 1.000000e+00 : f32
    %189 = vector.broadcast %cst_65 : f32 to vector<8x128xf32>
    %190 = arith.addf %189, %188 : vector<8x128xf32>
    %191 = arith.divf %189, %190 : vector<8x128xf32>
    %192 = vector.extract_strided_slice %179 {offsets = [0, 256], sizes = [8, 128], strides = [1, 1]} : vector<8x512xf32> to vector<8x128xf32>
    %193 = math.tanh %192 : vector<8x128xf32>
    %194 = vector.extract_strided_slice %179 {offsets = [0, 384], sizes = [8, 128], strides = [1, 1]} : vector<8x512xf32> to vector<8x128xf32>
    %195 = arith.negf %194 : vector<8x128xf32>
    %196 = math.exp %195 : vector<8x128xf32>
    %cst_66 = arith.constant 1.000000e+00 : f32
    %197 = vector.broadcast %cst_66 : f32 to vector<8x128xf32>
    %198 = arith.addf %197, %196 : vector<8x128xf32>
    %199 = arith.divf %197, %198 : vector<8x128xf32>
    %200 = arith.mulf %191, %164 : vector<8x128xf32>
    %201 = arith.mulf %185, %193 : vector<8x128xf32>
    %202 = arith.addf %200, %201 : vector<8x128xf32>
    %203 = math.tanh %202 : vector<8x128xf32>
    %204 = arith.mulf %199, %203 : vector<8x128xf32>
    %205 = arith.index_cast %173 : i32 to index
    %c0_67 = arith.constant 0 : index
    %c0_68 = arith.constant 0 : index
    %206 = vector.load %arg6[%205, %c0_67, %c0_68] : memref<8x8x128xf32, #tpu.memory_space<vmem>>, vector<1x8x128xf32>
    %207 = vector.shape_cast %206 : vector<1x8x128xf32> to vector<8x128xf32>
    %208 = vector.shape_cast %204 : vector<8x128xf32> to vector<1x8x128xf32>
    tpu.vector_store %arg6[%205, %c0_67, %c0_68], %208 {strides = array<i32>} : memref<8x8x128xf32, #tpu.memory_space<vmem>>, vector<1x8x128xf32>,
    %c5_i32 = arith.constant 5 : i32
    %c0_i32_69 = arith.constant 0 : i32
    %209 = arith.cmpi eq, %arg0, %c0_i32_69 : i32
    %c7_i32_70 = arith.constant 7 : i32
    %210 = arith.subi %c7_i32_70, %c5_i32 : i32
    %211 = arith.select %209, %c5_i32, %210 : i32
    %212 = arith.index_cast %211 : i32 to index
    %c0_71 = arith.constant 0 : index
    %c0_72 = arith.constant 0 : index
    %213 = vector.load %arg7[%212, %c0_71, %c0_72] : memref<8x8x512xf32, #tpu.memory_space<vmem>>, vector<1x8x512xf32>
    %214 = vector.shape_cast %213 : vector<1x8x512xf32> to vector<8x512xf32>
    %215 = arith.truncf %204 : vector<8x128xf32> to vector<8x128xbf16>
    %cst_73 = arith.constant dense<0.000000e+00> : vector<8x512xf32>
    %216 = tpu.matmul %215, %16, %cst_73 {dimension_numbers = #tpu.dot_dimension_numbers<[1], [0], [0], [1], [0, 0, 1, 1], [], []>} : vector<8x128xbf16>, vector<128x512xbf16>, vector<8x512xf32> -> vector<8x512xf32>
    %217 = arith.addf %214, %216 : vector<8x512xf32>
    %218 = vector.extract_strided_slice %217 {offsets = [0, 0], sizes = [8, 128], strides = [1, 1]} : vector<8x512xf32> to vector<8x128xf32>
    %219 = arith.negf %218 : vector<8x128xf32>
    %220 = math.exp %219 : vector<8x128xf32>
    %cst_74 = arith.constant 1.000000e+00 : f32
    %221 = vector.broadcast %cst_74 : f32 to vector<8x128xf32>
    %222 = arith.addf %221, %220 : vector<8x128xf32>
    %223 = arith.divf %221, %222 : vector<8x128xf32>
    %224 = vector.extract_strided_slice %217 {offsets = [0, 128], sizes = [8, 128], strides = [1, 1]} : vector<8x512xf32> to vector<8x128xf32>
    %225 = arith.negf %224 : vector<8x128xf32>
    %226 = math.exp %225 : vector<8x128xf32>
    %cst_75 = arith.constant 1.000000e+00 : f32
    %227 = vector.broadcast %cst_75 : f32 to vector<8x128xf32>
    %228 = arith.addf %227, %226 : vector<8x128xf32>
    %229 = arith.divf %227, %228 : vector<8x128xf32>
    %230 = vector.extract_strided_slice %217 {offsets = [0, 256], sizes = [8, 128], strides = [1, 1]} : vector<8x512xf32> to vector<8x128xf32>
    %231 = math.tanh %230 : vector<8x128xf32>
    %232 = vector.extract_strided_slice %217 {offsets = [0, 384], sizes = [8, 128], strides = [1, 1]} : vector<8x512xf32> to vector<8x128xf32>
    %233 = arith.negf %232 : vector<8x128xf32>
    %234 = math.exp %233 : vector<8x128xf32>
    %cst_76 = arith.constant 1.000000e+00 : f32
    %235 = vector.broadcast %cst_76 : f32 to vector<8x128xf32>
    %236 = arith.addf %235, %234 : vector<8x128xf32>
    %237 = arith.divf %235, %236 : vector<8x128xf32>
    %238 = arith.mulf %229, %202 : vector<8x128xf32>
    %239 = arith.mulf %223, %231 : vector<8x128xf32>
    %240 = arith.addf %238, %239 : vector<8x128xf32>
    %241 = math.tanh %240 : vector<8x128xf32>
    %242 = arith.mulf %237, %241 : vector<8x128xf32>
    %243 = arith.index_cast %211 : i32 to index
    %c0_77 = arith.constant 0 : index
    %c0_78 = arith.constant 0 : index
    %244 = vector.load %arg6[%243, %c0_77, %c0_78] : memref<8x8x128xf32, #tpu.memory_space<vmem>>, vector<1x8x128xf32>
    %245 = vector.shape_cast %244 : vector<1x8x128xf32> to vector<8x128xf32>
    %246 = vector.shape_cast %242 : vector<8x128xf32> to vector<1x8x128xf32>
    tpu.vector_store %arg6[%243, %c0_77, %c0_78], %246 {strides = array<i32>} : memref<8x8x128xf32, #tpu.memory_space<vmem>>, vector<1x8x128xf32>,
    %c6_i32 = arith.constant 6 : i32
    %c0_i32_79 = arith.constant 0 : i32
    %247 = arith.cmpi eq, %arg0, %c0_i32_79 : i32
    %c7_i32_80 = arith.constant 7 : i32
    %248 = arith.subi %c7_i32_80, %c6_i32 : i32
    %249 = arith.select %247, %c6_i32, %248 : i32
    %250 = arith.index_cast %249 : i32 to index
    %c0_81 = arith.constant 0 : index
    %c0_82 = arith.constant 0 : index
    %251 = vector.load %arg7[%250, %c0_81, %c0_82] : memref<8x8x512xf32, #tpu.memory_space<vmem>>, vector<1x8x512xf32>
    %252 = vector.shape_cast %251 : vector<1x8x512xf32> to vector<8x512xf32>
    %253 = arith.truncf %242 : vector<8x128xf32> to vector<8x128xbf16>
    %cst_83 = arith.constant dense<0.000000e+00> : vector<8x512xf32>
    %254 = tpu.matmul %253, %16, %cst_83 {dimension_numbers = #tpu.dot_dimension_numbers<[1], [0], [0], [1], [0, 0, 1, 1], [], []>} : vector<8x128xbf16>, vector<128x512xbf16>, vector<8x512xf32> -> vector<8x512xf32>
    %255 = arith.addf %252, %254 : vector<8x512xf32>
    %256 = vector.extract_strided_slice %255 {offsets = [0, 0], sizes = [8, 128], strides = [1, 1]} : vector<8x512xf32> to vector<8x128xf32>
    %257 = arith.negf %256 : vector<8x128xf32>
    %258 = math.exp %257 : vector<8x128xf32>
    %cst_84 = arith.constant 1.000000e+00 : f32
    %259 = vector.broadcast %cst_84 : f32 to vector<8x128xf32>
    %260 = arith.addf %259, %258 : vector<8x128xf32>
    %261 = arith.divf %259, %260 : vector<8x128xf32>
    %262 = vector.extract_strided_slice %255 {offsets = [0, 128], sizes = [8, 128], strides = [1, 1]} : vector<8x512xf32> to vector<8x128xf32>
    %263 = arith.negf %262 : vector<8x128xf32>
    %264 = math.exp %263 : vector<8x128xf32>
    %cst_85 = arith.constant 1.000000e+00 : f32
    %265 = vector.broadcast %cst_85 : f32 to vector<8x128xf32>
    %266 = arith.addf %265, %264 : vector<8x128xf32>
    %267 = arith.divf %265, %266 : vector<8x128xf32>
    %268 = vector.extract_strided_slice %255 {offsets = [0, 256], sizes = [8, 128], strides = [1, 1]} : vector<8x512xf32> to vector<8x128xf32>
    %269 = math.tanh %268 : vector<8x128xf32>
    %270 = vector.extract_strided_slice %255 {offsets = [0, 384], sizes = [8, 128], strides = [1, 1]} : vector<8x512xf32> to vector<8x128xf32>
    %271 = arith.negf %270 : vector<8x128xf32>
    %272 = math.exp %271 : vector<8x128xf32>
    %cst_86 = arith.constant 1.000000e+00 : f32
    %273 = vector.broadcast %cst_86 : f32 to vector<8x128xf32>
    %274 = arith.addf %273, %272 : vector<8x128xf32>
    %275 = arith.divf %273, %274 : vector<8x128xf32>
    %276 = arith.mulf %267, %240 : vector<8x128xf32>
    %277 = arith.mulf %261, %269 : vector<8x128xf32>
    %278 = arith.addf %276, %277 : vector<8x128xf32>
    %279 = math.tanh %278 : vector<8x128xf32>
    %280 = arith.mulf %275, %279 : vector<8x128xf32>
    %281 = arith.index_cast %249 : i32 to index
    %c0_87 = arith.constant 0 : index
    %c0_88 = arith.constant 0 : index
    %282 = vector.load %arg6[%281, %c0_87, %c0_88] : memref<8x8x128xf32, #tpu.memory_space<vmem>>, vector<1x8x128xf32>
    %283 = vector.shape_cast %282 : vector<1x8x128xf32> to vector<8x128xf32>
    %284 = vector.shape_cast %280 : vector<8x128xf32> to vector<1x8x128xf32>
    tpu.vector_store %arg6[%281, %c0_87, %c0_88], %284 {strides = array<i32>} : memref<8x8x128xf32, #tpu.memory_space<vmem>>, vector<1x8x128xf32>,
    %c7_i32_89 = arith.constant 7 : i32
    %c0_i32_90 = arith.constant 0 : i32
    %285 = arith.cmpi eq, %arg0, %c0_i32_90 : i32
    %c7_i32_91 = arith.constant 7 : i32
    %286 = arith.subi %c7_i32_91, %c7_i32_89 : i32
    %287 = arith.select %285, %c7_i32_89, %286 : i32
    %288 = arith.index_cast %287 : i32 to index
    %c0_92 = arith.constant 0 : index
    %c0_93 = arith.constant 0 : index
    %289 = vector.load %arg7[%288, %c0_92, %c0_93] : memref<8x8x512xf32, #tpu.memory_space<vmem>>, vector<1x8x512xf32>
    %290 = vector.shape_cast %289 : vector<1x8x512xf32> to vector<8x512xf32>
    %291 = arith.truncf %280 : vector<8x128xf32> to vector<8x128xbf16>
    %cst_94 = arith.constant dense<0.000000e+00> : vector<8x512xf32>
    %292 = tpu.matmul %291, %16, %cst_94 {dimension_numbers = #tpu.dot_dimension_numbers<[1], [0], [0], [1], [0, 0, 1, 1], [], []>} : vector<8x128xbf16>, vector<128x512xbf16>, vector<8x512xf32> -> vector<8x512xf32>
    %293 = arith.addf %290, %292 : vector<8x512xf32>
    %294 = vector.extract_strided_slice %293 {offsets = [0, 0], sizes = [8, 128], strides = [1, 1]} : vector<8x512xf32> to vector<8x128xf32>
    %295 = arith.negf %294 : vector<8x128xf32>
    %296 = math.exp %295 : vector<8x128xf32>
    %cst_95 = arith.constant 1.000000e+00 : f32
    %297 = vector.broadcast %cst_95 : f32 to vector<8x128xf32>
    %298 = arith.addf %297, %296 : vector<8x128xf32>
    %299 = arith.divf %297, %298 : vector<8x128xf32>
    %300 = vector.extract_strided_slice %293 {offsets = [0, 128], sizes = [8, 128], strides = [1, 1]} : vector<8x512xf32> to vector<8x128xf32>
    %301 = arith.negf %300 : vector<8x128xf32>
    %302 = math.exp %301 : vector<8x128xf32>
    %cst_96 = arith.constant 1.000000e+00 : f32
    %303 = vector.broadcast %cst_96 : f32 to vector<8x128xf32>
    %304 = arith.addf %303, %302 : vector<8x128xf32>
    %305 = arith.divf %303, %304 : vector<8x128xf32>
    %306 = vector.extract_strided_slice %293 {offsets = [0, 256], sizes = [8, 128], strides = [1, 1]} : vector<8x512xf32> to vector<8x128xf32>
    %307 = math.tanh %306 : vector<8x128xf32>
    %308 = vector.extract_strided_slice %293 {offsets = [0, 384], sizes = [8, 128], strides = [1, 1]} : vector<8x512xf32> to vector<8x128xf32>
    %309 = arith.negf %308 : vector<8x128xf32>
    %310 = math.exp %309 : vector<8x128xf32>
    %cst_97 = arith.constant 1.000000e+00 : f32
    %311 = vector.broadcast %cst_97 : f32 to vector<8x128xf32>
    %312 = arith.addf %311, %310 : vector<8x128xf32>
    %313 = arith.divf %311, %312 : vector<8x128xf32>
    %314 = arith.mulf %305, %278 : vector<8x128xf32>
    %315 = arith.mulf %299, %307 : vector<8x128xf32>
    %316 = arith.addf %314, %315 : vector<8x128xf32>
    %317 = math.tanh %316 : vector<8x128xf32>
    %318 = arith.mulf %313, %317 : vector<8x128xf32>
    %319 = arith.index_cast %287 : i32 to index
    %c0_98 = arith.constant 0 : index
    %c0_99 = arith.constant 0 : index
    %320 = vector.load %arg6[%319, %c0_98, %c0_99] : memref<8x8x128xf32, #tpu.memory_space<vmem>>, vector<1x8x128xf32>
    %321 = vector.shape_cast %320 : vector<1x8x128xf32> to vector<8x128xf32>
    %322 = vector.shape_cast %318 : vector<8x128xf32> to vector<1x8x128xf32>
    tpu.vector_store %arg6[%319, %c0_98, %c0_99], %322 {strides = array<i32>} : memref<8x8x128xf32, #tpu.memory_space<vmem>>, vector<1x8x128xf32>,
    %c8_i32 = arith.constant 8 : i32
    %c0_100 = arith.constant 0 : index
    %c0_101 = arith.constant 0 : index
    %323 = vector.load %arg8[%c0_100, %c0_101] : memref<8x128xf32, #tpu.memory_space<vmem>>, vector<8x128xf32>
    tpu.vector_store %arg8[%c0_100, %c0_101], %318 {strides = array<i32>} : memref<8x128xf32, #tpu.memory_space<vmem>>, vector<8x128xf32>,
    %c0_102 = arith.constant 0 : index
    %c0_103 = arith.constant 0 : index
    %324 = vector.load %arg9[%c0_102, %c0_103] : memref<8x128xf32, #tpu.memory_space<vmem>>, vector<8x128xf32>
    tpu.vector_store %arg9[%c0_102, %c0_103], %316 {strides = array<i32>} : memref<8x128xf32, #tpu.memory_space<vmem>>, vector<8x128xf32>,
    return
  }
  func.func @transform_0(%arg0: i32, %arg1: i32) -> (i32, i32, i32) {
    %c0_i32 = arith.constant 0 : i32
    %0 = arith.cmpi eq, %arg0, %c0_i32 : i32
    %c0_i32_0 = arith.constant 0 : i32
    %1 = arith.subi %c0_i32_0, %arg1 : i32
    %2 = arith.select %0, %arg1, %1 : i32
    %c0_i32_1 = arith.constant 0 : i32
    %c0_i32_2 = arith.constant 0 : i32
    %c0_i32_3 = arith.constant 0 : i32
    return %2, %c0_i32_1, %c0_i32_2 : i32, i32, i32
  }
  func.func @transform_1(%arg0: i32, %arg1: i32) -> (i32, i32, i32) {
    %c0_i32 = arith.constant 0 : i32
    %c0_i32_0 = arith.constant 0 : i32
    %c0_i32_1 = arith.constant 0 : i32
    return %arg0, %c0_i32, %c0_i32_0 : i32, i32, i32
  }
  func.func @transform_2(%arg0: i32, %arg1: i32) -> (i32, i32, i32) {
    %c0_i32 = arith.constant 0 : i32
    %c0_i32_0 = arith.constant 0 : i32
    %c0_i32_1 = arith.constant 0 : i32
    return %arg0, %c0_i32, %c0_i32_0 : i32, i32, i32
  }
  func.func @transform_3(%arg0: i32, %arg1: i32) -> (i32, i32, i32) {
    %c0_i32 = arith.constant 0 : i32
    %c0_i32_0 = arith.constant 0 : i32
    %c0_i32_1 = arith.constant 0 : i32
    return %arg0, %c0_i32, %c0_i32_0 : i32, i32, i32
  }
  func.func @transform_4(%arg0: i32, %arg1: i32) -> (i32, i32, i32) {
    %c0_i32 = arith.constant 0 : i32
    %0 = arith.cmpi eq, %arg0, %c0_i32 : i32
    %c0_i32_0 = arith.constant 0 : i32
    %1 = arith.subi %c0_i32_0, %arg1 : i32
    %2 = arith.select %0, %arg1, %1 : i32
    %c0_i32_1 = arith.constant 0 : i32
    %c0_i32_2 = arith.constant 0 : i32
    return %2, %c0_i32_1, %arg0 : i32, i32, i32
  }
}

module attributes {stable_mosaic.version = 11 : i64} {
  func.func @_lstm_bidir_kernel(%arg0: i32, %arg1: i32, %arg2: memref<8x8x16xf32, #tpu.memory_space<vmem>>, %arg3: memref<1x16x512xbf16, #tpu.memory_space<vmem>>, %arg4: memref<1x128x512xbf16, #tpu.memory_space<vmem>>, %arg5: memref<1x1x512xf32, #tpu.memory_space<vmem>>, %arg6: memref<8x8x128xf32, #tpu.memory_space<vmem>>, %arg7: memref<8x8x512xf32, #tpu.memory_space<vmem>>, %arg8: memref<8x128xf32, #tpu.memory_space<vmem>>, %arg9: memref<8x128xf32, #tpu.memory_space<vmem>>) attributes {dimension_semantics = [#tpu.dimension_semantics<parallel>, #tpu.dimension_semantics<arbitrary>], iteration_bounds = array<i64: 2, 1>, scalar_prefetch = 0 : i64, scratch_operands = 3 : i64, tpu.core_type = #tpu.core_type<tc>, window_params = [{transform_indices = @transform_0, window_bounds = array<i64: 8, 8, 16>}, {transform_indices = @transform_1, window_bounds = array<i64: 1, 16, 512>}, {transform_indices = @transform_2, window_bounds = array<i64: 1, 128, 512>}, {transform_indices = @transform_3, window_bounds = array<i64: 1, 1, 512>}, {transform_indices = @transform_4, window_bounds = array<i64: 8, 8, 128>}]} {
    %c0_i32 = arith.constant 0 : i32
    %0 = arith.cmpi eq, %arg1, %c0_i32 : i32
    %1 = arith.extui %0 : i1 to i32
    %c0_i32_0 = arith.constant 0 : i32
    %2 = arith.cmpi ne, %1, %c0_i32_0 : i32
    scf.if %2 {
      %cst_104 = arith.constant 0.000000e+00 : f32
      %325 = vector.broadcast %cst_104 : f32 to vector<8x128xf32>
      %c0_105 = arith.constant 0 : index
      %c0_106 = arith.constant 0 : index
      %326 = vector.load %arg8[%c0_105, %c0_106] : memref<8x128xf32, #tpu.memory_space<vmem>>, vector<8x128xf32>
      tpu.vector_store %arg8[%c0_105, %c0_106], %325 {strides = array<i32>} : memref<8x128xf32, #tpu.memory_space<vmem>>, vector<8x128xf32>,
      %cst_107 = arith.constant 0.000000e+00 : f32
      %327 = vector.broadcast %cst_107 : f32 to vector<8x128xf32>
      %c0_108 = arith.constant 0 : index
      %c0_109 = arith.constant 0 : index
      %328 = vector.load %arg9[%c0_108, %c0_109] : memref<8x128xf32, #tpu.memory_space<vmem>>, vector<8x128xf32>
      tpu.vector_store %arg9[%c0_108, %c0_109], %327 {strides = array<i32>} : memref<8x128xf32, #tpu.memory_space<vmem>>, vector<8x128xf32>,
    } else {
    }
    %c0 = arith.constant 0 : index
    %c0_1 = arith.constant 0 : index
    %c0_2 = arith.constant 0 : index
    %3 = vector.load %arg2[%c0, %c0_1, %c0_2] : memref<8x8x16xf32, #tpu.memory_space<vmem>>, vector<8x8x16xf32>
    %4 = vector.shape_cast %3 : vector<8x8x16xf32> to vector<64x16xf32>
    %5 = arith.truncf %4 : vector<64x16xf32> to vector<64x16xbf16>
    %c0_3 = arith.constant 0 : index
    %c0_4 = arith.constant 0 : index
    %c0_5 = arith.constant 0 : index
    %6 = vector.load %arg3[%c0_3, %c0_4, %c0_5] : memref<1x16x512xbf16, #tpu.memory_space<vmem>>, vector<1x16x512xbf16>
    %7 = vector.shape_cast %6 : vector<1x16x512xbf16> to vector<16x512xbf16>
    %cst = arith.constant dense<0.000000e+00> : vector<64x512xf32>
    %8 = tpu.matmul %5, %7, %cst {dimension_numbers = #tpu.dot_dimension_numbers<[1], [0], [0], [1], [0, 0, 1, 1], [], []>} : vector<64x16xbf16>, vector<16x512xbf16>, vector<64x512xf32> -> vector<64x512xf32>
    %c0_6 = arith.constant 0 : index
    %c0_7 = arith.constant 0 : index
    %c0_8 = arith.constant 0 : index
    %9 = vector.load %arg5[%c0_6, %c0_7, %c0_8] : memref<1x1x512xf32, #tpu.memory_space<vmem>>, vector<1x1x512xf32>
    %10 = vector.shape_cast %9 : vector<1x1x512xf32> to vector<1x512xf32>
    %11 = vector.broadcast %10 : vector<1x512xf32> to vector<64x512xf32>
    %12 = arith.addf %8, %11 : vector<64x512xf32>
    %13 = vector.shape_cast %12 : vector<64x512xf32> to vector<8x8x512xf32>
    %c0_9 = arith.constant 0 : index
    %c0_10 = arith.constant 0 : index
    %c0_11 = arith.constant 0 : index
    %14 = vector.load %arg7[%c0_9, %c0_10, %c0_11] : memref<8x8x512xf32, #tpu.memory_space<vmem>>, vector<8x8x512xf32>
    tpu.vector_store %arg7[%c0_9, %c0_10, %c0_11], %13 {strides = array<i32>} : memref<8x8x512xf32, #tpu.memory_space<vmem>>, vector<8x8x512xf32>,
    %c0_12 = arith.constant 0 : index
    %c0_13 = arith.constant 0 : index
    %c0_14 = arith.constant 0 : index
    %15 = vector.load %arg4[%c0_12, %c0_13, %c0_14] : memref<1x128x512xbf16, #tpu.memory_space<vmem>>, vector<1x128x512xbf16>
    %16 = vector.shape_cast %15 : vector<1x128x512xbf16> to vector<128x512xbf16>
    %c0_15 = arith.constant 0 : index
    %c0_16 = arith.constant 0 : index
    %17 = vector.load %arg8[%c0_15, %c0_16] : memref<8x128xf32, #tpu.memory_space<vmem>>, vector<8x128xf32>
    %c0_17 = arith.constant 0 : index
    %c0_18 = arith.constant 0 : index
    %18 = vector.load %arg9[%c0_17, %c0_18] : memref<8x128xf32, #tpu.memory_space<vmem>>, vector<8x128xf32>
    %c0_i32_19 = arith.constant 0 : i32
    %c0_i32_20 = arith.constant 0 : i32
    %19 = arith.cmpi eq, %arg0, %c0_i32_20 : i32
    %c7_i32 = arith.constant 7 : i32
    %20 = arith.subi %c7_i32, %c0_i32_19 : i32
    %21 = arith.select %19, %c0_i32_19, %20 : i32
    %22 = arith.index_cast %21 : i32 to index
    %c0_21 = arith.constant 0 : index
    %c0_22 = arith.constant 0 : index
    %23 = vector.load %arg7[%22, %c0_21, %c0_22] : memref<8x8x512xf32, #tpu.memory_space<vmem>>, vector<1x8x512xf32>
    %24 = vector.shape_cast %23 : vector<1x8x512xf32> to vector<8x512xf32>
    %25 = arith.truncf %17 : vector<8x128xf32> to vector<8x128xbf16>
    %cst_23 = arith.constant dense<0.000000e+00> : vector<8x512xf32>
    %26 = tpu.matmul %25, %16, %cst_23 {dimension_numbers = #tpu.dot_dimension_numbers<[1], [0], [0], [1], [0, 0, 1, 1], [], []>} : vector<8x128xbf16>, vector<128x512xbf16>, vector<8x512xf32> -> vector<8x512xf32>
    %27 = arith.addf %24, %26 : vector<8x512xf32>
    %28 = vector.extract_strided_slice %27 {offsets = [0, 0], sizes = [8, 128], strides = [1, 1]} : vector<8x512xf32> to vector<8x128xf32>
    %29 = arith.negf %28 : vector<8x128xf32>
    %30 = math.exp %29 : vector<8x128xf32>
    %cst_24 = arith.constant 1.000000e+00 : f32
    %31 = vector.broadcast %cst_24 : f32 to vector<8x128xf32>
    %32 = arith.addf %31, %30 : vector<8x128xf32>
    %33 = arith.divf %31, %32 : vector<8x128xf32>
    %34 = vector.extract_strided_slice %27 {offsets = [0, 128], sizes = [8, 128], strides = [1, 1]} : vector<8x512xf32> to vector<8x128xf32>
    %35 = arith.negf %34 : vector<8x128xf32>
    %36 = math.exp %35 : vector<8x128xf32>
    %cst_25 = arith.constant 1.000000e+00 : f32
    %37 = vector.broadcast %cst_25 : f32 to vector<8x128xf32>
    %38 = arith.addf %37, %36 : vector<8x128xf32>
    %39 = arith.divf %37, %38 : vector<8x128xf32>
    %40 = vector.extract_strided_slice %27 {offsets = [0, 256], sizes = [8, 128], strides = [1, 1]} : vector<8x512xf32> to vector<8x128xf32>
    %41 = math.tanh %40 : vector<8x128xf32>
    %42 = vector.extract_strided_slice %27 {offsets = [0, 384], sizes = [8, 128], strides = [1, 1]} : vector<8x512xf32> to vector<8x128xf32>
    %43 = arith.negf %42 : vector<8x128xf32>
    %44 = math.exp %43 : vector<8x128xf32>
    %cst_26 = arith.constant 1.000000e+00 : f32
    %45 = vector.broadcast %cst_26 : f32 to vector<8x128xf32>
    %46 = arith.addf %45, %44 : vector<8x128xf32>
    %47 = arith.divf %45, %46 : vector<8x128xf32>
    %48 = arith.mulf %39, %18 : vector<8x128xf32>
    %49 = arith.mulf %33, %41 : vector<8x128xf32>
    %50 = arith.addf %48, %49 : vector<8x128xf32>
    %51 = math.tanh %50 : vector<8x128xf32>
    %52 = arith.mulf %47, %51 : vector<8x128xf32>
    %53 = arith.index_cast %21 : i32 to index
    %c0_27 = arith.constant 0 : index
    %c0_28 = arith.constant 0 : index
    %54 = vector.load %arg6[%53, %c0_27, %c0_28] : memref<8x8x128xf32, #tpu.memory_space<vmem>>, vector<1x8x128xf32>
    %55 = vector.shape_cast %54 : vector<1x8x128xf32> to vector<8x128xf32>
    %56 = vector.shape_cast %52 : vector<8x128xf32> to vector<1x8x128xf32>
    tpu.vector_store %arg6[%53, %c0_27, %c0_28], %56 {strides = array<i32>} : memref<8x8x128xf32, #tpu.memory_space<vmem>>, vector<1x8x128xf32>,
    %c1_i32 = arith.constant 1 : i32
    %c0_i32_29 = arith.constant 0 : i32
    %57 = arith.cmpi eq, %arg0, %c0_i32_29 : i32
    %c7_i32_30 = arith.constant 7 : i32
    %58 = arith.subi %c7_i32_30, %c1_i32 : i32
    %59 = arith.select %57, %c1_i32, %58 : i32
    %60 = arith.index_cast %59 : i32 to index
    %c0_31 = arith.constant 0 : index
    %c0_32 = arith.constant 0 : index
    %61 = vector.load %arg7[%60, %c0_31, %c0_32] : memref<8x8x512xf32, #tpu.memory_space<vmem>>, vector<1x8x512xf32>
    %62 = vector.shape_cast %61 : vector<1x8x512xf32> to vector<8x512xf32>
    %63 = arith.truncf %52 : vector<8x128xf32> to vector<8x128xbf16>
    %cst_33 = arith.constant dense<0.000000e+00> : vector<8x512xf32>
    %64 = tpu.matmul %63, %16, %cst_33 {dimension_numbers = #tpu.dot_dimension_numbers<[1], [0], [0], [1], [0, 0, 1, 1], [], []>} : vector<8x128xbf16>, vector<128x512xbf16>, vector<8x512xf32> -> vector<8x512xf32>
    %65 = arith.addf %62, %64 : vector<8x512xf32>
    %66 = vector.extract_strided_slice %65 {offsets = [0, 0], sizes = [8, 128], strides = [1, 1]} : vector<8x512xf32> to vector<8x128xf32>
    %67 = arith.negf %66 : vector<8x128xf32>
    %68 = math.exp %67 : vector<8x128xf32>
    %cst_34 = arith.constant 1.000000e+00 : f32
    %69 = vector.broadcast %cst_34 : f32 to vector<8x128xf32>
    %70 = arith.addf %69, %68 : vector<8x128xf32>
    %71 = arith.divf %69, %70 : vector<8x128xf32>
    %72 = vector.extract_strided_slice %65 {offsets = [0, 128], sizes = [8, 128], strides = [1, 1]} : vector<8x512xf32> to vector<8x128xf32>
    %73 = arith.negf %72 : vector<8x128xf32>
    %74 = math.exp %73 : vector<8x128xf32>
    %cst_35 = arith.constant 1.000000e+00 : f32
    %75 = vector.broadcast %cst_35 : f32 to vector<8x128xf32>
    %76 = arith.addf %75, %74 : vector<8x128xf32>
    %77 = arith.divf %75, %76 : vector<8x128xf32>
    %78 = vector.extract_strided_slice %65 {offsets = [0, 256], sizes = [8, 128], strides = [1, 1]} : vector<8x512xf32> to vector<8x128xf32>
    %79 = math.tanh %78 : vector<8x128xf32>
    %80 = vector.extract_strided_slice %65 {offsets = [0, 384], sizes = [8, 128], strides = [1, 1]} : vector<8x512xf32> to vector<8x128xf32>
    %81 = arith.negf %80 : vector<8x128xf32>
    %82 = math.exp %81 : vector<8x128xf32>
    %cst_36 = arith.constant 1.000000e+00 : f32
    %83 = vector.broadcast %cst_36 : f32 to vector<8x128xf32>
    %84 = arith.addf %83, %82 : vector<8x128xf32>
    %85 = arith.divf %83, %84 : vector<8x128xf32>
    %86 = arith.mulf %77, %50 : vector<8x128xf32>
    %87 = arith.mulf %71, %79 : vector<8x128xf32>
    %88 = arith.addf %86, %87 : vector<8x128xf32>
    %89 = math.tanh %88 : vector<8x128xf32>
    %90 = arith.mulf %85, %89 : vector<8x128xf32>
    %91 = arith.index_cast %59 : i32 to index
    %c0_37 = arith.constant 0 : index
    %c0_38 = arith.constant 0 : index
    %92 = vector.load %arg6[%91, %c0_37, %c0_38] : memref<8x8x128xf32, #tpu.memory_space<vmem>>, vector<1x8x128xf32>
    %93 = vector.shape_cast %92 : vector<1x8x128xf32> to vector<8x128xf32>
    %94 = vector.shape_cast %90 : vector<8x128xf32> to vector<1x8x128xf32>
    tpu.vector_store %arg6[%91, %c0_37, %c0_38], %94 {strides = array<i32>} : memref<8x8x128xf32, #tpu.memory_space<vmem>>, vector<1x8x128xf32>,
    %c2_i32 = arith.constant 2 : i32
    %c0_i32_39 = arith.constant 0 : i32
    %95 = arith.cmpi eq, %arg0, %c0_i32_39 : i32
    %c7_i32_40 = arith.constant 7 : i32
    %96 = arith.subi %c7_i32_40, %c2_i32 : i32
    %97 = arith.select %95, %c2_i32, %96 : i32
    %98 = arith.index_cast %97 : i32 to index
    %c0_41 = arith.constant 0 : index
    %c0_42 = arith.constant 0 : index
    %99 = vector.load %arg7[%98, %c0_41, %c0_42] : memref<8x8x512xf32, #tpu.memory_space<vmem>>, vector<1x8x512xf32>
    %100 = vector.shape_cast %99 : vector<1x8x512xf32> to vector<8x512xf32>
    %101 = arith.truncf %90 : vector<8x128xf32> to vector<8x128xbf16>
    %cst_43 = arith.constant dense<0.000000e+00> : vector<8x512xf32>
    %102 = tpu.matmul %101, %16, %cst_43 {dimension_numbers = #tpu.dot_dimension_numbers<[1], [0], [0], [1], [0, 0, 1, 1], [], []>} : vector<8x128xbf16>, vector<128x512xbf16>, vector<8x512xf32> -> vector<8x512xf32>
    %103 = arith.addf %100, %102 : vector<8x512xf32>
    %104 = vector.extract_strided_slice %103 {offsets = [0, 0], sizes = [8, 128], strides = [1, 1]} : vector<8x512xf32> to vector<8x128xf32>
    %105 = arith.negf %104 : vector<8x128xf32>
    %106 = math.exp %105 : vector<8x128xf32>
    %cst_44 = arith.constant 1.000000e+00 : f32
    %107 = vector.broadcast %cst_44 : f32 to vector<8x128xf32>
    %108 = arith.addf %107, %106 : vector<8x128xf32>
    %109 = arith.divf %107, %108 : vector<8x128xf32>
    %110 = vector.extract_strided_slice %103 {offsets = [0, 128], sizes = [8, 128], strides = [1, 1]} : vector<8x512xf32> to vector<8x128xf32>
    %111 = arith.negf %110 : vector<8x128xf32>
    %112 = math.exp %111 : vector<8x128xf32>
    %cst_45 = arith.constant 1.000000e+00 : f32
    %113 = vector.broadcast %cst_45 : f32 to vector<8x128xf32>
    %114 = arith.addf %113, %112 : vector<8x128xf32>
    %115 = arith.divf %113, %114 : vector<8x128xf32>
    %116 = vector.extract_strided_slice %103 {offsets = [0, 256], sizes = [8, 128], strides = [1, 1]} : vector<8x512xf32> to vector<8x128xf32>
    %117 = math.tanh %116 : vector<8x128xf32>
    %118 = vector.extract_strided_slice %103 {offsets = [0, 384], sizes = [8, 128], strides = [1, 1]} : vector<8x512xf32> to vector<8x128xf32>
    %119 = arith.negf %118 : vector<8x128xf32>
    %120 = math.exp %119 : vector<8x128xf32>
    %cst_46 = arith.constant 1.000000e+00 : f32
    %121 = vector.broadcast %cst_46 : f32 to vector<8x128xf32>
    %122 = arith.addf %121, %120 : vector<8x128xf32>
    %123 = arith.divf %121, %122 : vector<8x128xf32>
    %124 = arith.mulf %115, %88 : vector<8x128xf32>
    %125 = arith.mulf %109, %117 : vector<8x128xf32>
    %126 = arith.addf %124, %125 : vector<8x128xf32>
    %127 = math.tanh %126 : vector<8x128xf32>
    %128 = arith.mulf %123, %127 : vector<8x128xf32>
    %129 = arith.index_cast %97 : i32 to index
    %c0_47 = arith.constant 0 : index
    %c0_48 = arith.constant 0 : index
    %130 = vector.load %arg6[%129, %c0_47, %c0_48] : memref<8x8x128xf32, #tpu.memory_space<vmem>>, vector<1x8x128xf32>
    %131 = vector.shape_cast %130 : vector<1x8x128xf32> to vector<8x128xf32>
    %132 = vector.shape_cast %128 : vector<8x128xf32> to vector<1x8x128xf32>
    tpu.vector_store %arg6[%129, %c0_47, %c0_48], %132 {strides = array<i32>} : memref<8x8x128xf32, #tpu.memory_space<vmem>>, vector<1x8x128xf32>,
    %c3_i32 = arith.constant 3 : i32
    %c0_i32_49 = arith.constant 0 : i32
    %133 = arith.cmpi eq, %arg0, %c0_i32_49 : i32
    %c7_i32_50 = arith.constant 7 : i32
    %134 = arith.subi %c7_i32_50, %c3_i32 : i32
    %135 = arith.select %133, %c3_i32, %134 : i32
    %136 = arith.index_cast %135 : i32 to index
    %c0_51 = arith.constant 0 : index
    %c0_52 = arith.constant 0 : index
    %137 = vector.load %arg7[%136, %c0_51, %c0_52] : memref<8x8x512xf32, #tpu.memory_space<vmem>>, vector<1x8x512xf32>
    %138 = vector.shape_cast %137 : vector<1x8x512xf32> to vector<8x512xf32>
    %139 = arith.truncf %128 : vector<8x128xf32> to vector<8x128xbf16>
    %cst_53 = arith.constant dense<0.000000e+00> : vector<8x512xf32>
    %140 = tpu.matmul %139, %16, %cst_53 {dimension_numbers = #tpu.dot_dimension_numbers<[1], [0], [0], [1], [0, 0, 1, 1], [], []>} : vector<8x128xbf16>, vector<128x512xbf16>, vector<8x512xf32> -> vector<8x512xf32>
    %141 = arith.addf %138, %140 : vector<8x512xf32>
    %142 = vector.extract_strided_slice %141 {offsets = [0, 0], sizes = [8, 128], strides = [1, 1]} : vector<8x512xf32> to vector<8x128xf32>
    %143 = arith.negf %142 : vector<8x128xf32>
    %144 = math.exp %143 : vector<8x128xf32>
    %cst_54 = arith.constant 1.000000e+00 : f32
    %145 = vector.broadcast %cst_54 : f32 to vector<8x128xf32>
    %146 = arith.addf %145, %144 : vector<8x128xf32>
    %147 = arith.divf %145, %146 : vector<8x128xf32>
    %148 = vector.extract_strided_slice %141 {offsets = [0, 128], sizes = [8, 128], strides = [1, 1]} : vector<8x512xf32> to vector<8x128xf32>
    %149 = arith.negf %148 : vector<8x128xf32>
    %150 = math.exp %149 : vector<8x128xf32>
    %cst_55 = arith.constant 1.000000e+00 : f32
    %151 = vector.broadcast %cst_55 : f32 to vector<8x128xf32>
    %152 = arith.addf %151, %150 : vector<8x128xf32>
    %153 = arith.divf %151, %152 : vector<8x128xf32>
    %154 = vector.extract_strided_slice %141 {offsets = [0, 256], sizes = [8, 128], strides = [1, 1]} : vector<8x512xf32> to vector<8x128xf32>
    %155 = math.tanh %154 : vector<8x128xf32>
    %156 = vector.extract_strided_slice %141 {offsets = [0, 384], sizes = [8, 128], strides = [1, 1]} : vector<8x512xf32> to vector<8x128xf32>
    %157 = arith.negf %156 : vector<8x128xf32>
    %158 = math.exp %157 : vector<8x128xf32>
    %cst_56 = arith.constant 1.000000e+00 : f32
    %159 = vector.broadcast %cst_56 : f32 to vector<8x128xf32>
    %160 = arith.addf %159, %158 : vector<8x128xf32>
    %161 = arith.divf %159, %160 : vector<8x128xf32>
    %162 = arith.mulf %153, %126 : vector<8x128xf32>
    %163 = arith.mulf %147, %155 : vector<8x128xf32>
    %164 = arith.addf %162, %163 : vector<8x128xf32>
    %165 = math.tanh %164 : vector<8x128xf32>
    %166 = arith.mulf %161, %165 : vector<8x128xf32>
    %167 = arith.index_cast %135 : i32 to index
    %c0_57 = arith.constant 0 : index
    %c0_58 = arith.constant 0 : index
    %168 = vector.load %arg6[%167, %c0_57, %c0_58] : memref<8x8x128xf32, #tpu.memory_space<vmem>>, vector<1x8x128xf32>
    %169 = vector.shape_cast %168 : vector<1x8x128xf32> to vector<8x128xf32>
    %170 = vector.shape_cast %166 : vector<8x128xf32> to vector<1x8x128xf32>
    tpu.vector_store %arg6[%167, %c0_57, %c0_58], %170 {strides = array<i32>} : memref<8x8x128xf32, #tpu.memory_space<vmem>>, vector<1x8x128xf32>,
    %c4_i32 = arith.constant 4 : i32
    %c0_i32_59 = arith.constant 0 : i32
    %171 = arith.cmpi eq, %arg0, %c0_i32_59 : i32
    %c7_i32_60 = arith.constant 7 : i32
    %172 = arith.subi %c7_i32_60, %c4_i32 : i32
    %173 = arith.select %171, %c4_i32, %172 : i32
    %174 = arith.index_cast %173 : i32 to index
    %c0_61 = arith.constant 0 : index
    %c0_62 = arith.constant 0 : index
    %175 = vector.load %arg7[%174, %c0_61, %c0_62] : memref<8x8x512xf32, #tpu.memory_space<vmem>>, vector<1x8x512xf32>
    %176 = vector.shape_cast %175 : vector<1x8x512xf32> to vector<8x512xf32>
    %177 = arith.truncf %166 : vector<8x128xf32> to vector<8x128xbf16>
    %cst_63 = arith.constant dense<0.000000e+00> : vector<8x512xf32>
    %178 = tpu.matmul %177, %16, %cst_63 {dimension_numbers = #tpu.dot_dimension_numbers<[1], [0], [0], [1], [0, 0, 1, 1], [], []>} : vector<8x128xbf16>, vector<128x512xbf16>, vector<8x512xf32> -> vector<8x512xf32>
    %179 = arith.addf %176, %178 : vector<8x512xf32>
    %180 = vector.extract_strided_slice %179 {offsets = [0, 0], sizes = [8, 128], strides = [1, 1]} : vector<8x512xf32> to vector<8x128xf32>
    %181 = arith.negf %180 : vector<8x128xf32>
    %182 = math.exp %181 : vector<8x128xf32>
    %cst_64 = arith.constant 1.000000e+00 : f32
    %183 = vector.broadcast %cst_64 : f32 to vector<8x128xf32>
    %184 = arith.addf %183, %182 : vector<8x128xf32>
    %185 = arith.divf %183, %184 : vector<8x128xf32>
    %186 = vector.extract_strided_slice %179 {offsets = [0, 128], sizes = [8, 128], strides = [1, 1]} : vector<8x512xf32> to vector<8x128xf32>
    %187 = arith.negf %186 : vector<8x128xf32>
    %188 = math.exp %187 : vector<8x128xf32>
    %cst_65 = arith.constant 1.000000e+00 : f32
    %189 = vector.broadcast %cst_65 : f32 to vector<8x128xf32>
    %190 = arith.addf %189, %188 : vector<8x128xf32>
    %191 = arith.divf %189, %190 : vector<8x128xf32>
    %192 = vector.extract_strided_slice %179 {offsets = [0, 256], sizes = [8, 128], strides = [1, 1]} : vector<8x512xf32> to vector<8x128xf32>
    %193 = math.tanh %192 : vector<8x128xf32>
    %194 = vector.extract_strided_slice %179 {offsets = [0, 384], sizes = [8, 128], strides = [1, 1]} : vector<8x512xf32> to vector<8x128xf32>
    %195 = arith.negf %194 : vector<8x128xf32>
    %196 = math.exp %195 : vector<8x128xf32>
    %cst_66 = arith.constant 1.000000e+00 : f32
    %197 = vector.broadcast %cst_66 : f32 to vector<8x128xf32>
    %198 = arith.addf %197, %196 : vector<8x128xf32>
    %199 = arith.divf %197, %198 : vector<8x128xf32>
    %200 = arith.mulf %191, %164 : vector<8x128xf32>
    %201 = arith.mulf %185, %193 : vector<8x128xf32>
    %202 = arith.addf %200, %201 : vector<8x128xf32>
    %203 = math.tanh %202 : vector<8x128xf32>
    %204 = arith.mulf %199, %203 : vector<8x128xf32>
    %205 = arith.index_cast %173 : i32 to index
    %c0_67 = arith.constant 0 : index
    %c0_68 = arith.constant 0 : index
    %206 = vector.load %arg6[%205, %c0_67, %c0_68] : memref<8x8x128xf32, #tpu.memory_space<vmem>>, vector<1x8x128xf32>
    %207 = vector.shape_cast %206 : vector<1x8x128xf32> to vector<8x128xf32>
    %208 = vector.shape_cast %204 : vector<8x128xf32> to vector<1x8x128xf32>
    tpu.vector_store %arg6[%205, %c0_67, %c0_68], %208 {strides = array<i32>} : memref<8x8x128xf32, #tpu.memory_space<vmem>>, vector<1x8x128xf32>,
    %c5_i32 = arith.constant 5 : i32
    %c0_i32_69 = arith.constant 0 : i32
    %209 = arith.cmpi eq, %arg0, %c0_i32_69 : i32
    %c7_i32_70 = arith.constant 7 : i32
    %210 = arith.subi %c7_i32_70, %c5_i32 : i32
    %211 = arith.select %209, %c5_i32, %210 : i32
    %212 = arith.index_cast %211 : i32 to index
    %c0_71 = arith.constant 0 : index
    %c0_72 = arith.constant 0 : index
    %213 = vector.load %arg7[%212, %c0_71, %c0_72] : memref<8x8x512xf32, #tpu.memory_space<vmem>>, vector<1x8x512xf32>
    %214 = vector.shape_cast %213 : vector<1x8x512xf32> to vector<8x512xf32>
    %215 = arith.truncf %204 : vector<8x128xf32> to vector<8x128xbf16>
    %cst_73 = arith.constant dense<0.000000e+00> : vector<8x512xf32>
    %216 = tpu.matmul %215, %16, %cst_73 {dimension_numbers = #tpu.dot_dimension_numbers<[1], [0], [0], [1], [0, 0, 1, 1], [], []>} : vector<8x128xbf16>, vector<128x512xbf16>, vector<8x512xf32> -> vector<8x512xf32>
    %217 = arith.addf %214, %216 : vector<8x512xf32>
    %218 = vector.extract_strided_slice %217 {offsets = [0, 0], sizes = [8, 128], strides = [1, 1]} : vector<8x512xf32> to vector<8x128xf32>
    %219 = arith.negf %218 : vector<8x128xf32>
    %220 = math.exp %219 : vector<8x128xf32>
    %cst_74 = arith.constant 1.000000e+00 : f32
    %221 = vector.broadcast %cst_74 : f32 to vector<8x128xf32>
    %222 = arith.addf %221, %220 : vector<8x128xf32>
    %223 = arith.divf %221, %222 : vector<8x128xf32>
    %224 = vector.extract_strided_slice %217 {offsets = [0, 128], sizes = [8, 128], strides = [1, 1]} : vector<8x512xf32> to vector<8x128xf32>
    %225 = arith.negf %224 : vector<8x128xf32>
    %226 = math.exp %225 : vector<8x128xf32>
    %cst_75 = arith.constant 1.000000e+00 : f32
    %227 = vector.broadcast %cst_75 : f32 to vector<8x128xf32>
    %228 = arith.addf %227, %226 : vector<8x128xf32>
    %229 = arith.divf %227, %228 : vector<8x128xf32>
    %230 = vector.extract_strided_slice %217 {offsets = [0, 256], sizes = [8, 128], strides = [1, 1]} : vector<8x512xf32> to vector<8x128xf32>
    %231 = math.tanh %230 : vector<8x128xf32>
    %232 = vector.extract_strided_slice %217 {offsets = [0, 384], sizes = [8, 128], strides = [1, 1]} : vector<8x512xf32> to vector<8x128xf32>
    %233 = arith.negf %232 : vector<8x128xf32>
    %234 = math.exp %233 : vector<8x128xf32>
    %cst_76 = arith.constant 1.000000e+00 : f32
    %235 = vector.broadcast %cst_76 : f32 to vector<8x128xf32>
    %236 = arith.addf %235, %234 : vector<8x128xf32>
    %237 = arith.divf %235, %236 : vector<8x128xf32>
    %238 = arith.mulf %229, %202 : vector<8x128xf32>
    %239 = arith.mulf %223, %231 : vector<8x128xf32>
    %240 = arith.addf %238, %239 : vector<8x128xf32>
    %241 = math.tanh %240 : vector<8x128xf32>
    %242 = arith.mulf %237, %241 : vector<8x128xf32>
    %243 = arith.index_cast %211 : i32 to index
    %c0_77 = arith.constant 0 : index
    %c0_78 = arith.constant 0 : index
    %244 = vector.load %arg6[%243, %c0_77, %c0_78] : memref<8x8x128xf32, #tpu.memory_space<vmem>>, vector<1x8x128xf32>
    %245 = vector.shape_cast %244 : vector<1x8x128xf32> to vector<8x128xf32>
    %246 = vector.shape_cast %242 : vector<8x128xf32> to vector<1x8x128xf32>
    tpu.vector_store %arg6[%243, %c0_77, %c0_78], %246 {strides = array<i32>} : memref<8x8x128xf32, #tpu.memory_space<vmem>>, vector<1x8x128xf32>,
    %c6_i32 = arith.constant 6 : i32
    %c0_i32_79 = arith.constant 0 : i32
    %247 = arith.cmpi eq, %arg0, %c0_i32_79 : i32
    %c7_i32_80 = arith.constant 7 : i32
    %248 = arith.subi %c7_i32_80, %c6_i32 : i32
    %249 = arith.select %247, %c6_i32, %248 : i32
    %250 = arith.index_cast %249 : i32 to index
    %c0_81 = arith.constant 0 : index
    %c0_82 = arith.constant 0 : index
    %251 = vector.load %arg7[%250, %c0_81, %c0_82] : memref<8x8x512xf32, #tpu.memory_space<vmem>>, vector<1x8x512xf32>
    %252 = vector.shape_cast %251 : vector<1x8x512xf32> to vector<8x512xf32>
    %253 = arith.truncf %242 : vector<8x128xf32> to vector<8x128xbf16>
    %cst_83 = arith.constant dense<0.000000e+00> : vector<8x512xf32>
    %254 = tpu.matmul %253, %16, %cst_83 {dimension_numbers = #tpu.dot_dimension_numbers<[1], [0], [0], [1], [0, 0, 1, 1], [], []>} : vector<8x128xbf16>, vector<128x512xbf16>, vector<8x512xf32> -> vector<8x512xf32>
    %255 = arith.addf %252, %254 : vector<8x512xf32>
    %256 = vector.extract_strided_slice %255 {offsets = [0, 0], sizes = [8, 128], strides = [1, 1]} : vector<8x512xf32> to vector<8x128xf32>
    %257 = arith.negf %256 : vector<8x128xf32>
    %258 = math.exp %257 : vector<8x128xf32>
    %cst_84 = arith.constant 1.000000e+00 : f32
    %259 = vector.broadcast %cst_84 : f32 to vector<8x128xf32>
    %260 = arith.addf %259, %258 : vector<8x128xf32>
    %261 = arith.divf %259, %260 : vector<8x128xf32>
    %262 = vector.extract_strided_slice %255 {offsets = [0, 128], sizes = [8, 128], strides = [1, 1]} : vector<8x512xf32> to vector<8x128xf32>
    %263 = arith.negf %262 : vector<8x128xf32>
    %264 = math.exp %263 : vector<8x128xf32>
    %cst_85 = arith.constant 1.000000e+00 : f32
    %265 = vector.broadcast %cst_85 : f32 to vector<8x128xf32>
    %266 = arith.addf %265, %264 : vector<8x128xf32>
    %267 = arith.divf %265, %266 : vector<8x128xf32>
    %268 = vector.extract_strided_slice %255 {offsets = [0, 256], sizes = [8, 128], strides = [1, 1]} : vector<8x512xf32> to vector<8x128xf32>
    %269 = math.tanh %268 : vector<8x128xf32>
    %270 = vector.extract_strided_slice %255 {offsets = [0, 384], sizes = [8, 128], strides = [1, 1]} : vector<8x512xf32> to vector<8x128xf32>
    %271 = arith.negf %270 : vector<8x128xf32>
    %272 = math.exp %271 : vector<8x128xf32>
    %cst_86 = arith.constant 1.000000e+00 : f32
    %273 = vector.broadcast %cst_86 : f32 to vector<8x128xf32>
    %274 = arith.addf %273, %272 : vector<8x128xf32>
    %275 = arith.divf %273, %274 : vector<8x128xf32>
    %276 = arith.mulf %267, %240 : vector<8x128xf32>
    %277 = arith.mulf %261, %269 : vector<8x128xf32>
    %278 = arith.addf %276, %277 : vector<8x128xf32>
    %279 = math.tanh %278 : vector<8x128xf32>
    %280 = arith.mulf %275, %279 : vector<8x128xf32>
    %281 = arith.index_cast %249 : i32 to index
    %c0_87 = arith.constant 0 : index
    %c0_88 = arith.constant 0 : index
    %282 = vector.load %arg6[%281, %c0_87, %c0_88] : memref<8x8x128xf32, #tpu.memory_space<vmem>>, vector<1x8x128xf32>
    %283 = vector.shape_cast %282 : vector<1x8x128xf32> to vector<8x128xf32>
    %284 = vector.shape_cast %280 : vector<8x128xf32> to vector<1x8x128xf32>
    tpu.vector_store %arg6[%281, %c0_87, %c0_88], %284 {strides = array<i32>} : memref<8x8x128xf32, #tpu.memory_space<vmem>>, vector<1x8x128xf32>,
    %c7_i32_89 = arith.constant 7 : i32
    %c0_i32_90 = arith.constant 0 : i32
    %285 = arith.cmpi eq, %arg0, %c0_i32_90 : i32
    %c7_i32_91 = arith.constant 7 : i32
    %286 = arith.subi %c7_i32_91, %c7_i32_89 : i32
    %287 = arith.select %285, %c7_i32_89, %286 : i32
    %288 = arith.index_cast %287 : i32 to index
    %c0_92 = arith.constant 0 : index
    %c0_93 = arith.constant 0 : index
    %289 = vector.load %arg7[%288, %c0_92, %c0_93] : memref<8x8x512xf32, #tpu.memory_space<vmem>>, vector<1x8x512xf32>
    %290 = vector.shape_cast %289 : vector<1x8x512xf32> to vector<8x512xf32>
    %291 = arith.truncf %280 : vector<8x128xf32> to vector<8x128xbf16>
    %cst_94 = arith.constant dense<0.000000e+00> : vector<8x512xf32>
    %292 = tpu.matmul %291, %16, %cst_94 {dimension_numbers = #tpu.dot_dimension_numbers<[1], [0], [0], [1], [0, 0, 1, 1], [], []>} : vector<8x128xbf16>, vector<128x512xbf16>, vector<8x512xf32> -> vector<8x512xf32>
    %293 = arith.addf %290, %292 : vector<8x512xf32>
    %294 = vector.extract_strided_slice %293 {offsets = [0, 0], sizes = [8, 128], strides = [1, 1]} : vector<8x512xf32> to vector<8x128xf32>
    %295 = arith.negf %294 : vector<8x128xf32>
    %296 = math.exp %295 : vector<8x128xf32>
    %cst_95 = arith.constant 1.000000e+00 : f32
    %297 = vector.broadcast %cst_95 : f32 to vector<8x128xf32>
    %298 = arith.addf %297, %296 : vector<8x128xf32>
    %299 = arith.divf %297, %298 : vector<8x128xf32>
    %300 = vector.extract_strided_slice %293 {offsets = [0, 128], sizes = [8, 128], strides = [1, 1]} : vector<8x512xf32> to vector<8x128xf32>
    %301 = arith.negf %300 : vector<8x128xf32>
    %302 = math.exp %301 : vector<8x128xf32>
    %cst_96 = arith.constant 1.000000e+00 : f32
    %303 = vector.broadcast %cst_96 : f32 to vector<8x128xf32>
    %304 = arith.addf %303, %302 : vector<8x128xf32>
    %305 = arith.divf %303, %304 : vector<8x128xf32>
    %306 = vector.extract_strided_slice %293 {offsets = [0, 256], sizes = [8, 128], strides = [1, 1]} : vector<8x512xf32> to vector<8x128xf32>
    %307 = math.tanh %306 : vector<8x128xf32>
    %308 = vector.extract_strided_slice %293 {offsets = [0, 384], sizes = [8, 128], strides = [1, 1]} : vector<8x512xf32> to vector<8x128xf32>
    %309 = arith.negf %308 : vector<8x128xf32>
    %310 = math.exp %309 : vector<8x128xf32>
    %cst_97 = arith.constant 1.000000e+00 : f32
    %311 = vector.broadcast %cst_97 : f32 to vector<8x128xf32>
    %312 = arith.addf %311, %310 : vector<8x128xf32>
    %313 = arith.divf %311, %312 : vector<8x128xf32>
    %314 = arith.mulf %305, %278 : vector<8x128xf32>
    %315 = arith.mulf %299, %307 : vector<8x128xf32>
    %316 = arith.addf %314, %315 : vector<8x128xf32>
    %317 = math.tanh %316 : vector<8x128xf32>
    %318 = arith.mulf %313, %317 : vector<8x128xf32>
    %319 = arith.index_cast %287 : i32 to index
    %c0_98 = arith.constant 0 : index
    %c0_99 = arith.constant 0 : index
    %320 = vector.load %arg6[%319, %c0_98, %c0_99] : memref<8x8x128xf32, #tpu.memory_space<vmem>>, vector<1x8x128xf32>
    %321 = vector.shape_cast %320 : vector<1x8x128xf32> to vector<8x128xf32>
    %322 = vector.shape_cast %318 : vector<8x128xf32> to vector<1x8x128xf32>
    tpu.vector_store %arg6[%319, %c0_98, %c0_99], %322 {strides = array<i32>} : memref<8x8x128xf32, #tpu.memory_space<vmem>>, vector<1x8x128xf32>,
    %c8_i32 = arith.constant 8 : i32
    %c0_100 = arith.constant 0 : index
    %c0_101 = arith.constant 0 : index
    %323 = vector.load %arg8[%c0_100, %c0_101] : memref<8x128xf32, #tpu.memory_space<vmem>>, vector<8x128xf32>
    tpu.vector_store %arg8[%c0_100, %c0_101], %318 {strides = array<i32>} : memref<8x128xf32, #tpu.memory_space<vmem>>, vector<8x128xf32>,
    %c0_102 = arith.constant 0 : index
    %c0_103 = arith.constant 0 : index
    %324 = vector.load %arg9[%c0_102, %c0_103] : memref<8x128xf32, #tpu.memory_space<vmem>>, vector<8x128xf32>
    tpu.vector_store %arg9[%c0_102, %c0_103], %316 {strides = array<i32>} : memref<8x128xf32, #tpu.memory_space<vmem>>, vector<8x128xf32>,
    return
  }
  func.func @transform_0(%arg0: i32, %arg1: i32) -> (i32, i32, i32) {
    %c0_i32 = arith.constant 0 : i32
    %0 = arith.cmpi eq, %arg0, %c0_i32 : i32
    %c0_i32_0 = arith.constant 0 : i32
    %1 = arith.subi %c0_i32_0, %arg1 : i32
    %2 = arith.select %0, %arg1, %1 : i32
    %c0_i32_1 = arith.constant 0 : i32
    %c0_i32_2 = arith.constant 0 : i32
    %c0_i32_3 = arith.constant 0 : i32
    return %2, %c0_i32_1, %c0_i32_2 : i32, i32, i32
  }
  func.func @transform_1(%arg0: i32, %arg1: i32) -> (i32, i32, i32) {
    %c0_i32 = arith.constant 0 : i32
    %c0_i32_0 = arith.constant 0 : i32
    %c0_i32_1 = arith.constant 0 : i32
    return %arg0, %c0_i32, %c0_i32_0 : i32, i32, i32
  }
  func.func @transform_2(%arg0: i32, %arg1: i32) -> (i32, i32, i32) {
    %c0_i32 = arith.constant 0 : i32
    %c0_i32_0 = arith.constant 0 : i32
    %c0_i32_1 = arith.constant 0 : i32
    return %arg0, %c0_i32, %c0_i32_0 : i32, i32, i32
  }
  func.func @transform_3(%arg0: i32, %arg1: i32) -> (i32, i32, i32) {
    %c0_i32 = arith.constant 0 : i32
    %c0_i32_0 = arith.constant 0 : i32
    %c0_i32_1 = arith.constant 0 : i32
    return %arg0, %c0_i32, %c0_i32_0 : i32, i32, i32
  }
  func.func @transform_4(%arg0: i32, %arg1: i32) -> (i32, i32, i32) {
    %c0_i32 = arith.constant 0 : i32
    %0 = arith.cmpi eq, %arg0, %c0_i32 : i32
    %c0_i32_0 = arith.constant 0 : i32
    %1 = arith.subi %c0_i32_0, %arg1 : i32
    %2 = arith.select %0, %arg1, %1 : i32
    %c0_i32_1 = arith.constant 0 : i32
    %c0_i32_2 = arith.constant 0 : i32
    return %2, %c0_i32_1, %arg0 : i32, i32, i32
  }
}

module attributes {stable_mosaic.version = 11 : i64} {
  func.func @_fc_head_kernel(%arg0: i32, %arg1: memref<64x256xf32, #tpu.memory_space<vmem>>, %arg2: memref<256x256xbf16, #tpu.memory_space<vmem>>, %arg3: memref<1x256xf32, #tpu.memory_space<vmem>>, %arg4: memref<256x128xbf16, #tpu.memory_space<vmem>>, %arg5: memref<1x128xf32, #tpu.memory_space<vmem>>, %arg6: memref<64x128xf32, #tpu.memory_space<vmem>>) attributes {dimension_semantics = [#tpu.dimension_semantics<parallel>], iteration_bounds = array<i64: 1>, scalar_prefetch = 0 : i64, scratch_operands = 0 : i64, tpu.core_type = #tpu.core_type<tc>, window_params = [{transform_indices = @transform_0, window_bounds = array<i64: 64, 256>}, {pipeline_mode = #tpu.pipeline_mode<synchronous>, transform_indices = @transform_1, window_bounds = array<i64: 256, 256>}, {pipeline_mode = #tpu.pipeline_mode<synchronous>, transform_indices = @transform_2, window_bounds = array<i64: 1, 256>}, {pipeline_mode = #tpu.pipeline_mode<synchronous>, transform_indices = @transform_3, window_bounds = array<i64: 256, 128>}, {pipeline_mode = #tpu.pipeline_mode<synchronous>, transform_indices = @transform_4, window_bounds = array<i64: 1, 128>}, {transform_indices = @transform_5, window_bounds = array<i64: 64, 128>}]} {
    %c0 = arith.constant 0 : index
    %c0_0 = arith.constant 0 : index
    %0 = vector.load %arg1[%c0, %c0_0] : memref<64x256xf32, #tpu.memory_space<vmem>>, vector<64x256xf32>
    %1 = arith.truncf %0 : vector<64x256xf32> to vector<64x256xbf16>
    %c0_1 = arith.constant 0 : index
    %c0_2 = arith.constant 0 : index
    %2 = vector.load %arg2[%c0_1, %c0_2] : memref<256x256xbf16, #tpu.memory_space<vmem>>, vector<256x256xbf16>
    %cst = arith.constant dense<0.000000e+00> : vector<64x256xf32>
    %3 = tpu.matmul %1, %2, %cst {dimension_numbers = #tpu.dot_dimension_numbers<[1], [0], [0], [1], [0, 0, 1, 1], [], []>} : vector<64x256xbf16>, vector<256x256xbf16>, vector<64x256xf32> -> vector<64x256xf32>
    %c0_3 = arith.constant 0 : index
    %c0_4 = arith.constant 0 : index
    %4 = vector.load %arg3[%c0_3, %c0_4] : memref<1x256xf32, #tpu.memory_space<vmem>>, vector<1x256xf32>
    %5 = vector.broadcast %4 : vector<1x256xf32> to vector<64x256xf32>
    %6 = arith.addf %3, %5 : vector<64x256xf32>
    %cst_5 = arith.constant 0.000000e+00 : f32
    %7 = vector.broadcast %cst_5 : f32 to vector<64x256xf32>
    %8 = arith.maximumf %6, %7 : vector<64x256xf32>
    %9 = arith.truncf %8 : vector<64x256xf32> to vector<64x256xbf16>
    %c0_6 = arith.constant 0 : index
    %c0_7 = arith.constant 0 : index
    %10 = vector.load %arg4[%c0_6, %c0_7] : memref<256x128xbf16, #tpu.memory_space<vmem>>, vector<256x128xbf16>
    %cst_8 = arith.constant dense<0.000000e+00> : vector<64x128xf32>
    %11 = tpu.matmul %9, %10, %cst_8 {dimension_numbers = #tpu.dot_dimension_numbers<[1], [0], [0], [1], [0, 0, 1, 1], [], []>} : vector<64x256xbf16>, vector<256x128xbf16>, vector<64x128xf32> -> vector<64x128xf32>
    %c0_9 = arith.constant 0 : index
    %c0_10 = arith.constant 0 : index
    %12 = vector.load %arg5[%c0_9, %c0_10] : memref<1x128xf32, #tpu.memory_space<vmem>>, vector<1x128xf32>
    %13 = vector.broadcast %12 : vector<1x128xf32> to vector<64x128xf32>
    %14 = arith.addf %11, %13 : vector<64x128xf32>
    %c0_11 = arith.constant 0 : index
    %c0_12 = arith.constant 0 : index
    %15 = vector.load %arg6[%c0_11, %c0_12] : memref<64x128xf32, #tpu.memory_space<vmem>>, vector<64x128xf32>
    tpu.vector_store %arg6[%c0_11, %c0_12], %14 {strides = array<i32>} : memref<64x128xf32, #tpu.memory_space<vmem>>, vector<64x128xf32>,
    return
  }
  func.func @transform_0(%arg0: i32) -> (i32, i32) {
    %c0_i32 = arith.constant 0 : i32
    %c0_i32_0 = arith.constant 0 : i32
    return %arg0, %c0_i32 : i32, i32
  }
  func.func @transform_1(%arg0: i32) -> (i32, i32) {
    %c0_i32 = arith.constant 0 : i32
    %c0_i32_0 = arith.constant 0 : i32
    %c0_i32_1 = arith.constant 0 : i32
    return %c0_i32, %c0_i32_0 : i32, i32
  }
  func.func @transform_2(%arg0: i32) -> (i32, i32) {
    %c0_i32 = arith.constant 0 : i32
    %c0_i32_0 = arith.constant 0 : i32
    %c0_i32_1 = arith.constant 0 : i32
    return %c0_i32, %c0_i32_0 : i32, i32
  }
  func.func @transform_3(%arg0: i32) -> (i32, i32) {
    %c0_i32 = arith.constant 0 : i32
    %c0_i32_0 = arith.constant 0 : i32
    %c0_i32_1 = arith.constant 0 : i32
    return %c0_i32, %c0_i32_0 : i32, i32
  }
  func.func @transform_4(%arg0: i32) -> (i32, i32) {
    %c0_i32 = arith.constant 0 : i32
    %c0_i32_0 = arith.constant 0 : i32
    %c0_i32_1 = arith.constant 0 : i32
    return %c0_i32, %c0_i32_0 : i32, i32
  }
  func.func @transform_5(%arg0: i32) -> (i32, i32) {
    %c0_i32 = arith.constant 0 : i32
    %c0_i32_0 = arith.constant 0 : i32
    return %arg0, %c0_i32 : i32, i32
  }
}

</mosaic_0001>

<bundles_post_ra>
// kernel: mimic_lstm_predictor_forward.5
= control target key start
LH: loop header
LB: loop body
LE: loop exit
PB: predicated region body
PF: predicated region fallthrough
CT: control target
= control target key end

     0   :  { %s963_s1 = inlined_call_operand.vmem [shape: bf16[256,256], index: 1, kind: input, shape index: {}]   ;;  %s964_s0 = inlined_call_operand.vmem [shape: f32[64,256], index: 0, kind: input, shape index: {}]   ;;  %s965_s3 = inlined_call_operand.vmem [shape: bf16[256,128], index: 3, kind: input, shape index: {}]   ;;  %s966_s2 = inlined_call_operand.vmem [shape: f32[1,256], index: 2, kind: input, shape index: {}]   ;;  %s967_s4 = inlined_call_operand.vmem [shape: f32[1,128], index: 4, kind: input, shape index: {}]   ;;  %s968_s5 = inlined_call_operand.vmem [shape: f32[64,128], index: 5, kind: output, shape index: {}]  }
   0x1   :  { %v647_v0 = vld [vmem:[%s963_s1 + $0x74] ss:$8 sps:$4 sm:$0xff]   ;;  %v649_v1 = vld [vmem:[%s963_s1 + $0x70] ss:$8 sps:$4 sm:$0xff]   ;;  %v650_v2 = vld [vmem:[%s963_s1 + $0x64] ss:$8 sps:$4 sm:$0xff]  }
   0x2   :  { %249 = vmatprep.subr.bf16.mxu0 %v647_v0  ;;  %v652_v3 = vld [vmem:[%s963_s1 + $0x60] ss:$8 sps:$4 sm:$0xff]   ;;  %v653_v4 = vld [vmem:[%s963_s1 + $0x54] ss:$8 sps:$4 sm:$0xff]   ;;  %v655_v5 = vld [vmem:[%s963_s1 + $0x50] ss:$8 sps:$4 sm:$0xff]  }
   0x3   :  { %250 = vmatpush1.bf16.msra.mxu0 %v649_v1  ;;  %v656_v6 = vld [vmem:[%s963_s1 + $0x44] ss:$8 sps:$4 sm:$0xff]   ;;  %v658_v7 = vld [vmem:[%s963_s1 + $0x40] ss:$8 sps:$4 sm:$0xff]   ;;  %v659_v8 = vld [vmem:[%s963_s1 + $0x34] ss:$8 sps:$4 sm:$0xff]  }
   0x4   :  { %251 = vmatprep.subr.bf16.mxu0 %v650_v2  ;;  %v661_v9 = vld [vmem:[%s963_s1 + $0x30] ss:$8 sps:$4 sm:$0xff]   ;;  %v662_v10 = vld [vmem:[%s963_s1 + $0x24] ss:$8 sps:$4 sm:$0xff]   ;;  %v664_v11 = vld [vmem:[%s963_s1 + $0x20] ss:$8 sps:$4 sm:$0xff]  }
   0x5   :  { %v665_v12 = vld [vmem:[%s963_s1 + $0x14] ss:$8 sps:$4 sm:$0xff]   ;;  %v22_v13 = vld [vmem:[%s964_s0 + $0x8] sm:$0xff]  ;;  %v667_v16 = vld [vmem:[%s963_s1 + $0x10] ss:$8 sps:$4 sm:$0xff]  }
   0x6   :  { %v24_v14 = vld [vmem:[%s964_s0 + $0x18] sm:$0xff]  ;;  %v668_v17 = vld [vmem:[%s963_s1 + $0x4] ss:$8 sps:$4 sm:$0xff]   ;;  %v670_v18 = vld [vmem:[%s963_s1] ss:$8 sps:$4 sm:$0xff]  }
   0x7   :  { %252 = vmatpush1.bf16.msra.mxu0 %v652_v3  ;;  %v38_v15 = vpack.c.bf16 %v24_v14, %v22_v13  ;;  %v671_v19 = vld [vmem:[%s963_s1 + $0xf4] ss:$8 sps:$4 sm:$0xff]   ;;  %v673_v22 = vld [vmem:[%s963_s1 + $0xf0] ss:$8 sps:$4 sm:$0xff]   ;;  %v699_v25 = vld [vmem:[%s965_s3 + $0x68] sm:$0xff]  }
   0x8   :  { %253 = vmatprep.subr.bf16.mxu0 %v653_v4  ;;  %v695_v20 = vld [vmem:[%s965_s3 + $0x78] sm:$0xff]   ;;  %v697_v23 = vld [vmem:[%s965_s3 + $0x70] sm:$0xff]   ;;  %v674_v26 = vld [vmem:[%s963_s1 + $0xe4] ss:$8 sps:$4 sm:$0xff]  }
   0x9   :  { %281 = vmatprep.mubr.bf16.mxu0 %v38_v15  ;;  %v696_v21 = vld [vmem:[%s965_s3 + $0x38] sm:$0xff]   ;;  %607 = vmatprep.subr.bf16.mxu1 %v695_v20  ;;  %v698_v24 = vld [vmem:[%s965_s3 + $0x30] sm:$0xff]   ;;  %v676_v27 = vld [vmem:[%s963_s1 + $0xe0] ss:$8 sps:$4 sm:$0xff]  }
   0xa   :  { %608 = vmatpush3.bf16.msra.mxu1 %v696_v21  ;;  %v700_v28 = vld [vmem:[%s965_s3 + $0x28] sm:$0xff]   ;;  %v701_v29 = vld [vmem:[%s965_s3 + $0x60] sm:$0xff]   ;;  %v677_v30 = vld [vmem:[%s963_s1 + $0xd4] ss:$8 sps:$4 sm:$0xff]  }
   0xb   :  { %254 = vmatpush1.bf16.msra.mxu0 %v655_v5  ;;  %609 = vmatprep.subr.bf16.mxu1 %v697_v23  ;;  %v702_v31 = vld [vmem:[%s965_s3 + $0x20] sm:$0xff]   ;;  %v679_v32 = vld [vmem:[%s963_s1 + $0xd0] ss:$8 sps:$4 sm:$0xff]   ;;  %v683_v37 = vld [vmem:[%s963_s1 + $0xb4] ss:$8 sps:$4 sm:$0xff]  }
   0xc   :  { %255 = vmatprep.subr.bf16.mxu0 %v656_v6  ;;  %v703_v33 = vld [vmem:[%s965_s3 + $0x58] sm:$0xff]   ;;  %v680_v34 = vld [vmem:[%s963_s1 + $0xc4] ss:$8 sps:$4 sm:$0xff]   ;;  %v682_v36 = vld [vmem:[%s963_s1 + $0xc0] ss:$8 sps:$4 sm:$0xff]  }
   0xd   :  { %v704_v35 = vld [vmem:[%s965_s3 + $0x18] sm:$0xff]   ;;  %v686_v39 = vld [vmem:[%s963_s1 + $0xa4] ss:$8 sps:$4 sm:$0xff]   ;;  %v688_v40 = vld [vmem:[%s963_s1 + $0xa0] ss:$8 sps:$4 sm:$0xff]  }
   0xe   :  { %610 = vmatpush3.bf16.msra.mxu1 %v698_v24  ;;  %v685_v38 = vld [vmem:[%s963_s1 + $0xb0] ss:$8 sps:$4 sm:$0xff]   ;;  %v689_v41 = vld [vmem:[%s963_s1 + $0x94] ss:$8 sps:$4 sm:$0xff]   ;;  %v692_v43 = vld [vmem:[%s963_s1 + $0x84] ss:$8 sps:$4 sm:$0xff]  }
   0xf   :  { %256 = vmatpush1.bf16.msra.mxu0 %v658_v7  ;;  %611 = vmatprep.subr.bf16.mxu1 %v699_v25  ;;  %v691_v42 = vld [vmem:[%s963_s1 + $0x90] ss:$8 sps:$4 sm:$0xff]   ;;  %v694_v44 = vld [vmem:[%s963_s1 + $0x80] ss:$8 sps:$4 sm:$0xff]  }
  0x10   :  { %257 = vmatprep.subr.bf16.mxu0 %v659_v8  ;;  %v21_v45 = vld [vmem:[%s964_s0] sm:$0xff]  ;;  %v23_v46 = vld [vmem:[%s964_s0 + $0x10] sm:$0xff]  ;;  %v26_v47 = vld [vmem:[%s964_s0 + $0x28] sm:$0xff]  ;;  %v79_v8 = vlaneseq }
  0x11   :  { %v28_v48 = vld [vmem:[%s964_s0 + $0x38] sm:$0xff]  ;;  %v37_v49 = vpack.c.bf16 %v23_v46, %v21_v45  ;;  %v25_v51 = vld [vmem:[%s964_s0 + $0x20] sm:$0xff]  ;;  %v27_v52 = vld [vmem:[%s964_s0 + $0x30] sm:$0xff] }
  0x12   :  { %612 = vmatpush3.bf16.msra.mxu1 %v700_v28  ;;  %v40_v50 = vpack.c.bf16 %v28_v48, %v26_v47  ;;  %v30_v53 = vld [vmem:[%s964_s0 + $0x48] sm:$0xff]  ;;  %v32_v54 = vld [vmem:[%s964_s0 + $0x58] sm:$0xff]  ;;  %v39_v55 = vpack.c.bf16 %v27_v52, %v25_v51  ;;  %v29_v57 = vld [vmem:[%s964_s0 + $0x40] sm:$0xff] }
  0x13   :  { %258 = vmatpush1.bf16.msra.mxu0 %v661_v9  ;;  %613 = vmatprep.subr.bf16.mxu1 %v701_v29  ;;  %v42_v56 = vpack.c.bf16 %v32_v54, %v30_v53  ;;  %v31_v58 = vld [vmem:[%s964_s0 + $0x50] sm:$0xff]  ;;  %v34_v59 = vld [vmem:[%s964_s0 + $0x68] sm:$0xff]  ;;  %v36_v60 = vld [vmem:[%s964_s0 + $0x78] sm:$0xff]  ;;  %v80_v9 = vshrl.u32 %v79_v8, 7 }
  0x14   :  { %259 = vmatprep.subr.bf16.mxu0 %v662_v10  ;;  %v41_v61 = vpack.c.bf16 %v31_v58, %v29_v57  ;;  %v44_v62 = vpack.c.bf16 %v36_v60, %v34_v59  ;;  %v33_v63 = vld [vmem:[%s964_s0 + $0x60] sm:$0xff]  ;;  %v35_v0 = vld [vmem:[%s964_s0 + $0x70] sm:$0xff]  ;;  %v707_v4 = vld [vmem:[%s965_s3 + $0x48] sm:$0xff]  }
  0x15   :  { %v43_v1 = vpack.c.bf16 %v35_v0, %v33_v63  ;;  %v705_v2 = vld [vmem:[%s965_s3 + $0x50] sm:$0xff]   ;;  %v708_v5 = vld [vmem:[%s965_s3 + $0x8] sm:$0xff]   ;;  %v709_v6 = vld [vmem:[%s965_s3 + $0x40] sm:$0xff]   ;;  %v85_v10 = vsub.s32 1, %v80_v9 }
  0x16   :  { %614 = vmatpush3.bf16.msra.mxu1 %v702_v31  ;;  %v706_v3 = vld [vmem:[%s965_s3 + $0x10] sm:$0xff]   ;;  %v710_v7 = vld [vmem:[%s965_s3] sm:$0xff]  }
  0x17   :  { %260 = vmatpush1.bf16.msra.mxu0 %v664_v11  ;;  %615 = vmatprep.subr.bf16.mxu1 %v703_v33  ;;  %v81_v11 = vsub.s32 0, %v80_v9  ;;  %v590_v8 = vld [vmem:[%s967_s4] ss:$0 sm:$0xff] }
  0x18   :  { %261 = vmatprep.subr.bf16.mxu0 %v665_v12  ;;  %v77_v12 = vld [vmem:[%s966_s2] sm:$0x3] }
  0x19   :  { %v86_v14 = vrot.slane %v77_v12, %v85_v10  ;;  %v82_v15 = vrot.slane %v77_v12, %v81_v11 }
  0x1a   :  { %616 = vmatpush3.bf16.msra.mxu1 %v704_v35 }
  0x1b   :  { %262 = vmatpush1.bf16.msra.mxu0 %v667_v16  ;;  %617 = vmatprep.subr.bf16.mxu1 %v705_v2 }
  0x1c   :  { %263 = vmatprep.subr.bf16.mxu0 %v668_v17 }
  0x1e   :  { %618 = vmatpush3.bf16.msra.mxu1 %v706_v3 }
  0x1f   :  { %264 = vmatpush1.bf16.msra.mxu0 %v670_v18  ;;  %619 = vmatprep.subr.bf16.mxu1 %v707_v4 }
  0x20   :  { %265 = vmatprep.subr.bf16.mxu0 %v671_v19 }
  0x22   :  { %620 = vmatpush3.bf16.msra.mxu1 %v708_v5 }
  0x23   :  { %266 = vmatpush2.bf16.msra.mxu0 %v673_v22  ;;  %621 = vmatprep.subr.bf16.mxu1 %v709_v6 }
  0x24   :  { %267 = vmatprep.subr.bf16.mxu0 %v674_v26 }
  0x26   :  { %622 = vmatpush3.bf16.msra.mxu1 %v710_v7 }
  0x27   :  { %268 = vmatpush2.bf16.msra.mxu0 %v676_v27 }
  0x28   :  { %269 = vmatprep.subr.bf16.mxu0 %v677_v30 }
  0x2b   :  { %270 = vmatpush2.bf16.msra.mxu0 %v679_v32 }
  0x2c   :  { %271 = vmatprep.subr.bf16.mxu0 %v680_v34 }
  0x2f   :  { %272 = vmatpush2.bf16.msra.mxu0 %v682_v36 }
  0x30   :  { %273 = vmatprep.subr.bf16.mxu0 %v683_v37 }
  0x33   :  { %274 = vmatpush2.bf16.msra.mxu0 %v685_v38 }
  0x34   :  { %275 = vmatprep.subr.bf16.mxu0 %v686_v39 }
  0x37   :  { %276 = vmatpush2.bf16.msra.mxu0 %v688_v40 }
  0x38   :  { %277 = vmatprep.subr.bf16.mxu0 %v689_v41 }
  0x3b   :  { %278 = vmatpush2.bf16.msra.mxu0 %v691_v42 }
  0x3c   :  { %279 = vmatprep.subr.bf16.mxu0 %v692_v43 }
  0x3f   :  { %280 = vmatpush2.bf16.msra.mxu0 %v694_v44 }
  0x42   :  { %282 = vmatmul.mubr.bf16.vlgmr.msra.gmra.mxu0 %v37_v49 }
  0x43   :  { %291 = vmatprep.mubr.bf16.mxu0 %v40_v50 }
  0x4a   :  { %292 = vmatmul.mubr.bf16.gmra.mxu0 %v39_v55 }
  0x4b   :  { %301 = vmatprep.mubr.bf16.mxu0 %v42_v56 }
  0x52   :  { %302 = vmatmul.mubr.bf16.gmra.mxu0 %v41_v61 }
  0x53   :  { %311 = vmatprep.mubr.bf16.mxu0 %v44_v62 }
  0x5a   :  { %312 = vmatmul.mubr.bf16.gmra.mxu0 %v43_v1 }
 0x102   :  { %v283_v13 = vpop.f32.mrf.mxu0 }
 0x103   :  { %v284_v20 = vadd.f32 %v283_v13, %v82_v15 }
 0x104   :  { %v285_v16 = vpop.f32.mrf.mxu0 }
 0x105   :  { %v286_v18 = vadd.f32 %v285_v16, %v86_v14  ;;  %v322_v27 = vmax.f32 %v284_v20, 0.0 }
 0x106   :  { %v287_v17 = vpop.f32.mrf.mxu0 }
 0x107   :  { %v288_v19 = vadd.f32 %v287_v17, %v82_v15  ;;  %v323_v25 = vmax.f32 %v286_v18, 0.0 }
 0x108   :  { %v289_v21 = vpop.f32.mrf.mxu0 }
 0x109   :  { %v290_v22 = vadd.f32 %v289_v21, %v86_v14  ;;  %v324_v23 = vmax.f32 %v288_v19, 0.0 }
 0x10a   :  { %v293_v24 = vpop.f32.mrf.mxu0 }
 0x10b   :  { %v325_v26 = vmax.f32 %v290_v22, 0.0  ;;  %v338_v30 = vpack.c.bf16 %v324_v23, %v322_v27  ;;  %v294_v34 = vadd.f32 %v293_v24, %v82_v15 }
 0x10c   :  { %v295_v28 = vpop.f32.mrf.mxu0 }
 0x10d   :  { %v339_v29 = vpack.c.bf16 %v325_v26, %v323_v25  ;;  %v296_v32 = vadd.f32 %v295_v28, %v86_v14  ;;  %v326_v41 = vmax.f32 %v294_v34, 0.0 }
 0x10e   :  { %v297_v31 = vpop.f32.mrf.mxu0 }
 0x10f   :  { %v298_v33 = vadd.f32 %v297_v31, %v82_v15  ;;  %513 = vmatprep.mubr.bf16.mxu1 %v339_v29  ;;  %v327_v39 = vmax.f32 %v296_v32, 0.0 }
 0x110   :  { %v299_v35 = vpop.f32.mrf.mxu0  ;;  %514 = vmatmul.mubr.bf16.vlgmr.msra.gmra.mxu1 %v338_v30 }
 0x111   :  { %v300_v36 = vadd.f32 %v299_v35, %v86_v14  ;;  %v328_v37 = vmax.f32 %v298_v33, 0.0 }
 0x112   :  { %v303_v38 = vpop.f32.mrf.mxu0 }
 0x113   :  { %v329_v40 = vmax.f32 %v300_v36, 0.0  ;;  %v340_v44 = vpack.c.bf16 %v328_v37, %v326_v41  ;;  %v304_v48 = vadd.f32 %v303_v38, %v82_v15 }
 0x114   :  { %v305_v42 = vpop.f32.mrf.mxu0 }
 0x115   :  { %v341_v43 = vpack.c.bf16 %v329_v40, %v327_v39  ;;  %v306_v46 = vadd.f32 %v305_v42, %v86_v14  ;;  %v330_v55 = vmax.f32 %v304_v48, 0.0 }
 0x116   :  { %v307_v45 = vpop.f32.mrf.mxu0 }
 0x117   :  { %v308_v47 = vadd.f32 %v307_v45, %v82_v15  ;;  %521 = vmatprep.mubr.bf16.mxu1 %v341_v43  ;;  %v331_v53 = vmax.f32 %v306_v46, 0.0 }
 0x118   :  { %v309_v49 = vpop.f32.mrf.mxu0  ;;  %522 = vmatmul.mubr.bf16.gmra.mxu1 %v340_v44 }
 0x119   :  { %v310_v50 = vadd.f32 %v309_v49, %v86_v14  ;;  %v332_v51 = vmax.f32 %v308_v47, 0.0 }
 0x11a   :  { %v313_v52 = vpop.f32.mrf.mxu0 }
 0x11b   :  { %v333_v54 = vmax.f32 %v310_v50, 0.0  ;;  %v342_v58 = vpack.c.bf16 %v332_v51, %v330_v55  ;;  %v314_v62 = vadd.f32 %v313_v52, %v82_v15 }
 0x11c   :  { %v315_v56 = vpop.f32.mrf.mxu0 }
 0x11d   :  { %v343_v57 = vpack.c.bf16 %v333_v54, %v331_v53  ;;  %v316_v60 = vadd.f32 %v315_v56, %v86_v14  ;;  %v334_v4 = vmax.f32 %v314_v62, 0.0 }
 0x11e   :  { %v317_v59 = vpop.f32.mrf.mxu0 }
 0x11f   :  { %v318_v61 = vadd.f32 %v317_v59, %v82_v15  ;;  %529 = vmatprep.mubr.bf16.mxu1 %v343_v57  ;;  %v335_v2 = vmax.f32 %v316_v60, 0.0 }
 0x120   :  { %v319_v63 = vpop.f32.mrf.mxu0  ;;  %530 = vmatmul.mubr.bf16.gmra.mxu1 %v342_v58 }
 0x121   :  { %v320_v0 = vadd.f32 %v319_v63, %v86_v14  ;;  %v336_v1 = vmax.f32 %v318_v61, 0.0 }
 0x123   :  { %v337_v3 = vmax.f32 %v320_v0, 0.0  ;;  %v344_v6 = vpack.c.bf16 %v336_v1, %v334_v4 }
 0x125   :  { %v345_v5 = vpack.c.bf16 %v337_v3, %v335_v2 }
 0x127   :  { %537 = vmatprep.mubr.bf16.mxu1 %v345_v5 }
 0x128   :  { %538 = vmatmul.mubr.bf16.gmra.mxu1 %v344_v6 }
 0x1d0   :  { %v623_v7 = vpop.f32.mrf.mxu1 }
 0x1d2   :  { %v624_v9 = vpop.f32.mrf.mxu1 }
 0x1d3   :  { %v625_v10 = vadd.f32 %v624_v9, %v623_v7 }
 0x1d4   :  { %v626_v11 = vpop.f32.mrf.mxu1 }
 0x1d5   :  { %v516_v12 = vadd.f32 %v625_v10, %v590_v8 }
 0x1d6   :  { %v627_v13 = vpop.f32.mrf.mxu1 }
 0x1d7   :  { %546 = vst [vmem:[%s968_s5] sm:$0xff] %v516_v12  ;;  %v628_v14 = vadd.f32 %v627_v13, %v626_v11 }
 0x1d8   :  { %v629_v15 = vpop.f32.mrf.mxu1 }
 0x1d9   :  { %v519_v16 = vadd.f32 %v628_v14, %v590_v8 }
 0x1da   :  { %v630_v17 = vpop.f32.mrf.mxu1 }
 0x1db   :  { %547 = vst [vmem:[%s968_s5 + $0x8] sm:$0xff] %v519_v16  ;;  %v631_v18 = vadd.f32 %v630_v17, %v629_v15 }
 0x1dc   :  { %v632_v19 = vpop.f32.mrf.mxu1 }
 0x1dd   :  { %v524_v20 = vadd.f32 %v631_v18, %v590_v8 }
 0x1de   :  { %v633_v21 = vpop.f32.mrf.mxu1 }
 0x1df   :  { %548 = vst [vmem:[%s968_s5 + $0x10] sm:$0xff] %v524_v20  ;;  %v634_v22 = vadd.f32 %v633_v21, %v632_v19 }
 0x1e0   :  { %v635_v23 = vpop.f32.mrf.mxu1 }
 0x1e1   :  { %v527_v24 = vadd.f32 %v634_v22, %v590_v8 }
 0x1e2   :  { %v636_v25 = vpop.f32.mrf.mxu1 }
 0x1e3   :  { %549 = vst [vmem:[%s968_s5 + $0x18] sm:$0xff] %v527_v24  ;;  %v637_v26 = vadd.f32 %v636_v25, %v635_v23 }
 0x1e4   :  { %v638_v27 = vpop.f32.mrf.mxu1 }
 0x1e5   :  { %v532_v28 = vadd.f32 %v637_v26, %v590_v8 }
 0x1e6   :  { %v639_v29 = vpop.f32.mrf.mxu1 }
 0x1e7   :  { %550 = vst [vmem:[%s968_s5 + $0x20] sm:$0xff] %v532_v28  ;;  %v640_v30 = vadd.f32 %v639_v29, %v638_v27 }
 0x1e8   :  { %v641_v31 = vpop.f32.mrf.mxu1 }
 0x1e9   :  { %v535_v32 = vadd.f32 %v640_v30, %v590_v8 }
 0x1ea   :  { %v642_v33 = vpop.f32.mrf.mxu1 }
 0x1eb   :  { %551 = vst [vmem:[%s968_s5 + $0x28] sm:$0xff] %v535_v32  ;;  %v643_v34 = vadd.f32 %v642_v33, %v641_v31 }
 0x1ec   :  { %v644_v35 = vpop.f32.mrf.mxu1 }
 0x1ed   :  { %v540_v36 = vadd.f32 %v643_v34, %v590_v8 }
 0x1ee   :  { %v645_v37 = vpop.f32.mrf.mxu1 }
 0x1ef   :  { %552 = vst [vmem:[%s968_s5 + $0x30] sm:$0xff] %v540_v36  ;;  %v646_v38 = vadd.f32 %v645_v37, %v644_v35 }
 0x1f1   :  { %v543_v39 = vadd.f32 %v646_v38, %v590_v8 }
 0x1f3   :  { %553 = vst [vmem:[%s968_s5 + $0x38] sm:$0xff] %v543_v39 }

// kernel: mimic_lstm_predictor_forward.3
= control target key start
LH: loop header
LB: loop body
LE: loop exit
PB: predicated region body
PF: predicated region fallthrough
CT: control target
= control target key end

     0   :  { %s3393_s0 = inlined_call_operand.vmem [shape: f32[8,8,16], index: 0, kind: input, shape index: {}]   ;;  %s3394_s1 = inlined_call_operand.hbm [shape: bf16[2,16,512], index: 1, kind: input, shape index: {}]   ;;  %s3395_s2 = inlined_call_operand.hbm [shape: bf16[2,128,512], index: 2, kind: input, shape index: {}]   ;;  %s3396_s3 = inlined_call_operand.hbm [shape: f32[2,1,512], index: 3, kind: input, shape index: {}]   ;;  %s3397_s4 = inlined_call_operand.vmem [shape: f32[8,8,256], index: 4, kind: output, shape index: {}]  }
   0x1   :  { %3400 = sst [smem:[#allocation14_spill]] %s3394_s1 }
   0x2   :  { %3401 = sst [smem:[#allocation15_spill]] %s3395_s2 }
   0x3   :  { %9 = vsyncpa [#allocation6], 0 }
   0x4   :  { %11 = vsyncpa [#allocation6 + $0x1], 0 }
   0x5   :  { %12 = vsyncpa [#allocation8], 0 }
   0x6   :  { %14 = vsyncpa [#allocation8 + $0x1], 0  ;;  %s2599_s15 = smov 0   ;;  %s2601_s16 = smov 0  }
   0x7   :  { %s2603_s17 = smov 0   ;;  %s2605_s18 = smov 0  }
   0x8   :  { %s2607_s19 = smov 0   ;;  %s2609_s20 = smov 0  }
   0x9 LB: > { %s2628_s21 = sadd.s32 4294967295, %s2565_s20   ;;  %s32_s22 = sadd.s32 1, %s2561_s19  ;;  %s2565_s20 = sphi %s2609_s20, %s20_s20   ;;  %s2561_s19 = sphi %s2607_s19, %s3415_s19   ;;  %s2557_s18 = sphi %s2605_s18, %s3414_s18   ;;  %s2553_s17 = sphi %s2603_s17, %s3413_s17   ;;  %s2549_s16 = sphi %s2601_s16, %s3412_s16   ;;  %s2545_s15 = sphi %s2599_s15, %s3411_s15  }
   0xa   : > { %p34_p0 = scmp.ge.s32.totalorder %s32_s22, 2  ;;  %s71_s23 = sadd.s32 1, %s2553_s17 }
   0xb   : > { %p78_p1 = scmp.ne.s32.totalorder %s2553_s17, %s2549_s16  ;;  %p79_p2 = scmp.eq.s32.totalorder %s2565_s20, 0 }
   0xc   : > { %s3417_s22 = smov (%p34_p0, %s32_s22), 0  ;;  %p84_p4 = scmp.ne.s32.totalorder %s2549_s16, %s2545_s15 }
   0xd   : > { %3402 = sst [smem:[#allocation13_spill]] %s3417_s22  ;;  %p80_p3 = por %p79_p2, %p78_p1 }
   0xe   : > { %s68_s24 = ssub.s32 %s2561_s19, %s3417_s22  ;;  %p85_p5 = scmp.eq.s32.totalorder %s2628_s21, 0 }
   0xf   : > { %p69_p6 = scmp.eq.s32.totalorder %s68_s24, 0  ;;  %p168_p7 = scmp.eq.s32.totalorder %s2628_s21, 1 }
  0x10   : > { %p2642_p8 = por %p85_p5, %p84_p4  ;;  %p2160_p10 = scmp.lt.s32.totalorder %s2565_s20, 2 }
  0x11   : > { %s2647_s26 = scalar_select %p69_p6, %s2553_s17, %s71_s23  }
  0x12   : > { %p2649_p9 = por %p168_p7, %p78_p1  ;;  %s2655_s28 = sand.u32 1, %s2553_s17  }
  0x13   : > { %p2657_p11 = pnand %p2160_p10, %p80_p3  ;;  %s230_s30 = sand.u32 1, %s2565_s20  }
  0x14   : > { %s2026_s5 = sshll.u32 %s2655_s28, 8  ;;  %s2134_s6 = sshll.u32 %s2561_s19, 12 }
  0x15   : > { %s3406_s2 = sld [smem:[#allocation15_spill]]  ;;  %s234_s10 = scalar_lea.vmem [#allocation7], %s2026_s5 }
  0x16   : > { %s241_s11 = sshll.u32 %s234_s10, 4  ;;  %p2032_p12 = scmp.ge.s32.totalorder %s2565_s20, 1  ;;  %s242_s11 = int_to_ptr.vmem [resolvable:$true] %s241_s11 }
  0x17   : > { %s2668_s12 = scalar_lea.sflag [#allocation8], %s230_s30  ;;  %p2429_p13 = pneg %p2657_p11 }
  0x18   : > { %s2440_s13 = scalar_lea.vmem %s242_s11, 4096  ;;  %s2567_s14 = smov [#allocation7]  }
  0x19   : > { %p2441_p0 = scmp.ne.s32.totalorder %s242_s11, %s2440_s13  ;;  %s2445_s15 = sshll.u32 %s2567_s14, 4  ;;  %s2446_s15 = int_to_ptr.vmem [resolvable:$false] %s2445_s15 }
  0x1a   : > { %s2447_s23 = scalar_lea.vmem %s2446_s15, 8192  ;;  %p2448_p3 = scmp.lt.s32.totalorder %s242_s11, %s2446_s15 }
  0x1b   : > { %s240_s9 = scalar_lea.hbm %s3406_s2, %s2134_s6  ;;  %p2443_p1 = pnand %p2441_p0, %p2429_p13 }
  0x1c   : > { %p2449_p4 = scmp.lt.s32.totalorder %s2447_s23, %s2440_s13 }
  0x1d   : > { %p2444_p2 = pneg %p2443_p1 }
  0x1e   : > { %p2450_p5 = por %p2449_p4, %p2448_p3 }
  0x20   : > { %p2451_p6 = pnand %p2450_p5, %p2444_p2 }
  0x22   : > { %2454 = shalt.err (!%p2451_p6)
}
  0x23   : > { %s3399_s24 = smov 256   ;;  %s2569_s30 = smov 16  }
  0x24   : > { %2156 = dma.hbm_to_vmem [thread:$0]  (!%p2657_p11), %s240_s9, 4096, %s242_s11, %s2668_s12, %s3399_s24, %s3399_s24, %s2569_s30  }
  0x25   : > { %p268_p7 = scmp.lt.s32.totalorder %s2565_s20, 3  ;;  %s2023_s6 = sshll.u32 %s2655_s28, 5 }
  0x26   : > { %s2133_s7 = sshll.u32 %s2561_s19, 9  ;;  %s3408_s1 = sld [smem:[#allocation14_spill]] }
  0x27   : > { %p2684_p10 = pnand %p2032_p12, %p268_p7  ;;  %s213_s14 = scalar_lea.vmem [#allocation5], %s2023_s6 }
  0x28   : > { %s220_s15 = sshll.u32 %s213_s14, 4  ;;  %s2029_s23 = sshll.u32 %s2655_s28, 2  ;;  %s221_s15 = int_to_ptr.vmem [resolvable:$true] %s220_s15 }
  0x29   : > { %s210_s2 = scalar_lea.sflag [#allocation6], %s2655_s28  ;;  %s2468_s22 = scalar_lea.vmem %s221_s15, 512 }
  0x2a   : > { %p2469_p0 = scmp.ne.s32.totalorder %s221_s15, %s2468_s22  ;;  %s2570_s9 = smov [#allocation5]  }
  0x2b   : > { %s2473_s11 = sshll.u32 %s2570_s9, 4  ;;  %s2474_s11 = int_to_ptr.vmem [resolvable:$false] %s2473_s11 }
  0x2c   : > { %s219_s13 = scalar_lea.hbm %s3408_s1, %s2133_s7  ;;  %p2471_p1 = pnand %p2469_p0, %p2429_p13 }
  0x2d   : > { %s2475_s24 = scalar_lea.vmem %s2474_s11, 1024  ;;  %p2476_p2 = scmp.lt.s32.totalorder %s221_s15, %s2474_s11 }
  0x2e   : > { %p2472_p12 = pneg %p2471_p1  ;;  %p2477_p3 = scmp.lt.s32.totalorder %s2475_s24, %s2468_s22 }
  0x30   : > { %p2478_p4 = por %p2477_p3, %p2476_p2 }
  0x32   : > { %p2479_p5 = pnand %p2478_p4, %p2472_p12 }
  0x34   : > { %2482 = shalt.err (!%p2479_p5)
}
  0x35   : > { %s3409_s6 = smov 256   ;;  %s2135_s28 = sshll.u32 %s2561_s19, 6 }
  0x36   : > { %2153 = dma.hbm_to_vmem [thread:$0]  (!%p2657_p11), %s219_s13, 512, %s221_s15, %s210_s2, %s3409_s6, %s3409_s6, %s2569_s30  }
  0x37   : > { %s261_s10 = scalar_lea.hbm %s3396_s3, %s2135_s28  ;;  %s255_s14 = scalar_lea.vmem [#allocation9], %s2029_s23 }
  0x38   : > { %s263_s9 = sshll.u32 %s255_s14, 4  ;;  %s2571_s24 = smov [#allocation9]   ;;  %s264_s9 = int_to_ptr.vmem [resolvable:$true] %s263_s9 }
  0x39   : > { %s2496_s22 = scalar_lea.vmem %s264_s9, 64  ;;  %s2501_s11 = sshll.u32 %s2571_s24, 4  ;;  %s2502_s11 = int_to_ptr.vmem [resolvable:$false] %s2501_s11 }
  0x3a   : > { %p2497_p6 = scmp.ne.s32.totalorder %s264_s9, %s2496_s22  ;;  %s2503_s1 = scalar_lea.vmem %s2502_s11, 128 }
  0x3b   : > { %p2504_p1 = scmp.lt.s32.totalorder %s264_s9, %s2502_s11  ;;  %p2505_p12 = scmp.lt.s32.totalorder %s2503_s1, %s2496_s22 }
  0x3c   : > { %p2499_p7 = pnand %p2497_p6, %p2429_p13 }
  0x3d   : > { %p2506_p2 = por %p2505_p12, %p2504_p1 }
  0x3e   : > { %p2500_p0 = pneg %p2499_p7 }
  0x40   : > { %p2507_p3 = pnand %p2506_p2, %p2500_p0 }
  0x42   : > { %2510 = shalt.err (!%p2507_p3)
}
  0x43   : > { %2159 = dma.hbm_to_vmem [thread:$0]  (!%p2657_p11), %s261_s10, 64, %s264_s9, %s2668_s12  }
  0x44   : > { %272 = sbr.rel (%p2684_p10) target bundleno = 2142 (0x85e), region = 36  ;;  %s2716_s2 = sand.u32 (!%p2684_p10), 1, %s2549_s16  }
  0x45   : > { %s2033_s30 = sshll.u32 (!%p2684_p10), %s2716_s2, 5  ;;  %s275_s13 = scalar_lea.sflag (!%p2684_p10), [#allocation6], %s2716_s2 }
  0x46   : > { %s278_s15 = scalar_lea.vmem (!%p2684_p10), [#allocation5], %s2033_s30 }
  0x49   : > { %2536 = dma.done.wait (%p2642_p8), %s275_s13, 512  }
  0x4a   : > { %2538 = vsyncadd (%p2642_p8), %s275_s13, 4294966784  ;;  %s283_s1 = sand.u32 1, %s2628_s21   ;;  %s2034_s29 = sshll.u32 %s2716_s2, 8 }
  0x4b   : > { %s284_s12 = scalar_lea.sflag [#allocation8], %s283_s1  ;;  %s2726_s5 = scalar_lea.vmem [#allocation7], %s2034_s29 }
  0x4c   : > { %2540 = dma.done.wait (%p2642_p8), %s284_s12, 4160  }
  0x4d   : > { %2542 = vsyncadd (%p2642_p8), %s284_s12, 4294963136  ;;  %v2572_v0 = vmov 0   ;;  %v2213_v1 = vld [vmem:[%s278_s15 + $0x4] ss:$16 sps:$4 sm:$0xff]   ;;  %v2215_v2 = vld [vmem:[%s278_s15 + $0xc] ss:$16 sps:$4 sm:$0xff]   ;;  %v379_v50 = vlaneseq }
  0x4e   : > { %464 = vmatprep.mubr.bf16.mxu0 %v2572_v0  ;;  %537 = vmatprep.mubr.bf16.mxu1 %v2572_v0  ;;  %v2217_v3 = vld [vmem:[%s278_s15] ss:$16 sps:$4 sm:$0xff]   ;;  %v2218_v4 = vld [vmem:[%s278_s15 + $0x8] ss:$16 sps:$4 sm:$0xff]   ;;  %vm419_vm0 = vcmask 130048   ;;  %v2573_v49 = vmov 0.0|0.0  }
  0x4f   : > { %446 = vmatprep.subr.bf16.mxu0 %v2213_v1  ;;  %v361_v5 = vld [vmem:[%s3393_s0] sm:$0xff]  ;;  %519 = vmatprep.subr.bf16.mxu1 %v2215_v2  ;;  %v362_v6 = vld [vmem:[%s3393_s0 + $0x8] sm:$0xff]  ;;  %v363_v14 = vld [vmem:[%s3393_s0 + $0x10] sm:$0xff]  ;;  %s2035_s1 = sshll.u32 %s2716_s2, 2  ;;  %v380_v51 = vshrl.u32 %v379_v50, 7  ;;  %p644_p8 = scmp.eq.s32.totalorder %s2557_s18, 0 }
  0x50   : > { %447 = vmatpush1.bf16.msra.mxu0 %v2217_v3  ;;  %520 = vmatpush1.bf16.msra.mxu1 %v2218_v4  ;;  %v369_v7 = vpack.c.bf16 %v362_v6, %v361_v5  ;;  %v2741_v8 = vld [vmem:[%s2726_s5 + $0xe4] ss:$16 sps:$4 sm:$0xff]   ;;  %v2744_v9 = vld [vmem:[%s2726_s5 + $0xe0] ss:$16 sps:$4 sm:$0xff]   ;;  %v2751_v11 = vld [vmem:[%s2726_s5 + $0xec] ss:$16 sps:$4 sm:$0xff]  }
  0x51   : > { %v2747_v10 = vld [vmem:[%s2726_s5 + $0xc4] ss:$16 sps:$4 sm:$0xff]   ;;  %814 = vmatprep.subr.bf16.mxu0 %v2741_v8  ;;  %v2756_v12 = vld [vmem:[%s2726_s5 + $0xc0] ss:$16 sps:$4 sm:$0xff]   ;;  %v2759_v13 = vld [vmem:[%s2726_s5 + $0xe8] ss:$16 sps:$4 sm:$0xff]   ;;  %855 = vmatprep.subr.bf16.mxu1 %v2751_v11 }
  0x52   : > { %v364_v15 = vld [vmem:[%s3393_s0 + $0x18] sm:$0xff]  ;;  %v2772_v16 = vld [vmem:[%s2726_s5 + $0xa4] ss:$16 sps:$4 sm:$0xff]   ;;  %v2783_v20 = vld [vmem:[%s2726_s5 + $0xa0] ss:$16 sps:$4 sm:$0xff]   ;;  %v381_v52 = vsub.s32 0, %v380_v51 }
  0x53   : > { %2041 = vmatmul.mubr.msk.bf16.vlgmr.msra.gmra.mxu0 %vm419_vm0, %v369_v7  ;;  %2045 = vmatmul.mubr.msk.bf16.vlgmr.msra.gmra.mxu1 %vm419_vm0, %v369_v7  ;;  %v2777_v17 = vld [vmem:[%s2726_s5 + $0xcc] ss:$16 sps:$4 sm:$0xff]   ;;  %v2780_v18 = vld [vmem:[%s2726_s5 + $0xc8] ss:$16 sps:$4 sm:$0xff]   ;;  %v370_v19 = vpack.c.bf16 %v364_v15, %v363_v14  ;;  %v2792_v22 = vld [vmem:[%s2726_s5 + $0x84] ss:$16 sps:$4 sm:$0xff]  }
  0x54   : > { %815 = vmatpush1.bf16.msra.mxu0 %v2744_v9  ;;  %474 = vmatprep.mubr.bf16.mxu0 %v2572_v0  ;;  %v2788_v21 = vld [vmem:[%s2726_s5 + $0xac] ss:$16 sps:$4 sm:$0xff]   ;;  %v2796_v23 = vld [vmem:[%s2726_s5 + $0x80] ss:$16 sps:$4 sm:$0xff]   ;;  %v2799_v24 = vld [vmem:[%s2726_s5 + $0xa8] ss:$16 sps:$4 sm:$0xff]  }
  0x55   : > { %816 = vmatprep.subr.bf16.mxu0 %v2747_v10  ;;  %547 = vmatprep.mubr.bf16.mxu1 %v2572_v0  ;;  %v365_v25 = vld [vmem:[%s3393_s0 + $0x20] sm:$0xff]  ;;  %v366_v26 = vld [vmem:[%s3393_s0 + $0x28] sm:$0xff]  ;;  %v367_v36 = vld [vmem:[%s3393_s0 + $0x30] sm:$0xff]  ;;  %v389_v53 = vsub.s32 2, %v380_v51  ;;  %s296_s29 = scalar_lea.vmem [#allocation9], %s2035_s1  ;;  %v385_v55 = vsub.s32 1, %v380_v51 }
  0x56   : > { %856 = vmatpush1.bf16.msra.mxu1 %v2759_v13  ;;  %v2812_v27 = vld [vmem:[%s2726_s5 + $0x8c] ss:$16 sps:$4 sm:$0xff]   ;;  %v2817_v28 = vld [vmem:[%s2726_s5 + $0x64] ss:$16 sps:$4 sm:$0xff]   ;;  %v2822_v29 = vld [vmem:[%s2726_s5 + $0x88] ss:$16 sps:$4 sm:$0xff]   ;;  %v371_v30 = vpack.c.bf16 %v366_v26, %v365_v25 }
  0x57   : > { %857 = vmatprep.subr.bf16.mxu1 %v2777_v17  ;;  %v2825_v31 = vld [vmem:[%s2726_s5 + $0x60] ss:$16 sps:$4 sm:$0xff]   ;;  %v2830_v32 = vld [vmem:[%s2726_s5 + $0x6c] ss:$16 sps:$4 sm:$0xff]   ;;  %v2834_v33 = vld [vmem:[%s2726_s5 + $0x44] ss:$16 sps:$4 sm:$0xff]  }
  0x58   : > { %817 = vmatpush1.bf16.msra.mxu0 %v2756_v12  ;;  %v2838_v34 = vld [vmem:[%s2726_s5 + $0x40] ss:$16 sps:$4 sm:$0xff]   ;;  %v2841_v35 = vld [vmem:[%s2726_s5 + $0x68] ss:$16 sps:$4 sm:$0xff]   ;;  %v2849_v37 = vld [vmem:[%s2726_s5 + $0x4c] ss:$16 sps:$4 sm:$0xff]  }
  0x59   : > { %818 = vmatprep.subr.bf16.mxu0 %v2772_v16  ;;  %v368_v38 = vld [vmem:[%s3393_s0 + $0x38] sm:$0xff]  ;;  %v2859_v39 = vld [vmem:[%s2726_s5 + $0x24] ss:$16 sps:$4 sm:$0xff]   ;;  %v2869_v42 = vld [vmem:[%s2726_s5 + $0x20] ss:$16 sps:$4 sm:$0xff]   ;;  %v393_v56 = vsub.s32 3, %v380_v51 }
  0x5a   : > { %858 = vmatpush1.bf16.msra.mxu1 %v2780_v18  ;;  %v2864_v40 = vld [vmem:[%s2726_s5 + $0x48] ss:$16 sps:$4 sm:$0xff]   ;;  %v372_v41 = vpack.c.bf16 %v368_v38, %v367_v36  ;;  %v2872_v43 = vld [vmem:[%s2726_s5 + $0x2c] ss:$16 sps:$4 sm:$0xff]   ;;  %v2876_v44 = vld [vmem:[%s2726_s5 + $0x4] ss:$16 sps:$4 sm:$0xff]  }
  0x5b   : > { %2042 = vmatmul.mubr.msk.bf16.gmra.mxu0 %vm419_vm0, %v370_v19  ;;  %2046 = vmatmul.mubr.msk.bf16.gmra.mxu1 %vm419_vm0, %v370_v19  ;;  %v2880_v45 = vld [vmem:[%s2726_s5 + $0x28] ss:$16 sps:$4 sm:$0xff]   ;;  %v2885_v46 = vld [vmem:[%s2726_s5 + $0xc] ss:$16 sps:$4 sm:$0xff]   ;;  %v2889_v47 = vld [vmem:[%s2726_s5] ss:$16 sps:$4 sm:$0xff]  }
  0x5c   : > { %819 = vmatpush1.bf16.msra.mxu0 %v2783_v20  ;;  %859 = vmatprep.subr.bf16.mxu1 %v2788_v21  ;;  %v2896_v48 = vld [vmem:[%s2726_s5 + $0x8] ss:$16 sps:$4 sm:$0xff]   ;;  %v377_v54 = vld [vmem:[%s296_s29] sm:$0xf]  ;;  %s2978_s12 = scalar_select %p644_p8, 0, 7 }
  0x5d   : > { %820 = vmatprep.subr.bf16.mxu0 %v2792_v22  ;;  %484 = vmatprep.mubr.bf16.mxu0 %v2572_v0  ;;  %v2939_v57 = vrot.slane %v377_v54, %v381_v52  ;;  %v2941_v58 = vrot.slane %v377_v54, %v389_v53  ;;  %v2943_v59 = vrot.slane %v377_v54, %v385_v55  ;;  %s2036_s25 = sshll.u32 %s2716_s2, 6 }
  0x5e   : > { %557 = vmatprep.mubr.bf16.mxu1 %v2572_v0  ;;  %860 = vmatpush1.bf16.msra.mxu1 %v2799_v24  ;;  %v2945_v60 = vrot.slane %v377_v54, %v393_v56  ;;  %s2136_s21 = sshll.u32 %s2978_s12, 5  ;;  %s2086_s6 = sshll.u32 %s2978_s12, 3 }
  0x5f   : > { %861 = vmatprep.subr.bf16.mxu1 %v2812_v27  ;;  %s648_s23 = scalar_lea.vmem [#allocation2], %s2136_s21  ;;  %s2990_s28 = scalar_lea.vmem [#allocation10], %s2036_s25 }
  0x60   : > { %821 = vmatpush1.bf16.msra.mxu0 %v2796_v23  ;;  %s925_s7 = scalar_lea.vmem %s2990_s28, %s2086_s6 [#allocation10] }
  0x61   : > { %822 = vmatprep.subr.bf16.mxu0 %v2817_v28  ;;  %s3029_s2 = scalar_select %p644_p8, 1, 6 }
  0x62   : > { %862 = vmatpush1.bf16.msra.mxu1 %v2822_v29  ;;  %s3074_s22 = scalar_select %p644_p8, 2, 5 }
  0x63   : > { %2043 = vmatmul.mubr.msk.bf16.gmra.mxu0 %vm419_vm0, %v371_v30  ;;  %2047 = vmatmul.mubr.msk.bf16.gmra.mxu1 %vm419_vm0, %v371_v30  ;;  %s2137_s8 = sshll.u32 %s3029_s2, 5  ;;  %s2092_s14 = sshll.u32 %s3029_s2, 3 }
  0x64   : > { %823 = vmatpush1.bf16.msra.mxu0 %v2825_v31  ;;  %863 = vmatprep.subr.bf16.mxu1 %v2830_v32  ;;  %s930_s10 = scalar_lea.vmem [#allocation2], %s2137_s8  ;;  %s1047_s9 = scalar_lea.vmem %s2990_s28, %s2092_s14 [#allocation10] }
  0x65   : > { %824 = vmatprep.subr.bf16.mxu0 %v2834_v33  ;;  %494 = vmatprep.mubr.bf16.mxu0 %v2572_v0  ;;  %s2138_s24 = sshll.u32 %s3074_s22, 5  ;;  %s2098_s30 = sshll.u32 %s3074_s22, 3 }
  0x66   : > { %567 = vmatprep.mubr.bf16.mxu1 %v2572_v0  ;;  %864 = vmatpush1.bf16.msra.mxu1 %v2841_v35  ;;  %s1052_s11 = scalar_lea.vmem [#allocation2], %s2138_s24  ;;  %s1169_s13 = scalar_lea.vmem %s2990_s28, %s2098_s30 [#allocation10] }
  0x67   : > { %865 = vmatprep.subr.bf16.mxu1 %v2849_v37  ;;  %s3125_s15 = scalar_select %p644_p8, 3, 4 }
  0x68   : > { %825 = vmatpush1.bf16.msra.mxu0 %v2838_v34  ;;  %s3305_s8 = scalar_select %p644_p8, 5, 2 }
  0x69   : > { %826 = vmatprep.subr.bf16.mxu0 %v2859_v39  ;;  %s2139_s1 = sshll.u32 %s3125_s15, 5  ;;  %s2104_s12 = sshll.u32 %s3125_s15, 3 }
  0x6a   : > { %866 = vmatpush1.bf16.msra.mxu1 %v2864_v40  ;;  %s1174_s29 = scalar_lea.vmem [#allocation2], %s2139_s1  ;;  %s1291_s21 = scalar_lea.vmem %s2990_s28, %s2104_s12 [#allocation10] }
  0x6b   : > { %2044 = vmatmul.mubr.msk.bf16.gmra.mxu0 %vm419_vm0, %v372_v41  ;;  %2048 = vmatmul.mubr.msk.bf16.gmra.mxu1 %vm419_vm0, %v372_v41  ;;  %s3348_s22 = scalar_select %p644_p8, 6, 1 }
  0x6c   : > { %827 = vmatpush1.bf16.msra.mxu0 %v2869_v42  ;;  %867 = vmatprep.subr.bf16.mxu1 %v2872_v43  ;;  %s3356_s15 = scalar_select %p644_p8, 7, 0 }
  0x6d   : > { %828 = vmatprep.subr.bf16.mxu0 %v2876_v44  ;;  %846 = vmatprep.mubr.bf16.mxu0 %v2572_v0  ;;  %s2142_s24 = sshll.u32 %s3348_s22, 5  ;;  %s2122_s30 = sshll.u32 %s3348_s22, 3 }
  0x6e   : > { %868 = vmatpush1.bf16.msra.mxu1 %v2880_v45  ;;  %887 = vmatprep.mubr.bf16.mxu1 %v2572_v0  ;;  %s2143_s1 = sshll.u32 %s3356_s15, 5  ;;  %s2128_s12 = sshll.u32 %s3356_s15, 3 }
  0x6f   : > { %869 = vmatprep.subr.bf16.mxu1 %v2885_v46 }
  0x70   : > { %829 = vmatpush1.bf16.msra.mxu0 %v2889_v47 }
  0x71   : > { %936 = vmatprep.subr.bf16.mxu0 %v2741_v8 }
  0x72   : > { %870 = vmatpush1.bf16.msra.mxu1 %v2896_v48 }
  0x73   : > { %847 = vmatmul.mubr.bf16.vlgmr.msra.gmra.mxu0 %v2573_v49  ;;  %977 = vmatprep.subr.bf16.mxu1 %v2751_v11 }
  0x74   : > { %937 = vmatpush1.bf16.msra.mxu0 %v2744_v9  ;;  %968 = vmatprep.mubr.bf16.mxu0 %v2572_v0 }
  0x75   : > { %888 = vmatmul.mubr.bf16.vlgmr.msra.gmra.mxu1 %v2573_v49  ;;  %938 = vmatprep.subr.bf16.mxu0 %v2747_v10 }
  0x76   : > { %978 = vmatpush1.bf16.msra.mxu1 %v2759_v13  ;;  %1009 = vmatprep.mubr.bf16.mxu1 %v2572_v0 }
  0x77   : > { %979 = vmatprep.subr.bf16.mxu1 %v2777_v17 }
  0x78   : > { %939 = vmatpush1.bf16.msra.mxu0 %v2756_v12 }
  0x79   : > { %940 = vmatprep.subr.bf16.mxu0 %v2772_v16 }
  0x7a   : > { %980 = vmatpush1.bf16.msra.mxu1 %v2780_v18 }
  0x7b   : > { %981 = vmatprep.subr.bf16.mxu1 %v2788_v21 }
  0x7c   : > { %941 = vmatpush1.bf16.msra.mxu0 %v2783_v20 }
  0x7d   : > { %942 = vmatprep.subr.bf16.mxu0 %v2792_v22 }
  0x7e   : > { %982 = vmatpush1.bf16.msra.mxu1 %v2799_v24 }
  0x7f   : > { %983 = vmatprep.subr.bf16.mxu1 %v2812_v27 }
  0x80   : > { %943 = vmatpush1.bf16.msra.mxu0 %v2796_v23 }
  0x81   : > { %944 = vmatprep.subr.bf16.mxu0 %v2817_v28 }
  0x82   : > { %984 = vmatpush1.bf16.msra.mxu1 %v2822_v29 }
  0x83   : > { %985 = vmatprep.subr.bf16.mxu1 %v2830_v32 }
  0x84   : > { %945 = vmatpush1.bf16.msra.mxu0 %v2825_v31 }
  0x85   : > { %946 = vmatprep.subr.bf16.mxu0 %v2834_v33 }
  0x86   : > { %986 = vmatpush1.bf16.msra.mxu1 %v2841_v35 }
  0x87   : > { %987 = vmatprep.subr.bf16.mxu1 %v2849_v37 }
  0x88   : > { %947 = vmatpush1.bf16.msra.mxu0 %v2838_v34 }
  0x89   : > { %948 = vmatprep.subr.bf16.mxu0 %v2859_v39 }
  0x8a   : > { %988 = vmatpush1.bf16.msra.mxu1 %v2864_v40 }
  0x8b   : > { %989 = vmatprep.subr.bf16.mxu1 %v2872_v43 }
  0x8c   : > { %949 = vmatpush1.bf16.msra.mxu0 %v2869_v42 }
  0x8d   : > { %950 = vmatprep.subr.bf16.mxu0 %v2876_v44 }
  0x8e   : > { %990 = vmatpush1.bf16.msra.mxu1 %v2880_v45 }
  0x8f   : > { %991 = vmatprep.subr.bf16.mxu1 %v2885_v46 }
  0x90   : > { %951 = vmatpush1.bf16.msra.mxu0 %v2889_v47 }
  0x91   : > { %1058 = vmatprep.subr.bf16.mxu0 %v2741_v8 }
  0x92   : > { %992 = vmatpush1.bf16.msra.mxu1 %v2896_v48 }
  0x93   : > { %1099 = vmatprep.subr.bf16.mxu1 %v2751_v11 }
 0x113   : > { %v466_v61 = vpop.f32.mrf.mxu0  ;;  %v539_v62 = vpop.f32.mrf.mxu1 }
 0x114   : > { %v467_v63 = vadd.f32 %v466_v61, %v2939_v57  ;;  %v540_v1 = vadd.f32 %v539_v62, %v2941_v58 }
 0x115   : > { %v468_v2 = vpop.f32.mrf.mxu0  ;;  %v541_v3 = vpop.f32.mrf.mxu1 }
 0x116   : > { %578 = vst [vmem:[#allocation2] sm:$0xff] %v467_v63  ;;  %580 = vst [vmem:[#allocation2 + $0x10] sm:$0xff] %v540_v1  ;;  %v469_v4 = vadd.f32 %v468_v2, %v2943_v59  ;;  %v542_v5 = vadd.f32 %v541_v3, %v2945_v60 }
 0x117   : > { %v470_v6 = vpop.f32.mrf.mxu0  ;;  %v543_v7 = vpop.f32.mrf.mxu1 }
 0x118   : > { %579 = vst [vmem:[#allocation2 + $0x8] sm:$0xff] %v469_v4  ;;  %581 = vst [vmem:[#allocation2 + $0x18] sm:$0xff] %v542_v5  ;;  %v471_v14 = vadd.f32 %v470_v6, %v2939_v57  ;;  %v544_v15 = vadd.f32 %v543_v7, %v2941_v58 }
 0x119   : > { %v472_v19 = vpop.f32.mrf.mxu0  ;;  %v545_v25 = vpop.f32.mrf.mxu1 }
 0x11a   : > { %582 = vst [vmem:[#allocation2 + $0x20] sm:$0xff] %v471_v14  ;;  %584 = vst [vmem:[#allocation2 + $0x30] sm:$0xff] %v544_v15  ;;  %v473_v26 = vadd.f32 %v472_v19, %v2943_v59  ;;  %v546_v30 = vadd.f32 %v545_v25, %v2945_v60 }
 0x11b   : > { %v476_v36 = vpop.f32.mrf.mxu0  ;;  %v549_v38 = vpop.f32.mrf.mxu1 }
 0x11c   : > { %583 = vst [vmem:[#allocation2 + $0x28] sm:$0xff] %v473_v26  ;;  %585 = vst [vmem:[#allocation2 + $0x38] sm:$0xff] %v546_v30  ;;  %v477_v41 = vadd.f32 %v476_v36, %v2939_v57  ;;  %v550_v49 = vadd.f32 %v549_v38, %v2941_v58 }
 0x11d   : > { %v478_v50 = vpop.f32.mrf.mxu0  ;;  %v551_v51 = vpop.f32.mrf.mxu1 }
 0x11e   : > { %586 = vst [vmem:[#allocation2 + $0x40] sm:$0xff] %v477_v41  ;;  %588 = vst [vmem:[#allocation2 + $0x50] sm:$0xff] %v550_v49  ;;  %v479_v52 = vadd.f32 %v478_v50, %v2943_v59  ;;  %v552_v53 = vadd.f32 %v551_v51, %v2945_v60 }
 0x11f   : > { %v480_v54 = vpop.f32.mrf.mxu0  ;;  %v553_v55 = vpop.f32.mrf.mxu1 }
 0x120   : > { %587 = vst [vmem:[#allocation2 + $0x48] sm:$0xff] %v479_v52  ;;  %589 = vst [vmem:[#allocation2 + $0x58] sm:$0xff] %v552_v53  ;;  %v481_v56 = vadd.f32 %v480_v54, %v2939_v57  ;;  %v554_v61 = vadd.f32 %v553_v55, %v2941_v58 }
 0x121   : > { %v482_v62 = vpop.f32.mrf.mxu0  ;;  %v555_v63 = vpop.f32.mrf.mxu1 }
 0x122   : > { %590 = vst [vmem:[#allocation2 + $0x60] sm:$0xff] %v481_v56  ;;  %592 = vst [vmem:[#allocation2 + $0x70] sm:$0xff] %v554_v61  ;;  %v483_v1 = vadd.f32 %v482_v62, %v2943_v59  ;;  %v556_v2 = vadd.f32 %v555_v63, %v2945_v60 }
 0x123   : > { %v486_v3 = vpop.f32.mrf.mxu0  ;;  %v559_v4 = vpop.f32.mrf.mxu1 }
 0x124   : > { %591 = vst [vmem:[#allocation2 + $0x68] sm:$0xff] %v483_v1  ;;  %593 = vst [vmem:[#allocation2 + $0x78] sm:$0xff] %v556_v2  ;;  %v487_v5 = vadd.f32 %v486_v3, %v2939_v57  ;;  %v560_v6 = vadd.f32 %v559_v4, %v2941_v58 }
 0x125   : > { %v488_v7 = vpop.f32.mrf.mxu0  ;;  %v561_v14 = vpop.f32.mrf.mxu1 }
 0x126   : > { %594 = vst [vmem:[#allocation2 + $0x80] sm:$0xff] %v487_v5  ;;  %596 = vst [vmem:[#allocation2 + $0x90] sm:$0xff] %v560_v6  ;;  %v489_v15 = vadd.f32 %v488_v7, %v2943_v59  ;;  %v562_v19 = vadd.f32 %v561_v14, %v2945_v60 }
 0x127   : > { %v490_v25 = vpop.f32.mrf.mxu0  ;;  %v563_v26 = vpop.f32.mrf.mxu1 }
 0x128   : > { %595 = vst [vmem:[#allocation2 + $0x88] sm:$0xff] %v489_v15  ;;  %597 = vst [vmem:[#allocation2 + $0x98] sm:$0xff] %v562_v19  ;;  %v491_v30 = vadd.f32 %v490_v25, %v2939_v57  ;;  %v564_v36 = vadd.f32 %v563_v26, %v2941_v58 }
 0x129   : > { %v492_v38 = vpop.f32.mrf.mxu0  ;;  %v565_v41 = vpop.f32.mrf.mxu1 }
 0x12a   : > { %598 = vst [vmem:[#allocation2 + $0xa0] sm:$0xff] %v491_v30  ;;  %600 = vst [vmem:[#allocation2 + $0xb0] sm:$0xff] %v564_v36  ;;  %v493_v49 = vadd.f32 %v492_v38, %v2943_v59  ;;  %v566_v50 = vadd.f32 %v565_v41, %v2945_v60 }
 0x12b   : > { %v496_v51 = vpop.f32.mrf.mxu0  ;;  %v569_v52 = vpop.f32.mrf.mxu1 }
 0x12c   : > { %599 = vst [vmem:[#allocation2 + $0xa8] sm:$0xff] %v493_v49  ;;  %601 = vst [vmem:[#allocation2 + $0xb8] sm:$0xff] %v566_v50  ;;  %v497_v53 = vadd.f32 %v496_v51, %v2939_v57  ;;  %v570_v54 = vadd.f32 %v569_v52, %v2941_v58 }
 0x12d   : > { %v498_v55 = vpop.f32.mrf.mxu0  ;;  %v571_v56 = vpop.f32.mrf.mxu1 }
 0x12e   : > { %602 = vst [vmem:[#allocation2 + $0xc0] sm:$0xff] %v497_v53  ;;  %604 = vst [vmem:[#allocation2 + $0xd0] sm:$0xff] %v570_v54  ;;  %v499_v61 = vadd.f32 %v498_v55, %v2943_v59  ;;  %v572_v62 = vadd.f32 %v571_v56, %v2945_v60 }
 0x12f   : > { %v500_v63 = vpop.f32.mrf.mxu0  ;;  %v573_v1 = vpop.f32.mrf.mxu1 }
 0x130   : > { %603 = vst [vmem:[#allocation2 + $0xc8] sm:$0xff] %v499_v61  ;;  %605 = vst [vmem:[#allocation2 + $0xd8] sm:$0xff] %v572_v62  ;;  %v501_v2 = vadd.f32 %v500_v63, %v2939_v57  ;;  %v574_v3 = vadd.f32 %v573_v1, %v2941_v58 }
 0x131   : > { %v502_v4 = vpop.f32.mrf.mxu0  ;;  %v575_v5 = vpop.f32.mrf.mxu1 }
 0x132   : > { %606 = vst [vmem:[#allocation2 + $0xe0] sm:$0xff] %v501_v2  ;;  %608 = vst [vmem:[#allocation2 + $0xf0] sm:$0xff] %v574_v3  ;;  %v503_v6 = vadd.f32 %v502_v4, %v2943_v59  ;;  %v576_v7 = vadd.f32 %v575_v5, %v2945_v60 }
 0x133   : > { %v848_v14 = vpop.f32.mrf.mxu0 }
 0x134   : > { %607 = vst [vmem:[#allocation2 + $0xe8] sm:$0xff] %v503_v6  ;;  %609 = vst [vmem:[#allocation2 + $0xf8] sm:$0xff] %v576_v7 }
 0x135   : > { %v850_v15 = vpop.f32.mrf.mxu0  ;;  %v889_v19 = vpop.f32.mrf.mxu1 }
 0x137   : > { %v852_v25 = vpop.f32.mrf.mxu0  ;;  %v891_v26 = vpop.f32.mrf.mxu1 }
 0x139   : > { %v853_v30 = vpop.f32.mrf.mxu0  ;;  %v893_v58 = vpop.f32.mrf.mxu1 }
 0x13b   : > { %v649_v57 = vld [vmem:[%s648_s23] sm:$0xff]  ;;  %v650_v38 = vld [vmem:[%s648_s23 + $0x8] sm:$0xff]  ;;  %v894_v41 = vpop.f32.mrf.mxu1  ;;  %v652_v60 = vld [vmem:[%s648_s23 + $0x18] sm:$0xff] }
 0x13c   : > { %v896_v36 = vadd.f32 %v848_v14, %v649_v57  ;;  %v897_v50 = vadd.f32 %v850_v15, %v650_v38  ;;  %v899_v51 = vadd.f32 %v891_v26, %v652_v60  ;;  %v651_v52 = vld [vmem:[%s648_s23 + $0x10] sm:$0xff]  ;;  %v931_v26 = vld [vmem:[%s930_s10] sm:$0xff]  ;;  %s3233_s23 = scalar_select %p644_p8, 4, 3 }
 0x13d   : > { %v898_v55 = vadd.f32 %v889_v19, %v651_v52 }
 0x13e   : > { %v2083_v49 = vmul.f32 -1.442695, %v896_v36  ;;  %v2084_v59 = vmul.f32 -1.442695, %v897_v50  ;;  %v2085_v53 = vmul.f32 -1.442695, %v899_v51 }
 0x13f   : > { %v932_v36 = vld [vmem:[%s930_s10 + $0x8] sm:$0xff]  ;;  %s2140_s25 = sshll.u32 %s3233_s23, 5 }
 0x140   : > { %2267 = vpow2.f32 %v2083_v49  ;;  %s1296_s6 = scalar_lea.vmem [#allocation2], %s2140_s25 }
 0x141   : > { %2269 = vpow2.f32 %v2084_v59 }
 0x142   : > { %2271 = vpow2.f32 %v2085_v53 }
 0x14d   : > { %v2268_v54 = vpop.eup %2267 }
 0x14e   : > { %v903_v56 = vadd.f32 1.0, %v2268_v54  ;;  %v2270_v61 = vpop.eup %2269  ;;  %v934_v54 = vld [vmem:[%s930_s10 + $0x18] sm:$0xff] }
 0x14f   : > { %v909_v62 = vadd.f32 1.0, %v2270_v61  ;;  %v2272_v63 = vpop.eup %2271  ;;  %v933_v61 = vld [vmem:[%s930_s10 + $0x10] sm:$0xff]  ;;  %s2141_s10 = sshll.u32 %s3305_s8, 5 }
 0x150   : > { %2273 = vrcp.f32 %v903_v56  ;;  %v916_v4 = vadd.f32 1.0, %v2272_v63  ;;  %s1418_s14 = scalar_lea.vmem [#allocation2], %s2141_s10 }
 0x151   : > { %2275 = vtanh.f32 %v898_v55 }
 0x152   : > { %2277 = vrcp.f32 %v909_v62 }
 0x153   : > { %2279 = vrcp.f32 %v916_v4 }
 0x15d   : > { %v2274_v1 = vpop.eup %2273 }
 0x15e   : > { %v2276_v2 = vpop.eup %2275 }
 0x15f   : > { %v2278_v3 = vpop.eup %2277  ;;  %v920_v6 = vmul.f32 %v2276_v2, %v2274_v1 }
 0x160   : > { %v919_v5 = vmul.f32 0.0, %v2278_v3  ;;  %v2280_v14 = vpop.eup %2279 }
 0x162   : > { %v2985_v7 = vadd.f32 %v920_v6, %v919_v5 }
 0x164   : > { %2281 = vtanh.f32 %v2985_v7 }
 0x171   : > { %v2282_v15 = vpop.eup %2281 }
 0x172   : > { %v923_v19 = vmul.f32 %v2282_v15, %v2280_v14 }
 0x174   : > { %926 = vst [vmem:[%s925_s7] sm:$0xff] %v923_v19  ;;  %v935_v25 = vpack.c.bf16 %v923_v19, %v923_v19  ;;  %s2110_s7 = sshll.u32 %s3233_s23, 3  ;;  %s2130_s23 = sshll.u32 (%p2649_p9), %s2557_s18, 3 }
 0x175   : > { %s1413_s2 = scalar_lea.vmem %s2990_s28, %s2110_s7 [#allocation10]  ;;  %s1797_s7 = scalar_lea.vmem (%p2649_p9), %s3397_s4, %s2130_s23 }
 0x176   : > { %969 = vmatmul.mubr.bf16.vlgmr.msra.gmra.mxu0 %v935_v25  ;;  %1010 = vmatmul.mubr.bf16.vlgmr.msra.gmra.mxu1 %v935_v25 }
 0x177   : > { %1059 = vmatpush1.bf16.msra.mxu0 %v2744_v9  ;;  %1100 = vmatpush1.bf16.msra.mxu1 %v2759_v13 }
 0x178   : > { %1060 = vmatprep.subr.bf16.mxu0 %v2747_v10  ;;  %1101 = vmatprep.subr.bf16.mxu1 %v2777_v17 }
 0x179   : > { %1090 = vmatprep.mubr.bf16.mxu0 %v2572_v0  ;;  %1131 = vmatprep.mubr.bf16.mxu1 %v2572_v0 }
 0x17b   : > { %1061 = vmatpush1.bf16.msra.mxu0 %v2756_v12  ;;  %1102 = vmatpush1.bf16.msra.mxu1 %v2780_v18 }
 0x17c   : > { %1062 = vmatprep.subr.bf16.mxu0 %v2772_v16  ;;  %1103 = vmatprep.subr.bf16.mxu1 %v2788_v21 }
 0x17f   : > { %1063 = vmatpush1.bf16.msra.mxu0 %v2783_v20  ;;  %1104 = vmatpush1.bf16.msra.mxu1 %v2799_v24 }
 0x180   : > { %1064 = vmatprep.subr.bf16.mxu0 %v2792_v22  ;;  %1105 = vmatprep.subr.bf16.mxu1 %v2812_v27 }
 0x183   : > { %1065 = vmatpush1.bf16.msra.mxu0 %v2796_v23  ;;  %1106 = vmatpush1.bf16.msra.mxu1 %v2822_v29 }
 0x184   : > { %1066 = vmatprep.subr.bf16.mxu0 %v2817_v28  ;;  %1107 = vmatprep.subr.bf16.mxu1 %v2830_v32 }
 0x187   : > { %1067 = vmatpush1.bf16.msra.mxu0 %v2825_v31  ;;  %1108 = vmatpush1.bf16.msra.mxu1 %v2841_v35 }
 0x188   : > { %1068 = vmatprep.subr.bf16.mxu0 %v2834_v33  ;;  %1109 = vmatprep.subr.bf16.mxu1 %v2849_v37 }
 0x18b   : > { %1069 = vmatpush1.bf16.msra.mxu0 %v2838_v34  ;;  %1110 = vmatpush1.bf16.msra.mxu1 %v2864_v40 }
 0x18c   : > { %1070 = vmatprep.subr.bf16.mxu0 %v2859_v39  ;;  %1111 = vmatprep.subr.bf16.mxu1 %v2872_v43 }
 0x18f   : > { %1071 = vmatpush1.bf16.msra.mxu0 %v2869_v42  ;;  %1112 = vmatpush1.bf16.msra.mxu1 %v2880_v45 }
 0x190   : > { %1072 = vmatprep.subr.bf16.mxu0 %v2876_v44  ;;  %1113 = vmatprep.subr.bf16.mxu1 %v2885_v46 }
 0x193   : > { %1073 = vmatpush1.bf16.msra.mxu0 %v2889_v47  ;;  %1114 = vmatpush1.bf16.msra.mxu1 %v2896_v48 }
 0x194   : > { %1180 = vmatprep.subr.bf16.mxu0 %v2741_v8  ;;  %1221 = vmatprep.subr.bf16.mxu1 %v2751_v11 }
 0x236   : > { %v970_v57 = vpop.f32.mrf.mxu0  ;;  %v1011_v30 = vpop.f32.mrf.mxu1 }
 0x237   : > { %v1018_v58 = vadd.f32 %v970_v57, %v931_v26  ;;  %v1020_v63 = vadd.f32 %v1011_v30, %v933_v61 }
 0x238   : > { %v972_v38 = vpop.f32.mrf.mxu0  ;;  %v1013_v41 = vpop.f32.mrf.mxu1 }
 0x239   : > { %v2089_v49 = vmul.f32 -1.442695, %v1018_v58  ;;  %v1019_v50 = vadd.f32 %v972_v38, %v932_v36  ;;  %v1021_v55 = vadd.f32 %v1013_v41, %v934_v54 }
 0x23a   : > { %v974_v59 = vpop.f32.mrf.mxu0  ;;  %v1015_v60 = vpop.f32.mrf.mxu1 }
 0x23b   : > { %2283 = vpow2.f32 %v2089_v49  ;;  %v2090_v51 = vmul.f32 -1.442695, %v1019_v50  ;;  %v2091_v56 = vmul.f32 -1.442695, %v1021_v55  ;;  %v1054_v50 = vld [vmem:[%s1052_s11 + $0x8] sm:$0xff] }
 0x23c   : > { %v975_v52 = vpop.f32.mrf.mxu0  ;;  %v1016_v53 = vpop.f32.mrf.mxu1 }
 0x23d   : > { %2285 = vpow2.f32 %v2090_v51 }
 0x23e   : > { %2287 = vpow2.f32 %v2091_v56  ;;  %v1056_v56 = vld [vmem:[%s1052_s11 + $0x18] sm:$0xff] }
 0x248   : > { %v2284_v62 = vpop.eup %2283 }
 0x249   : > { %v1025_v1 = vadd.f32 1.0, %v2284_v62 }
 0x24a   : > { %v2286_v2 = vpop.eup %2285 }
 0x24b   : > { %2289 = vrcp.f32 %v1025_v1  ;;  %v1031_v3 = vadd.f32 1.0, %v2286_v2  ;;  %v2288_v4 = vpop.eup %2287 }
 0x24c   : > { %2291 = vtanh.f32 %v1020_v63  ;;  %v1038_v15 = vadd.f32 1.0, %v2288_v4  ;;  %v1055_v63 = vld [vmem:[%s1052_s11 + $0x10] sm:$0xff] }
 0x24d   : > { %2293 = vrcp.f32 %v1031_v3 }
 0x24e   : > { %2295 = vrcp.f32 %v1038_v15 }
 0x258   : > { %v2290_v5 = vpop.eup %2289 }
 0x259   : > { %v2292_v6 = vpop.eup %2291 }
 0x25a   : > { %v2294_v14 = vpop.eup %2293  ;;  %v1042_v19 = vmul.f32 %v2292_v6, %v2290_v5 }
 0x25b   : > { %v1041_v25 = vmul.f32 %v2294_v14, %v2985_v7  ;;  %v2296_v57 = vpop.eup %2295  ;;  %v1053_v7 = vld [vmem:[%s1052_s11] sm:$0xff]  ;;  %s1540_s11 = scalar_lea.vmem [#allocation2], %s2142_s24 }
 0x25d   : > { %v3033_v26 = vadd.f32 %v1042_v19, %v1041_v25 }
 0x25f   : > { %2297 = vtanh.f32 %v3033_v26 }
 0x26c   : > { %v2298_v30 = vpop.eup %2297 }
 0x26d   : > { %v1045_v58 = vmul.f32 %v2298_v30, %v2296_v57 }
 0x26f   : > { %1048 = vst [vmem:[%s1047_s9] sm:$0xff] %v1045_v58  ;;  %v1057_v36 = vpack.c.bf16 %v1045_v58, %v1045_v58 }
 0x271   : > { %1091 = vmatmul.mubr.bf16.vlgmr.msra.gmra.mxu0 %v1057_v36  ;;  %1132 = vmatmul.mubr.bf16.vlgmr.msra.gmra.mxu1 %v1057_v36 }
 0x272   : > { %1181 = vmatpush1.bf16.msra.mxu0 %v2744_v9  ;;  %1222 = vmatpush1.bf16.msra.mxu1 %v2759_v13 }
 0x273   : > { %1182 = vmatprep.subr.bf16.mxu0 %v2747_v10  ;;  %1223 = vmatprep.subr.bf16.mxu1 %v2777_v17 }
 0x274   : > { %1212 = vmatprep.mubr.bf16.mxu0 %v2572_v0  ;;  %1253 = vmatprep.mubr.bf16.mxu1 %v2572_v0 }
 0x276   : > { %1183 = vmatpush1.bf16.msra.mxu0 %v2756_v12  ;;  %1224 = vmatpush1.bf16.msra.mxu1 %v2780_v18 }
 0x277   : > { %1184 = vmatprep.subr.bf16.mxu0 %v2772_v16  ;;  %1225 = vmatprep.subr.bf16.mxu1 %v2788_v21 }
 0x27a   : > { %1185 = vmatpush1.bf16.msra.mxu0 %v2783_v20  ;;  %1226 = vmatpush1.bf16.msra.mxu1 %v2799_v24 }
 0x27b   : > { %1186 = vmatprep.subr.bf16.mxu0 %v2792_v22  ;;  %1227 = vmatprep.subr.bf16.mxu1 %v2812_v27 }
 0x27e   : > { %1187 = vmatpush1.bf16.msra.mxu0 %v2796_v23  ;;  %1228 = vmatpush1.bf16.msra.mxu1 %v2822_v29 }
 0x27f   : > { %1188 = vmatprep.subr.bf16.mxu0 %v2817_v28  ;;  %1229 = vmatprep.subr.bf16.mxu1 %v2830_v32 }
 0x282   : > { %1189 = vmatpush1.bf16.msra.mxu0 %v2825_v31  ;;  %1230 = vmatpush1.bf16.msra.mxu1 %v2841_v35 }
 0x283   : > { %1190 = vmatprep.subr.bf16.mxu0 %v2834_v33  ;;  %1231 = vmatprep.subr.bf16.mxu1 %v2849_v37 }
 0x286   : > { %1191 = vmatpush1.bf16.msra.mxu0 %v2838_v34  ;;  %1232 = vmatpush1.bf16.msra.mxu1 %v2864_v40 }
 0x287   : > { %1192 = vmatprep.subr.bf16.mxu0 %v2859_v39  ;;  %1233 = vmatprep.subr.bf16.mxu1 %v2872_v43 }
 0x28a   : > { %1193 = vmatpush1.bf16.msra.mxu0 %v2869_v42  ;;  %1234 = vmatpush1.bf16.msra.mxu1 %v2880_v45 }
 0x28b   : > { %1194 = vmatprep.subr.bf16.mxu0 %v2876_v44  ;;  %1235 = vmatprep.subr.bf16.mxu1 %v2885_v46 }
 0x28e   : > { %1195 = vmatpush1.bf16.msra.mxu0 %v2889_v47  ;;  %1236 = vmatpush1.bf16.msra.mxu1 %v2896_v48 }
 0x28f   : > { %1302 = vmatprep.subr.bf16.mxu0 %v2741_v8  ;;  %1343 = vmatprep.subr.bf16.mxu1 %v2751_v11 }
 0x331   : > { %v1092_v38 = vpop.f32.mrf.mxu0  ;;  %v1133_v41 = vpop.f32.mrf.mxu1 }
 0x332   : > { %v1140_v49 = vadd.f32 %v1092_v38, %v1053_v7  ;;  %v1142_v2 = vadd.f32 %v1133_v41, %v1055_v63 }
 0x333   : > { %v1094_v59 = vpop.f32.mrf.mxu0  ;;  %v1135_v60 = vpop.f32.mrf.mxu1 }
 0x334   : > { %v2095_v51 = vmul.f32 -1.442695, %v1140_v49  ;;  %v1141_v52 = vadd.f32 %v1094_v59, %v1054_v50  ;;  %v1143_v61 = vadd.f32 %v1135_v60, %v1056_v56 }
 0x335   : > { %v1096_v53 = vpop.f32.mrf.mxu0  ;;  %v1137_v54 = vpop.f32.mrf.mxu1 }
 0x336   : > { %2299 = vpow2.f32 %v2095_v51  ;;  %v2096_v8 = vmul.f32 -1.442695, %v1141_v52  ;;  %v2097_v62 = vmul.f32 -1.442695, %v1143_v61 }
 0x337   : > { %v1097_v11 = vpop.f32.mrf.mxu0  ;;  %v1138_v55 = vpop.f32.mrf.mxu1 }
 0x338   : > { %2301 = vpow2.f32 %v2096_v8 }
 0x339   : > { %2303 = vpow2.f32 %v2097_v62 }
 0x343   : > { %v2300_v1 = vpop.eup %2299 }
 0x344   : > { %v1147_v3 = vadd.f32 1.0, %v2300_v1  ;;  %v3135_v1 = vld [vmem:[%s2726_s5 + $0xe0] ss:$16 sps:$4 sm:$0xff]  }
 0x345   : > { %v2302_v4 = vpop.eup %2301 }
 0x346   : > { %2305 = vrcp.f32 %v1147_v3  ;;  %v1153_v5 = vadd.f32 1.0, %v2302_v4  ;;  %v2304_v6 = vpop.eup %2303  ;;  %v3143_v3 = vld [vmem:[%s2726_s5 + $0xc4] ss:$16 sps:$4 sm:$0xff]   ;;  %v3147_v4 = vld [vmem:[%s2726_s5 + $0xcc] ss:$16 sps:$4 sm:$0xff]  }
 0x347   : > { %2307 = vtanh.f32 %v1142_v2  ;;  %v1160_v25 = vadd.f32 1.0, %v2304_v6  ;;  %v3139_v2 = vld [vmem:[%s2726_s5 + $0xe8] ss:$16 sps:$4 sm:$0xff]  }
 0x348   : > { %2309 = vrcp.f32 %v1153_v5  ;;  %v3153_v5 = vld [vmem:[%s2726_s5 + $0xc0] ss:$16 sps:$4 sm:$0xff]   ;;  %v3157_v6 = vld [vmem:[%s2726_s5 + $0xc8] ss:$16 sps:$4 sm:$0xff]  }
 0x349   : > { %2311 = vrcp.f32 %v1160_v25  ;;  %v3173_v25 = vld [vmem:[%s2726_s5 + $0xa8] ss:$16 sps:$4 sm:$0xff]  }
 0x353   : > { %v2306_v14 = vpop.eup %2305 }
 0x354   : > { %v2308_v15 = vpop.eup %2307 }
 0x355   : > { %v2310_v19 = vpop.eup %2309  ;;  %v1164_v57 = vmul.f32 %v2308_v15, %v2306_v14  ;;  %v3161_v14 = vld [vmem:[%s2726_s5 + $0xa4] ss:$16 sps:$4 sm:$0xff]   ;;  %v3165_v15 = vld [vmem:[%s2726_s5 + $0xac] ss:$16 sps:$4 sm:$0xff]  }
 0x356   : > { %v1163_v30 = vmul.f32 %v2310_v19, %v3033_v26  ;;  %v2312_v36 = vpop.eup %2311  ;;  %v3169_v19 = vld [vmem:[%s2726_s5 + $0xa0] ss:$16 sps:$4 sm:$0xff]  }
 0x358   : > { %v3078_v58 = vadd.f32 %v1164_v57, %v1163_v30  ;;  %v3177_v57 = vld [vmem:[%s2726_s5 + $0x84] ss:$16 sps:$4 sm:$0xff]   ;;  %v3181_v30 = vld [vmem:[%s2726_s5 + $0x8c] ss:$16 sps:$4 sm:$0xff]  }
 0x35a   : > { %2313 = vtanh.f32 %v3078_v58 }
 0x367   : > { %v2314_v7 = vpop.eup %2313 }
 0x368   : > { %v1167_v38 = vmul.f32 %v2314_v7, %v2312_v36  ;;  %v3189_v36 = vld [vmem:[%s2726_s5 + $0x88] ss:$16 sps:$4 sm:$0xff]   ;;  %v3193_v7 = vld [vmem:[%s2726_s5 + $0x64] ss:$16 sps:$4 sm:$0xff]  }
 0x36a   : > { %1170 = vst [vmem:[%s1169_s13] sm:$0xff] %v1167_v38  ;;  %v1179_v41 = vpack.c.bf16 %v1167_v38, %v1167_v38  ;;  %v3197_v38 = vld [vmem:[%s2726_s5 + $0x6c] ss:$16 sps:$4 sm:$0xff]   ;;  %s1657_s13 = scalar_lea.vmem %s2990_s28, %s2122_s30 [#allocation10] }
 0x36c   : > { %1213 = vmatmul.mubr.bf16.vlgmr.msra.gmra.mxu0 %v1179_v41  ;;  %1254 = vmatmul.mubr.bf16.vlgmr.msra.gmra.mxu1 %v1179_v41  ;;  %v3201_v41 = vld [vmem:[%s2726_s5 + $0x60] ss:$16 sps:$4 sm:$0xff]  }
 0x36d   : > { %1303 = vmatpush1.bf16.msra.mxu0 %v2744_v9  ;;  %1344 = vmatpush1.bf16.msra.mxu1 %v2759_v13  ;;  %v3116_v9 = vld [vmem:[%s2726_s5 + $0xe4] ss:$16 sps:$4 sm:$0xff]  }
 0x36e   : > { %1304 = vmatprep.subr.bf16.mxu0 %v2747_v10  ;;  %1345 = vmatprep.subr.bf16.mxu1 %v2777_v17  ;;  %v3120_v10 = vld [vmem:[%s2726_s5 + $0xec] ss:$16 sps:$4 sm:$0xff]  }
 0x36f   : > { %1334 = vmatprep.mubr.bf16.mxu0 %v2572_v0  ;;  %1375 = vmatprep.mubr.bf16.mxu1 %v2572_v0 }
 0x371   : > { %1305 = vmatpush1.bf16.msra.mxu0 %v2756_v12  ;;  %1346 = vmatpush1.bf16.msra.mxu1 %v2780_v18  ;;  %v1175_v12 = vld [vmem:[%s1174_s29] sm:$0xff]  ;;  %v1176_v18 = vld [vmem:[%s1174_s29 + $0x8] sm:$0xff] }
 0x372   : > { %1306 = vmatprep.subr.bf16.mxu0 %v2772_v16  ;;  %1347 = vmatprep.subr.bf16.mxu1 %v2788_v21 }
 0x375   : > { %1307 = vmatpush1.bf16.msra.mxu0 %v2783_v20  ;;  %1348 = vmatpush1.bf16.msra.mxu1 %v2799_v24 }
 0x376   : > { %1308 = vmatprep.subr.bf16.mxu0 %v2792_v22  ;;  %1349 = vmatprep.subr.bf16.mxu1 %v2812_v27 }
 0x379   : > { %1309 = vmatpush1.bf16.msra.mxu0 %v2796_v23  ;;  %1350 = vmatpush1.bf16.msra.mxu1 %v2822_v29 }
 0x37a   : > { %1310 = vmatprep.subr.bf16.mxu0 %v2817_v28  ;;  %1351 = vmatprep.subr.bf16.mxu1 %v2830_v32  ;;  %v1178_v32 = vld [vmem:[%s1174_s29 + $0x18] sm:$0xff] }
 0x37d   : > { %1311 = vmatpush1.bf16.msra.mxu0 %v2825_v31  ;;  %1352 = vmatpush1.bf16.msra.mxu1 %v2841_v35  ;;  %v1177_v35 = vld [vmem:[%s1174_s29 + $0x10] sm:$0xff]  ;;  %s1662_s29 = scalar_lea.vmem [#allocation2], %s2143_s1 }
 0x37e   : > { %1312 = vmatprep.subr.bf16.mxu0 %v2834_v33  ;;  %1353 = vmatprep.subr.bf16.mxu1 %v2849_v37 }
 0x381   : > { %1313 = vmatpush1.bf16.msra.mxu0 %v2838_v34  ;;  %1354 = vmatpush1.bf16.msra.mxu1 %v2864_v40 }
 0x382   : > { %1314 = vmatprep.subr.bf16.mxu0 %v2859_v39  ;;  %1355 = vmatprep.subr.bf16.mxu1 %v2872_v43 }
 0x385   : > { %1315 = vmatpush1.bf16.msra.mxu0 %v2869_v42  ;;  %1356 = vmatpush1.bf16.msra.mxu1 %v2880_v45 }
 0x386   : > { %1316 = vmatprep.subr.bf16.mxu0 %v2876_v44  ;;  %1357 = vmatprep.subr.bf16.mxu1 %v2885_v46 }
 0x389   : > { %1317 = vmatpush1.bf16.msra.mxu0 %v2889_v47  ;;  %1358 = vmatpush1.bf16.msra.mxu1 %v2896_v48 }
 0x38a   : > { %1424 = vmatprep.subr.bf16.mxu0 %v3116_v9  ;;  %1465 = vmatprep.subr.bf16.mxu1 %v3120_v10 }
 0x42c   : > { %v1214_v13 = vpop.f32.mrf.mxu0  ;;  %v1255_v16 = vpop.f32.mrf.mxu1 }
 0x42d   : > { %v1262_v17 = vadd.f32 %v1214_v13, %v1175_v12  ;;  %v1264_v26 = vadd.f32 %v1255_v16, %v1177_v35  ;;  %v3205_v12 = vld [vmem:[%s2726_s5 + $0x68] ss:$16 sps:$4 sm:$0xff]   ;;  %v3209_v13 = vld [vmem:[%s2726_s5 + $0x44] ss:$16 sps:$4 sm:$0xff]   ;;  %v3213_v16 = vld [vmem:[%s2726_s5 + $0x4c] ss:$16 sps:$4 sm:$0xff]  }
 0x42e   : > { %v1216_v20 = vpop.f32.mrf.mxu0  ;;  %v1257_v21 = vpop.f32.mrf.mxu1 }
 0x42f   : > { %v2101_v22 = vmul.f32 -1.442695, %v1262_v17  ;;  %v1263_v23 = vadd.f32 %v1216_v20, %v1176_v18  ;;  %v1265_v33 = vadd.f32 %v1257_v21, %v1178_v32  ;;  %v3217_v17 = vld [vmem:[%s2726_s5 + $0x40] ss:$16 sps:$4 sm:$0xff]  }
 0x430   : > { %v1218_v24 = vpop.f32.mrf.mxu0  ;;  %v1259_v27 = vpop.f32.mrf.mxu1 }
 0x431   : > { %2315 = vpow2.f32 %v2101_v22  ;;  %v2102_v28 = vmul.f32 -1.442695, %v1263_v23  ;;  %v2103_v34 = vmul.f32 -1.442695, %v1265_v33  ;;  %v1300_v24 = vld [vmem:[%s1296_s6 + $0x18] sm:$0xff] }
 0x432   : > { %v1219_v29 = vpop.f32.mrf.mxu0  ;;  %v1260_v31 = vpop.f32.mrf.mxu1 }
 0x433   : > { %2317 = vpow2.f32 %v2102_v28  ;;  %v1299_v29 = vld [vmem:[%s1296_s6 + $0x10] sm:$0xff] }
 0x434   : > { %2319 = vpow2.f32 %v2103_v34 }
 0x43e   : > { %v2316_v37 = vpop.eup %2315 }
 0x43f   : > { %v1269_v49 = vadd.f32 1.0, %v2316_v37 }
 0x440   : > { %v2318_v50 = vpop.eup %2317 }
 0x441   : > { %2321 = vrcp.f32 %v1269_v49  ;;  %v1275_v59 = vadd.f32 1.0, %v2318_v50  ;;  %v2320_v60 = vpop.eup %2319 }
 0x442   : > { %2323 = vtanh.f32 %v1264_v26  ;;  %v1282_v54 = vadd.f32 1.0, %v2320_v60 }
 0x443   : > { %2325 = vrcp.f32 %v1275_v59 }
 0x444   : > { %2327 = vrcp.f32 %v1282_v54 }
 0x44e   : > { %v2322_v51 = vpop.eup %2321 }
 0x44f   : > { %v2324_v52 = vpop.eup %2323 }
 0x450   : > { %v2326_v53 = vpop.eup %2325  ;;  %v1286_v8 = vmul.f32 %v2324_v52, %v2322_v51 }
 0x451   : > { %v1285_v11 = vmul.f32 %v2326_v53, %v3078_v58  ;;  %v2328_v56 = vpop.eup %2327  ;;  %v3185_v58 = vld [vmem:[%s2726_s5 + $0x80] ss:$16 sps:$4 sm:$0xff]  }
 0x453   : > { %v3129_v55 = vadd.f32 %v1286_v8, %v1285_v11 }
 0x455   : > { %2329 = vtanh.f32 %v3129_v55 }
 0x462   : > { %v2330_v61 = vpop.eup %2329 }
 0x463   : > { %v1289_v62 = vmul.f32 %v2330_v61, %v2328_v56  ;;  %v3270_v56 = vld [vmem:[%s2726_s5 + $0x24] ss:$16 sps:$4 sm:$0xff]   ;;  %v3274_v61 = vld [vmem:[%s2726_s5 + $0x2c] ss:$16 sps:$4 sm:$0xff]  }
 0x465   : > { %1292 = vst [vmem:[%s1291_s21] sm:$0xff] %v1289_v62  ;;  %v1301_v63 = vpack.c.bf16 %v1289_v62, %v1289_v62  ;;  %v3278_v62 = vld [vmem:[%s2726_s5 + $0x20] ss:$16 sps:$4 sm:$0xff]   ;;  %s1779_s21 = scalar_lea.vmem %s2990_s28, %s2128_s12 [#allocation10] }
 0x467   : > { %1335 = vmatmul.mubr.bf16.vlgmr.msra.gmra.mxu0 %v1301_v63  ;;  %1376 = vmatmul.mubr.bf16.vlgmr.msra.gmra.mxu1 %v1301_v63  ;;  %v3282_v63 = vld [vmem:[%s2726_s5 + $0x28] ss:$16 sps:$4 sm:$0xff]  }
 0x468   : > { %1425 = vmatpush1.bf16.msra.mxu0 %v3135_v1  ;;  %1466 = vmatpush1.bf16.msra.mxu1 %v3139_v2 }
 0x469   : > { %1426 = vmatprep.subr.bf16.mxu0 %v3143_v3  ;;  %1467 = vmatprep.subr.bf16.mxu1 %v3147_v4 }
 0x46a   : > { %1456 = vmatprep.mubr.bf16.mxu0 %v2572_v0  ;;  %1497 = vmatprep.mubr.bf16.mxu1 %v2572_v0 }
 0x46c   : > { %1427 = vmatpush1.bf16.msra.mxu0 %v3153_v5  ;;  %1468 = vmatpush1.bf16.msra.mxu1 %v3157_v6 }
 0x46d   : > { %1428 = vmatprep.subr.bf16.mxu0 %v3161_v14  ;;  %1469 = vmatprep.subr.bf16.mxu1 %v3165_v15 }
 0x470   : > { %1429 = vmatpush1.bf16.msra.mxu0 %v3169_v19  ;;  %1470 = vmatpush1.bf16.msra.mxu1 %v3173_v25 }
 0x471   : > { %1430 = vmatprep.subr.bf16.mxu0 %v3177_v57  ;;  %1471 = vmatprep.subr.bf16.mxu1 %v3181_v30 }
 0x474   : > { %1431 = vmatpush1.bf16.msra.mxu0 %v3185_v58  ;;  %1472 = vmatpush1.bf16.msra.mxu1 %v3189_v36 }
 0x475   : > { %1432 = vmatprep.subr.bf16.mxu0 %v3193_v7  ;;  %1473 = vmatprep.subr.bf16.mxu1 %v3197_v38 }
 0x478   : > { %1433 = vmatpush1.bf16.msra.mxu0 %v3201_v41  ;;  %1474 = vmatpush1.bf16.msra.mxu1 %v3205_v12 }
 0x479   : > { %1434 = vmatprep.subr.bf16.mxu0 %v3209_v13  ;;  %1475 = vmatprep.subr.bf16.mxu1 %v3213_v16 }
 0x47c   : > { %1435 = vmatpush1.bf16.msra.mxu0 %v3217_v17  ;;  %1476 = vmatpush1.bf16.msra.mxu1 %v2864_v40 }
 0x47d   : > { %1436 = vmatprep.subr.bf16.mxu0 %v2859_v39  ;;  %1477 = vmatprep.subr.bf16.mxu1 %v2872_v43  ;;  %v1297_v39 = vld [vmem:[%s1296_s6] sm:$0xff] }
 0x480   : > { %1437 = vmatpush1.bf16.msra.mxu0 %v2869_v42  ;;  %1478 = vmatpush1.bf16.msra.mxu1 %v2880_v45 }
 0x481   : > { %1438 = vmatprep.subr.bf16.mxu0 %v2876_v44  ;;  %1479 = vmatprep.subr.bf16.mxu1 %v2885_v46  ;;  %v1298_v44 = vld [vmem:[%s1296_s6 + $0x8] sm:$0xff] }
 0x484   : > { %1439 = vmatpush1.bf16.msra.mxu0 %v2889_v47  ;;  %1480 = vmatpush1.bf16.msra.mxu1 %v2896_v48 }
 0x485   : > { %1546 = vmatprep.subr.bf16.mxu0 %v3116_v9  ;;  %1587 = vmatprep.subr.bf16.mxu1 %v3120_v10 }
 0x527   : > { %v1336_v40 = vpop.f32.mrf.mxu0  ;;  %v1377_v42 = vpop.f32.mrf.mxu1 }
 0x528   : > { %v1384_v43 = vadd.f32 %v1336_v40, %v1297_v39  ;;  %v1386_v32 = vadd.f32 %v1377_v42, %v1299_v29  ;;  %v3286_v39 = vld [vmem:[%s2726_s5 + $0x4] ss:$16 sps:$4 sm:$0xff]   ;;  %v3290_v40 = vld [vmem:[%s2726_s5 + $0xc] ss:$16 sps:$4 sm:$0xff]   ;;  %v3294_v42 = vld [vmem:[%s2726_s5] ss:$16 sps:$4 sm:$0xff]  }
 0x529   : > { %v1338_v45 = vpop.f32.mrf.mxu0  ;;  %v1379_v46 = vpop.f32.mrf.mxu1 }
 0x52a   : > { %v2107_v47 = vmul.f32 -1.442695, %v1384_v43  ;;  %v1385_v18 = vadd.f32 %v1338_v45, %v1298_v44  ;;  %v1387_v27 = vadd.f32 %v1379_v46, %v1300_v24  ;;  %v3298_v43 = vld [vmem:[%s2726_s5 + $0x8] ss:$16 sps:$4 sm:$0xff]   ;;  %v1419_v44 = vld [vmem:[%s1418_s14] sm:$0xff] }
 0x52b   : > { %v1340_v48 = vpop.f32.mrf.mxu0  ;;  %v1381_v20 = vpop.f32.mrf.mxu1 }
 0x52c   : > { %2331 = vpow2.f32 %v2107_v47  ;;  %v2108_v21 = vmul.f32 -1.442695, %v1385_v18  ;;  %v2109_v28 = vmul.f32 -1.442695, %v1387_v27  ;;  %v1420_v18 = vld [vmem:[%s1418_s14 + $0x8] sm:$0xff] }
 0x52d   : > { %v1341_v22 = vpop.f32.mrf.mxu0  ;;  %v1382_v23 = vpop.f32.mrf.mxu1 }
 0x52e   : > { %2333 = vpow2.f32 %v2108_v21 }
 0x52f   : > { %2335 = vpow2.f32 %v2109_v28  ;;  %v1422_v28 = vld [vmem:[%s1418_s14 + $0x18] sm:$0xff] }
 0x539   : > { %v2332_v31 = vpop.eup %2331 }
 0x53a   : > { %v1391_v33 = vadd.f32 1.0, %v2332_v31 }
 0x53b   : > { %v2334_v34 = vpop.eup %2333 }
 0x53c   : > { %2337 = vrcp.f32 %v1391_v33  ;;  %v1397_v35 = vadd.f32 1.0, %v2334_v34  ;;  %v2336_v37 = vpop.eup %2335 }
 0x53d   : > { %2339 = vtanh.f32 %v1386_v32  ;;  %v1404_v59 = vadd.f32 1.0, %v2336_v37  ;;  %v1421_v32 = vld [vmem:[%s1418_s14 + $0x10] sm:$0xff] }
 0x53e   : > { %2341 = vrcp.f32 %v1397_v35 }
 0x53f   : > { %2343 = vrcp.f32 %v1404_v59 }
 0x549   : > { %v2338_v26 = vpop.eup %2337 }
 0x54a   : > { %v2340_v49 = vpop.eup %2339 }
 0x54b   : > { %v2342_v50 = vpop.eup %2341  ;;  %v1408_v60 = vmul.f32 %v2340_v49, %v2338_v26 }
 0x54c   : > { %v1407_v51 = vmul.f32 %v2342_v50, %v3129_v55  ;;  %v2344_v53 = vpop.eup %2343  ;;  %v3266_v55 = vld [vmem:[%s2726_s5 + $0x48] ss:$16 sps:$4 sm:$0xff]   ;;  %s2116_s5 = sshll.u32 %s3305_s8, 3 }
 0x54d   : > { %s1535_s9 = scalar_lea.vmem %s2990_s28, %s2116_s5 [#allocation10] }
 0x54e   : > { %v3237_v52 = vadd.f32 %v1408_v60, %v1407_v51 }
 0x550   : > { %2345 = vtanh.f32 %v3237_v52 }
 0x55d   : > { %v2346_v54 = vpop.eup %2345 }
 0x55e   : > { %v1411_v8 = vmul.f32 %v2346_v54, %v2344_v53 }
 0x560   : > { %1414 = vst [vmem:[%s1413_s2] sm:$0xff] %v1411_v8  ;;  %v1423_v11 = vpack.c.bf16 %v1411_v8, %v1411_v8 }
 0x562   : > { %1457 = vmatmul.mubr.bf16.vlgmr.msra.gmra.mxu0 %v1423_v11  ;;  %1498 = vmatmul.mubr.bf16.vlgmr.msra.gmra.mxu1 %v1423_v11 }
 0x563   : > { %1547 = vmatpush1.bf16.msra.mxu0 %v3135_v1  ;;  %1588 = vmatpush1.bf16.msra.mxu1 %v3139_v2 }
 0x564   : > { %1548 = vmatprep.subr.bf16.mxu0 %v3143_v3  ;;  %1589 = vmatprep.subr.bf16.mxu1 %v3147_v4 }
 0x565   : > { %1578 = vmatprep.mubr.bf16.mxu0 %v2572_v0  ;;  %1619 = vmatprep.mubr.bf16.mxu1 %v2572_v0 }
 0x567   : > { %1549 = vmatpush1.bf16.msra.mxu0 %v3153_v5  ;;  %1590 = vmatpush1.bf16.msra.mxu1 %v3157_v6 }
 0x568   : > { %1550 = vmatprep.subr.bf16.mxu0 %v3161_v14  ;;  %1591 = vmatprep.subr.bf16.mxu1 %v3165_v15 }
 0x56b   : > { %1551 = vmatpush1.bf16.msra.mxu0 %v3169_v19  ;;  %1592 = vmatpush1.bf16.msra.mxu1 %v3173_v25 }
 0x56c   : > { %1552 = vmatprep.subr.bf16.mxu0 %v3177_v57  ;;  %1593 = vmatprep.subr.bf16.mxu1 %v3181_v30 }
 0x56f   : > { %1553 = vmatpush1.bf16.msra.mxu0 %v3185_v58  ;;  %1594 = vmatpush1.bf16.msra.mxu1 %v3189_v36 }
 0x570   : > { %1554 = vmatprep.subr.bf16.mxu0 %v3193_v7  ;;  %1595 = vmatprep.subr.bf16.mxu1 %v3197_v38 }
 0x573   : > { %1555 = vmatpush1.bf16.msra.mxu0 %v3201_v41  ;;  %1596 = vmatpush1.bf16.msra.mxu1 %v3205_v12 }
 0x574   : > { %1556 = vmatprep.subr.bf16.mxu0 %v3209_v13  ;;  %1597 = vmatprep.subr.bf16.mxu1 %v3213_v16 }
 0x577   : > { %1557 = vmatpush1.bf16.msra.mxu0 %v3217_v17  ;;  %1598 = vmatpush1.bf16.msra.mxu1 %v3266_v55 }
 0x578   : > { %1558 = vmatprep.subr.bf16.mxu0 %v3270_v56  ;;  %1599 = vmatprep.subr.bf16.mxu1 %v3274_v61 }
 0x57b   : > { %1559 = vmatpush1.bf16.msra.mxu0 %v3278_v62  ;;  %1600 = vmatpush1.bf16.msra.mxu1 %v3282_v63 }
 0x57c   : > { %1560 = vmatprep.subr.bf16.mxu0 %v3286_v39  ;;  %1601 = vmatprep.subr.bf16.mxu1 %v3290_v40 }
 0x57f   : > { %1561 = vmatpush1.bf16.msra.mxu0 %v3294_v42  ;;  %1602 = vmatpush1.bf16.msra.mxu1 %v3298_v43 }
 0x580   : > { %1668 = vmatprep.subr.bf16.mxu0 %v3116_v9  ;;  %1709 = vmatprep.subr.bf16.mxu1 %v3120_v10 }
 0x622   : > { %v1458_v45 = vpop.f32.mrf.mxu0  ;;  %v1499_v46 = vpop.f32.mrf.mxu1 }
 0x623   : > { %v1506_v47 = vadd.f32 %v1458_v45, %v1419_v44  ;;  %v1508_v34 = vadd.f32 %v1499_v46, %v1421_v32 }
 0x624   : > { %v1460_v48 = vpop.f32.mrf.mxu0  ;;  %v1501_v20 = vpop.f32.mrf.mxu1 }
 0x625   : > { %v2113_v21 = vmul.f32 -1.442695, %v1506_v47  ;;  %v1507_v22 = vadd.f32 %v1460_v48, %v1420_v18  ;;  %v1509_v29 = vadd.f32 %v1501_v20, %v1422_v28  ;;  %v1663_v20 = vld [vmem:[%s1662_s29] sm:$0xff] }
 0x626   : > { %v1462_v23 = vpop.f32.mrf.mxu0  ;;  %v1503_v24 = vpop.f32.mrf.mxu1 }
 0x627   : > { %2347 = vpow2.f32 %v2113_v21  ;;  %v2114_v9 = vmul.f32 -1.442695, %v1507_v22  ;;  %v2115_v31 = vmul.f32 -1.442695, %v1509_v29  ;;  %v1664_v24 = vld [vmem:[%s1662_s29 + $0x8] sm:$0xff] }
 0x628   : > { %v1463_v10 = vpop.f32.mrf.mxu0  ;;  %v1504_v27 = vpop.f32.mrf.mxu1 }
 0x629   : > { %2349 = vpow2.f32 %v2114_v9 }
 0x62a   : > { %2351 = vpow2.f32 %v2115_v31 }
 0x634   : > { %v2348_v33 = vpop.eup %2347 }
 0x635   : > { %v1513_v35 = vadd.f32 1.0, %v2348_v33 }
 0x636   : > { %v2350_v37 = vpop.eup %2349 }
 0x637   : > { %2353 = vrcp.f32 %v1513_v35  ;;  %v1519_v26 = vadd.f32 1.0, %v2350_v37  ;;  %v2352_v49 = vpop.eup %2351  ;;  %v1666_v35 = vld [vmem:[%s1662_s29 + $0x18] sm:$0xff] }
 0x638   : > { %2355 = vtanh.f32 %v1508_v34  ;;  %v1526_v51 = vadd.f32 1.0, %v2352_v49  ;;  %v1665_v49 = vld [vmem:[%s1662_s29 + $0x10] sm:$0xff] }
 0x639   : > { %2357 = vrcp.f32 %v1519_v26 }
 0x63a   : > { %2359 = vrcp.f32 %v1526_v51 }
 0x644   : > { %v2354_v50 = vpop.eup %2353 }
 0x645   : > { %v2356_v59 = vpop.eup %2355 }
 0x646   : > { %v2358_v60 = vpop.eup %2357  ;;  %v1530_v53 = vmul.f32 %v2356_v59, %v2354_v50 }
 0x647   : > { %v1529_v54 = vmul.f32 %v2358_v60, %v3237_v52  ;;  %v2360_v11 = vpop.eup %2359 }
 0x649   : > { %v3309_v8 = vadd.f32 %v1530_v53, %v1529_v54 }
 0x64b   : > { %2361 = vtanh.f32 %v3309_v8 }
 0x658   : > { %v2362_v44 = vpop.eup %2361 }
 0x659   : > { %v1533_v45 = vmul.f32 %v2362_v44, %v2360_v11 }
 0x65b   : > { %1536 = vst [vmem:[%s1535_s9] sm:$0xff] %v1533_v45  ;;  %v1545_v46 = vpack.c.bf16 %v1533_v45, %v1533_v45 }
 0x65d   : > { %1579 = vmatmul.mubr.bf16.vlgmr.msra.gmra.mxu0 %v1545_v46  ;;  %1620 = vmatmul.mubr.bf16.vlgmr.msra.gmra.mxu1 %v1545_v46 }
 0x65e   : > { %1669 = vmatpush1.bf16.msra.mxu0 %v3135_v1  ;;  %1710 = vmatpush1.bf16.msra.mxu1 %v3139_v2 }
 0x65f   : > { %1670 = vmatprep.subr.bf16.mxu0 %v3143_v3  ;;  %1711 = vmatprep.subr.bf16.mxu1 %v3147_v4  ;;  %v1542_v4 = vld [vmem:[%s1540_s11 + $0x8] sm:$0xff] }
 0x660   : > { %1700 = vmatprep.mubr.bf16.mxu0 %v2572_v0  ;;  %1741 = vmatprep.mubr.bf16.mxu1 %v2572_v0  ;;  %v1541_v0 = vld [vmem:[%s1540_s11] sm:$0xff] }
 0x662   : > { %1671 = vmatpush1.bf16.msra.mxu0 %v3153_v5  ;;  %1712 = vmatpush1.bf16.msra.mxu1 %v3157_v6 }
 0x663   : > { %1672 = vmatprep.subr.bf16.mxu0 %v3161_v14  ;;  %1713 = vmatprep.subr.bf16.mxu1 %v3165_v15 }
 0x666   : > { %1673 = vmatpush1.bf16.msra.mxu0 %v3169_v19  ;;  %1714 = vmatpush1.bf16.msra.mxu1 %v3173_v25 }
 0x667   : > { %1674 = vmatprep.subr.bf16.mxu0 %v3177_v57  ;;  %1715 = vmatprep.subr.bf16.mxu1 %v3181_v30 }
 0x66a   : > { %1675 = vmatpush1.bf16.msra.mxu0 %v3185_v58  ;;  %1716 = vmatpush1.bf16.msra.mxu1 %v3189_v36  ;;  %v1544_v36 = vld [vmem:[%s1540_s11 + $0x18] sm:$0xff] }
 0x66b   : > { %1676 = vmatprep.subr.bf16.mxu0 %v3193_v7  ;;  %1717 = vmatprep.subr.bf16.mxu1 %v3197_v38 }
 0x66e   : > { %1677 = vmatpush1.bf16.msra.mxu0 %v3201_v41  ;;  %1718 = vmatpush1.bf16.msra.mxu1 %v3205_v12  ;;  %v1543_v41 = vld [vmem:[%s1540_s11 + $0x10] sm:$0xff] }
 0x66f   : > { %1678 = vmatprep.subr.bf16.mxu0 %v3209_v13  ;;  %1719 = vmatprep.subr.bf16.mxu1 %v3213_v16 }
 0x672   : > { %1679 = vmatpush1.bf16.msra.mxu0 %v3217_v17  ;;  %1720 = vmatpush1.bf16.msra.mxu1 %v3266_v55 }
 0x673   : > { %1680 = vmatprep.subr.bf16.mxu0 %v3270_v56  ;;  %1721 = vmatprep.subr.bf16.mxu1 %v3274_v61 }
 0x676   : > { %1681 = vmatpush1.bf16.msra.mxu0 %v3278_v62  ;;  %1722 = vmatpush1.bf16.msra.mxu1 %v3282_v63 }
 0x677   : > { %1682 = vmatprep.subr.bf16.mxu0 %v3286_v39  ;;  %1723 = vmatprep.subr.bf16.mxu1 %v3290_v40 }
 0x67a   : > { %1683 = vmatpush1.bf16.msra.mxu0 %v3294_v42  ;;  %1724 = vmatpush1.bf16.msra.mxu1 %v3298_v43 }
 0x71d   : > { %v1580_v1 = vpop.f32.mrf.mxu0  ;;  %v1621_v2 = vpop.f32.mrf.mxu1 }
 0x71e   : > { %v1628_v3 = vadd.f32 %v1580_v1, %v1541_v0  ;;  %v1630_v13 = vadd.f32 %v1621_v2, %v1543_v41 }
 0x71f   : > { %v1582_v5 = vpop.f32.mrf.mxu0  ;;  %v1623_v6 = vpop.f32.mrf.mxu1 }
 0x720   : > { %v2119_v14 = vmul.f32 -1.442695, %v1628_v3  ;;  %v1629_v15 = vadd.f32 %v1582_v5, %v1542_v4  ;;  %v1631_v7 = vadd.f32 %v1623_v6, %v1544_v36 }
 0x721   : > { %v1584_v19 = vpop.f32.mrf.mxu0  ;;  %v1625_v25 = vpop.f32.mrf.mxu1 }
 0x722   : > { %2363 = vpow2.f32 %v2119_v14  ;;  %v2120_v57 = vmul.f32 -1.442695, %v1629_v15  ;;  %v2121_v38 = vmul.f32 -1.442695, %v1631_v7 }
 0x723   : > { %v1585_v30 = vpop.f32.mrf.mxu0  ;;  %v1626_v58 = vpop.f32.mrf.mxu1 }
 0x724   : > { %2365 = vpow2.f32 %v2120_v57 }
 0x725   : > { %2367 = vpow2.f32 %v2121_v38 }
 0x72f   : > { %v2364_v12 = vpop.eup %2363 }
 0x730   : > { %v1635_v16 = vadd.f32 1.0, %v2364_v12 }
 0x731   : > { %v2366_v17 = vpop.eup %2365 }
 0x732   : > { %2369 = vrcp.f32 %v1635_v16  ;;  %v1641_v52 = vadd.f32 1.0, %v2366_v17  ;;  %v2368_v55 = vpop.eup %2367 }
 0x733   : > { %2371 = vtanh.f32 %v1630_v13  ;;  %v1648_v63 = vadd.f32 1.0, %v2368_v55 }
 0x734   : > { %2373 = vrcp.f32 %v1641_v52 }
 0x735   : > { %2375 = vrcp.f32 %v1648_v63 }
 0x73f   : > { %v2370_v56 = vpop.eup %2369 }
 0x740   : > { %v2372_v61 = vpop.eup %2371 }
 0x741   : > { %v2374_v62 = vpop.eup %2373  ;;  %v1652_v39 = vmul.f32 %v2372_v61, %v2370_v56 }
 0x742   : > { %v1651_v40 = vmul.f32 %v2374_v62, %v3309_v8  ;;  %v2376_v43 = vpop.eup %2375 }
 0x744   : > { %v1653_v42 = vadd.f32 %v1652_v39, %v1651_v40 }
 0x746   : > { %2377 = vtanh.f32 %v1653_v42 }
 0x753   : > { %v2378_v47 = vpop.eup %2377 }
 0x754   : > { %v1655_v18 = vmul.f32 %v2378_v47, %v2376_v43 }
 0x756   : > { %1658 = vst [vmem:[%s1657_s13] sm:$0xff] %v1655_v18  ;;  %v1667_v48 = vpack.c.bf16 %v1655_v18, %v1655_v18 }
 0x758   : > { %1701 = vmatmul.mubr.bf16.vlgmr.msra.gmra.mxu0 %v1667_v48  ;;  %1742 = vmatmul.mubr.bf16.vlgmr.msra.gmra.mxu1 %v1667_v48 }
 0x818   : > { %v1702_v21 = vpop.f32.mrf.mxu0  ;;  %v1743_v22 = vpop.f32.mrf.mxu1 }
 0x819   : > { %v1750_v23 = vadd.f32 %v1702_v21, %v1663_v20  ;;  %v1752_v59 = vadd.f32 %v1743_v22, %v1665_v49 }
 0x81a   : > { %v1704_v9 = vpop.f32.mrf.mxu0  ;;  %v1745_v10 = vpop.f32.mrf.mxu1 }
 0x81b   : > { %v2125_v27 = vmul.f32 -1.442695, %v1750_v23  ;;  %v1751_v28 = vadd.f32 %v1704_v9, %v1664_v24  ;;  %v1753_v37 = vadd.f32 %v1745_v10, %v1666_v35 }
 0x81c   : > { %v1706_v29 = vpop.f32.mrf.mxu0  ;;  %v1747_v31 = vpop.f32.mrf.mxu1 }
 0x81d   : > { %2379 = vpow2.f32 %v2125_v27  ;;  %v2126_v32 = vmul.f32 -1.442695, %v1751_v28  ;;  %v2127_v26 = vmul.f32 -1.442695, %v1753_v37 }
 0x81e   : > { %v1707_v33 = vpop.f32.mrf.mxu0  ;;  %v1748_v34 = vpop.f32.mrf.mxu1 }
 0x81f   : > { %2381 = vpow2.f32 %v2126_v32 }
 0x820   : > { %2383 = vpow2.f32 %v2127_v26 }
 0x82a   : > { %v2380_v50 = vpop.eup %2379 }
 0x82b   : > { %v1757_v60 = vadd.f32 1.0, %v2380_v50 }
 0x82c   : > { %v2382_v51 = vpop.eup %2381 }
 0x82d   : > { %2385 = vrcp.f32 %v1757_v60  ;;  %v1763_v53 = vadd.f32 1.0, %v2382_v51  ;;  %v2384_v54 = vpop.eup %2383 }
 0x82e   : > { %2387 = vtanh.f32 %v1752_v59  ;;  %v1770_v45 = vadd.f32 1.0, %v2384_v54 }
 0x82f   : > { %2389 = vrcp.f32 %v1763_v53 }
 0x830   : > { %2391 = vrcp.f32 %v1770_v45 }
 0x83a   : > { %v2386_v8 = vpop.eup %2385 }
 0x83b   : > { %v2388_v11 = vpop.eup %2387 }
 0x83c   : > { %v2390_v44 = vpop.eup %2389  ;;  %v1774_v46 = vmul.f32 %v2388_v11, %v2386_v8 }
 0x83d   : > { %v1773_v0 = vmul.f32 %v2390_v44, %v1653_v42  ;;  %v2392_v2 = vpop.eup %2391 }
 0x83f   : > { %v1775_v1 = vadd.f32 %v1774_v46, %v1773_v0 }
 0x841   : > { %2393 = vtanh.f32 %v1775_v1 }
 0x84d   : > { %1789 = sbr.rel (!%p2649_p9) target bundleno = 2142 (0x85e), region = 56 }
 0x84e   : > { %v2394_v3 = vpop.eup %2393 }
 0x84f   : > { %v1777_v4 = vmul.f32 %v2394_v3, %v2392_v2 }
 0x851   : > { %1780 = vst [vmem:[%s1779_s21] sm:$0xff] %v1777_v4 }
 0x858   : > { %v1840_v5 = vld [vmem:[%s2990_s28] sm:$0xff]  ;;  %v1842_v6 = vld [vmem:[%s2990_s28 + $0x8] sm:$0xff]  ;;  %v1844_v14 = vld [vmem:[%s2990_s28 + $0x10] sm:$0xff] }
 0x859   : > { %v1846_v15 = vld [vmem:[%s2990_s28 + $0x18] sm:$0xff]  ;;  %v1848_v19 = vld [vmem:[%s2990_s28 + $0x20] sm:$0xff]  ;;  %v1850_v25 = vld [vmem:[%s2990_s28 + $0x28] sm:$0xff]  ;;  %1841 = vst [vmem:[%s1797_s7] sm:$0xff] %v1840_v5 }
 0x85a   : > { %1843 = vst [vmem:[%s1797_s7 + $0x10] sm:$0xff] %v1842_v6  ;;  %1845 = vst [vmem:[%s1797_s7 + $0x20] sm:$0xff] %v1844_v14  ;;  %v1852_v57 = vld [vmem:[%s2990_s28 + $0x30] sm:$0xff]  ;;  %v1854_v30 = vld [vmem:[%s2990_s28 + $0x38] sm:$0xff] }
 0x85b   : > { %1847 = vst [vmem:[%s1797_s7 + $0x30] sm:$0xff] %v1846_v15  ;;  %1849 = vst [vmem:[%s1797_s7 + $0x40] sm:$0xff] %v1848_v19 }
 0x85c   : > { %1851 = vst [vmem:[%s1797_s7 + $0x50] sm:$0xff] %v1850_v25  ;;  %1853 = vst [vmem:[%s1797_s7 + $0x60] sm:$0xff] %v1852_v57 }
 0x85d   : > { %1855 = vst [vmem:[%s1797_s7 + $0x70] sm:$0xff] %v1854_v30 }
 0x85e PF: > { %s20_s20 = sadd.s32 1, %s2565_s20   ;;  %s3410_s27 = sld [smem:[#allocation13_spill]] }
 0x85f   : > { %p17_p9 = scmp.ge.s32.totalorder %s20_s20, 4   ;;  %s3411_s15 = smov %s2549_s16 }
 0x860   : > { %s3412_s16 = smov %s2553_s17  ;;  %s3413_s17 = smov %s2647_s26 }
 0x861   : > { %s3414_s18 = smov %s2561_s19  ;;  %19 = sbr.rel (!%p17_p9) target bundleno = 9 (0x9), region = 161 }
 0x864   : > { %s3415_s19 = smov %s3410_s27 }
 0x866   :  { %1871 = vsyncpa [#allocation6], 1 }
 0x867   :  { %1873 = vsyncpa [#allocation6 + $0x1], 1 }
 0x868   :  { %1874 = vsyncpa [#allocation8], 1 }
 0x869   :  { %1876 = vsyncpa [#allocation8 + $0x1], 1 }

// kernel: mimic_lstm_predictor_forward.4
= control target key start
LH: loop header
LB: loop body
LE: loop exit
PB: predicated region body
PF: predicated region fallthrough
CT: control target
= control target key end

     0   :  { %9 = vsyncpa [#allocation6], 0  ;;  %s3797_s0 = inlined_call_operand.vmem [shape: f32[8,8,256], index: 0, kind: input, shape index: {}]   ;;  %s3798_s1 = inlined_call_operand.hbm [shape: bf16[2,256,512], index: 1, kind: input, shape index: {}]   ;;  %s3799_s2 = inlined_call_operand.vmem [shape: bf16[2,128,512], index: 2, kind: input, shape index: {}]   ;;  %s3800_s3 = inlined_call_operand.vmem [shape: f32[2,1,512], index: 3, kind: input, shape index: {}]   ;;  %s3801_s4 = inlined_call_operand.vmem [shape: f32[8,8,256], index: 4, kind: output, shape index: {}]  }
   0x1   :  { %11 = vsyncpa [#allocation6 + $0x1], 0  ;;  %s2968_s15 = smov 0   ;;  %s2970_s16 = smov 0  }
   0x2   :  { %s2972_s17 = smov 0   ;;  %s2974_s18 = smov 0  }
   0x3   :  { %s2976_s19 = smov 0   ;;  %s2978_s20 = smov 0  }
   0x4 LB: > { %s2323_s21 = sadd.s32 4294967295, %s2936_s20   ;;  %s29_s22 = sadd.s32 1, %s2932_s19  ;;  %s2936_s20 = sphi %s2978_s20, %s17_s20   ;;  %s2932_s19 = sphi %s2976_s19, %s3810_s19   ;;  %s2928_s18 = sphi %s2974_s18, %s3809_s18   ;;  %s2924_s17 = sphi %s2972_s17, %s3808_s17   ;;  %s2920_s16 = sphi %s2970_s16, %s3807_s16   ;;  %s2916_s15 = sphi %s2968_s15, %s3806_s15  }
   0x5   : > { %p31_p0 = scmp.ge.s32.totalorder %s29_s22, 2  ;;  %s68_s23 = sadd.s32 1, %s2924_s17 }
   0x6   : > { %p75_p1 = scmp.ne.s32.totalorder %s2924_s17, %s2920_s16  ;;  %p76_p2 = scmp.eq.s32.totalorder %s2936_s20, 0 }
   0x7   : > { %s3812_s22 = smov (%p31_p0, %s29_s22), 0  ;;  %p81_p4 = scmp.ne.s32.totalorder %s2920_s16, %s2916_s15 }
   0x8   : > { %p3004_p3 = por %p76_p2, %p75_p1  ;;  %s65_s25 = ssub.s32 %s2932_s19, %s3812_s22 }
   0x9   : > { %p82_p5 = scmp.eq.s32.totalorder %s2323_s21, 0  ;;  %p66_p6 = scmp.eq.s32.totalorder %s65_s25, 0 }
   0xa   : > { %p165_p7 = scmp.eq.s32.totalorder %s2323_s21, 1  ;;  %p2501_p10 = scmp.lt.s32.totalorder %s2936_s20, 2 }
   0xb   : > { %p3011_p8 = por %p82_p5, %p81_p4  ;;  %s207_s29 = sand.u32 1, %s2924_s17  }
   0xc   : > { %s3016_s27 = scalar_select %p66_p6, %s2924_s17, %s68_s23  }
   0xd   : > { %p3018_p9 = por %p165_p7, %p75_p1  ;;  %s2485_s30 = sshll.u32 %s2932_s19, 13 }
   0xe   : > { %s2328_s5 = sshll.u32 %s207_s29, 9  ;;  %s217_s8 = scalar_lea.hbm %s3798_s1, %s2485_s30 }
   0xf   : > { %s211_s9 = scalar_lea.vmem [#allocation5], %s2328_s5  ;;  %p3030_p11 = pnand %p2501_p10, %p3004_p3 }
  0x10   : > { %s218_s10 = sshll.u32 %s211_s9, 4  ;;  %s208_s12 = scalar_lea.sflag [#allocation6], %s207_s29  ;;  %s219_s10 = int_to_ptr.vmem [resolvable:$true] %s218_s10 }
  0x11   : > { %p2860_p12 = pneg %p3030_p11  ;;  %s2871_s13 = scalar_lea.vmem %s219_s10, 8192 }
  0x12   : > { %p2872_p13 = scmp.ne.s32.totalorder %s219_s10, %s2871_s13  ;;  %s2938_s14 = smov [#allocation5]  }
  0x13   : > { %s2876_s15 = sshll.u32 %s2938_s14, 4  ;;  %s2877_s15 = int_to_ptr.vmem [resolvable:$false] %s2876_s15 }
  0x14   : > { %p2874_p0 = pnand %p2872_p13, %p2860_p12  ;;  %s2878_s21 = scalar_lea.vmem %s2877_s15, 16384 }
  0x15   : > { %p2879_p2 = scmp.lt.s32.totalorder %s219_s10, %s2877_s15  ;;  %p2880_p4 = scmp.lt.s32.totalorder %s2878_s21, %s2871_s13 }
  0x16   : > { %p2875_p1 = pneg %p2874_p0 }
  0x17   : > { %p2881_p5 = por %p2880_p4, %p2879_p2 }
  0x19   : > { %p2882_p3 = pnand %p2881_p5, %p2875_p1 }
  0x1b   : > { %2885 = shalt.err (!%p2882_p3)
}
  0x1c   : > { %s2939_s23 = smov 256   ;;  %s2940_s24 = smov 16  }
  0x1d   : > { %2500 = dma.hbm_to_vmem [thread:$0]  (!%p3030_p11), %s217_s8, 8192, %s219_s10, %s208_s12, %s2939_s23, %s2939_s23, %s2940_s24  }
  0x1e   : > { %p2331_p6 = scmp.ge.s32.totalorder %s2936_s20, 1  ;;  %p241_p7 = scmp.lt.s32.totalorder %s2936_s20, 3 }
  0x20   : > { %p242_p10 = pnand %p2331_p6, %p241_p7 }
  0x21   : > { %s3041_s25 = sand.u32 (!%p242_p10), 1, %s2920_s16  }
  0x22   : > { %245 = sbr.rel (%p242_p10) target bundleno = 2164 (0x874), region = 36  ;;  %s2332_s29 = sshll.u32 (!%p242_p10), %s3041_s25, 9 }
  0x23   : > { %s248_s30 = scalar_lea.sflag (!%p242_p10), [#allocation6], %s3041_s25  ;;  %s3045_s5 = scalar_lea.vmem (!%p242_p10), [#allocation5], %s2332_s29 }
  0x27   : > { %2911 = dma.done.wait (%p3011_p8), %s248_s30, 8192  }
  0x28   : > { %2913 = vsyncadd (%p3011_p8), %s248_s30, 4294959104  ;;  %v2554_v0 = vld [vmem:[%s3045_s5 + $0xe4] ss:$16 sps:$4 sm:$0xff]   ;;  %v2556_v1 = vld [vmem:[%s3045_s5 + $0xec] ss:$16 sps:$4 sm:$0xff]   ;;  %p306_p8 = scmp.lt.s32.totalorder %s2928_s18, 1 }
  0x29   : > { %756 = vmatprep.subr.bf16.mxu0 %v2554_v0  ;;  %v2558_v2 = vld [vmem:[%s3045_s5 + $0xe0] ss:$16 sps:$4 sm:$0xff]   ;;  %v2559_v3 = vld [vmem:[%s3045_s5 + $0xe8] ss:$16 sps:$4 sm:$0xff]   ;;  %829 = vmatprep.subr.bf16.mxu1 %v2556_v1  ;;  %v2560_v4 = vld [vmem:[%s3045_s5 + $0xc4] ss:$16 sps:$4 sm:$0xff]  }
  0x2a   : > { %757 = vmatpush1.bf16.msra.mxu0 %v2558_v2  ;;  %830 = vmatpush1.bf16.msra.mxu1 %v2559_v3  ;;  %v2562_v5 = vld [vmem:[%s3045_s5 + $0xcc] ss:$16 sps:$4 sm:$0xff]   ;;  %v2564_v6 = vld [vmem:[%s3045_s5 + $0xc0] ss:$16 sps:$4 sm:$0xff]   ;;  %v2565_v7 = vld [vmem:[%s3045_s5 + $0xc8] ss:$16 sps:$4 sm:$0xff]  }
  0x2b   : > { %758 = vmatprep.subr.bf16.mxu0 %v2560_v4  ;;  %831 = vmatprep.subr.bf16.mxu1 %v2562_v5  ;;  %v2566_v8 = vld [vmem:[%s3045_s5 + $0xa4] ss:$16 sps:$4 sm:$0xff]   ;;  %v2568_v9 = vld [vmem:[%s3045_s5 + $0xac] ss:$16 sps:$4 sm:$0xff]   ;;  %v2570_v10 = vld [vmem:[%s3045_s5 + $0xa0] ss:$16 sps:$4 sm:$0xff]  }
  0x2c   : > { %v2571_v11 = vld [vmem:[%s3045_s5 + $0xa8] ss:$16 sps:$4 sm:$0xff]   ;;  %v2572_v12 = vld [vmem:[%s3045_s5 + $0x84] ss:$16 sps:$4 sm:$0xff]   ;;  %v2574_v13 = vld [vmem:[%s3045_s5 + $0x8c] ss:$16 sps:$4 sm:$0xff]  }
  0x2d   : > { %v2576_v14 = vld [vmem:[%s3045_s5 + $0x80] ss:$16 sps:$4 sm:$0xff]   ;;  %v2577_v15 = vld [vmem:[%s3045_s5 + $0x88] ss:$16 sps:$4 sm:$0xff]   ;;  %v2578_v16 = vld [vmem:[%s3045_s5 + $0x64] ss:$16 sps:$4 sm:$0xff]  }
  0x2e   : > { %759 = vmatpush1.bf16.msra.mxu0 %v2564_v6  ;;  %832 = vmatpush1.bf16.msra.mxu1 %v2565_v7  ;;  %v2580_v17 = vld [vmem:[%s3045_s5 + $0x6c] ss:$16 sps:$4 sm:$0xff]   ;;  %v2582_v18 = vld [vmem:[%s3045_s5 + $0x60] ss:$16 sps:$4 sm:$0xff]   ;;  %v2583_v19 = vld [vmem:[%s3045_s5 + $0x68] ss:$16 sps:$4 sm:$0xff]  }
  0x2f   : > { %760 = vmatprep.subr.bf16.mxu0 %v2566_v8  ;;  %833 = vmatprep.subr.bf16.mxu1 %v2568_v9  ;;  %v2584_v20 = vld [vmem:[%s3045_s5 + $0x44] ss:$16 sps:$4 sm:$0xff]   ;;  %v2586_v21 = vld [vmem:[%s3045_s5 + $0x4c] ss:$16 sps:$4 sm:$0xff]   ;;  %v2588_v22 = vld [vmem:[%s3045_s5 + $0x40] ss:$16 sps:$4 sm:$0xff]  }
  0x30   : > { %v2589_v23 = vld [vmem:[%s3045_s5 + $0x48] ss:$16 sps:$4 sm:$0xff]   ;;  %v2590_v24 = vld [vmem:[%s3045_s5 + $0x24] ss:$16 sps:$4 sm:$0xff]   ;;  %v2592_v25 = vld [vmem:[%s3045_s5 + $0x2c] ss:$16 sps:$4 sm:$0xff]  }
  0x31   : > { %v2594_v26 = vld [vmem:[%s3045_s5 + $0x20] ss:$16 sps:$4 sm:$0xff]   ;;  %v2595_v27 = vld [vmem:[%s3045_s5 + $0x28] ss:$16 sps:$4 sm:$0xff]   ;;  %v2596_v28 = vld [vmem:[%s3045_s5 + $0x4] ss:$16 sps:$4 sm:$0xff]  }
  0x32   : > { %761 = vmatpush1.bf16.msra.mxu0 %v2570_v10  ;;  %834 = vmatpush1.bf16.msra.mxu1 %v2571_v11  ;;  %v2598_v29 = vld [vmem:[%s3045_s5 + $0xc] ss:$16 sps:$4 sm:$0xff]   ;;  %v2600_v30 = vld [vmem:[%s3045_s5] ss:$16 sps:$4 sm:$0xff]   ;;  %v2601_v31 = vld [vmem:[%s3045_s5 + $0x8] ss:$16 sps:$4 sm:$0xff]  }
  0x33   : > { %762 = vmatprep.subr.bf16.mxu0 %v2572_v12  ;;  %835 = vmatprep.subr.bf16.mxu1 %v2574_v13  ;;  %v2602_v32 = vld [vmem:[%s3045_s5 + $0x1e4] ss:$16 sps:$4 sm:$0xff]   ;;  %v2604_v33 = vld [vmem:[%s3045_s5 + $0x1ec] ss:$16 sps:$4 sm:$0xff]   ;;  %v2606_v34 = vld [vmem:[%s3045_s5 + $0x1e0] ss:$16 sps:$4 sm:$0xff]  }
  0x34   : > { %v2607_v35 = vld [vmem:[%s3045_s5 + $0x1e8] ss:$16 sps:$4 sm:$0xff]   ;;  %v2608_v36 = vld [vmem:[%s3045_s5 + $0x1c4] ss:$16 sps:$4 sm:$0xff]   ;;  %v2610_v37 = vld [vmem:[%s3045_s5 + $0x1cc] ss:$16 sps:$4 sm:$0xff]  }
  0x35   : > { %v2612_v38 = vld [vmem:[%s3045_s5 + $0x1c0] ss:$16 sps:$4 sm:$0xff]   ;;  %v2613_v39 = vld [vmem:[%s3045_s5 + $0x1c8] ss:$16 sps:$4 sm:$0xff]   ;;  %v2614_v40 = vld [vmem:[%s3045_s5 + $0x1a4] ss:$16 sps:$4 sm:$0xff]  }
  0x36   : > { %763 = vmatpush1.bf16.msra.mxu0 %v2576_v14  ;;  %836 = vmatpush1.bf16.msra.mxu1 %v2577_v15  ;;  %s3094_s26 = scalar_select %p306_p8, %s2928_s18, 1  ;;  %v2616_v41 = vld [vmem:[%s3045_s5 + $0x1ac] ss:$16 sps:$4 sm:$0xff]   ;;  %v2618_v42 = vld [vmem:[%s3045_s5 + $0x1a0] ss:$16 sps:$4 sm:$0xff]  }
  0x37   : > { %764 = vmatprep.subr.bf16.mxu0 %v2578_v16  ;;  %837 = vmatprep.subr.bf16.mxu1 %v2580_v17  ;;  %v2619_v43 = vld [vmem:[%s3045_s5 + $0x1a8] ss:$16 sps:$4 sm:$0xff]   ;;  %v2620_v44 = vld [vmem:[%s3045_s5 + $0x184] ss:$16 sps:$4 sm:$0xff]   ;;  %v2622_v45 = vld [vmem:[%s3045_s5 + $0x18c] ss:$16 sps:$4 sm:$0xff]  }
  0x38   : > { %s2486_s6 = sshll.u32 %s3094_s26, 8  ;;  %v327_v46 = vld [vmem:[%s3797_s0 + $0x8] sm:$0xff]  ;;  %v2624_v47 = vld [vmem:[%s3045_s5 + $0x180] ss:$16 sps:$4 sm:$0xff]   ;;  %v329_v49 = vld [vmem:[%s3797_s0 + $0x18] sm:$0xff]  ;;  %s2336_s11 = sshll.u32 %s3094_s26, 2 }
  0x39   : > { %v2625_v48 = vld [vmem:[%s3045_s5 + $0x188] ss:$16 sps:$4 sm:$0xff]   ;;  %s3113_s13 = scalar_lea.vmem %s3799_s2, %s2486_s6  ;;  %v2626_v50 = vld [vmem:[%s3045_s5 + $0x164] ss:$16 sps:$4 sm:$0xff]   ;;  %v343_v51 = vpack.c.bf16 %v329_v49, %v327_v46  ;;  %v2628_v52 = vld [vmem:[%s3045_s5 + $0x16c] ss:$16 sps:$4 sm:$0xff]   ;;  %s314_s15 = scalar_lea.vmem %s3800_s3, %s2336_s11 }
  0x3a   : > { %765 = vmatpush1.bf16.msra.mxu0 %v2582_v18  ;;  %838 = vmatpush1.bf16.msra.mxu1 %v2583_v19  ;;  %v2630_v53 = vld [vmem:[%s3045_s5 + $0x160] ss:$16 sps:$4 sm:$0xff]   ;;  %v2631_v54 = vld [vmem:[%s3045_s5 + $0x168] ss:$16 sps:$4 sm:$0xff]   ;;  %v2632_v55 = vld [vmem:[%s3045_s5 + $0x144] ss:$16 sps:$4 sm:$0xff]  }
  0x3b   : > { %766 = vmatprep.subr.bf16.mxu0 %v2584_v20  ;;  %839 = vmatprep.subr.bf16.mxu1 %v2586_v21  ;;  %v2634_v56 = vld [vmem:[%s3045_s5 + $0x14c] ss:$16 sps:$4 sm:$0xff]   ;;  %v2636_v57 = vld [vmem:[%s3045_s5 + $0x140] ss:$16 sps:$4 sm:$0xff]   ;;  %v2637_v58 = vld [vmem:[%s3045_s5 + $0x148] ss:$16 sps:$4 sm:$0xff]  }
  0x3c   : > { %788 = vmatprep.mubr.bf16.mxu0 %v343_v51  ;;  %861 = vmatprep.mubr.bf16.mxu1 %v343_v51  ;;  %v2638_v59 = vld [vmem:[%s3045_s5 + $0x124] ss:$16 sps:$4 sm:$0xff]   ;;  %v2640_v60 = vld [vmem:[%s3045_s5 + $0x12c] ss:$16 sps:$4 sm:$0xff]   ;;  %v2642_v61 = vld [vmem:[%s3045_s5 + $0x120] ss:$16 sps:$4 sm:$0xff]  }
  0x3d   : > { %v2643_v62 = vld [vmem:[%s3045_s5 + $0x128] ss:$16 sps:$4 sm:$0xff]   ;;  %v2644_v63 = vld [vmem:[%s3045_s5 + $0x104] ss:$16 sps:$4 sm:$0xff]   ;;  %v2646_v0 = vld [vmem:[%s3045_s5 + $0x10c] ss:$16 sps:$4 sm:$0xff]  }
  0x3e   : > { %767 = vmatpush1.bf16.msra.mxu0 %v2588_v22  ;;  %840 = vmatpush1.bf16.msra.mxu1 %v2589_v23  ;;  %v2648_v1 = vld [vmem:[%s3045_s5 + $0x100] ss:$16 sps:$4 sm:$0xff]   ;;  %v2649_v2 = vld [vmem:[%s3045_s5 + $0x108] ss:$16 sps:$4 sm:$0xff]   ;;  %v3138_v5 = vld [vmem:[%s3113_s13 + $0xe4] ss:$16 sps:$4 sm:$0xff]  }
  0x3f   : > { %768 = vmatprep.subr.bf16.mxu0 %v2590_v24  ;;  %841 = vmatprep.subr.bf16.mxu1 %v2592_v25  ;;  %v326_v3 = vld [vmem:[%s3797_s0] sm:$0xff]  ;;  %v328_v4 = vld [vmem:[%s3797_s0 + $0x10] sm:$0xff]  ;;  %v3141_v6 = vld [vmem:[%s3113_s13 + $0xec] ss:$16 sps:$4 sm:$0xff]   ;;  %p968_p11 = scmp.eq.s32.totalorder %s2928_s18, 0  ;;  %s2333_s24 = sshll.u32 %s3041_s25, 6 }
  0x40   : > { %v331_v7 = vld [vmem:[%s3797_s0 + $0x28] sm:$0xff]  ;;  %v333_v8 = vld [vmem:[%s3797_s0 + $0x38] sm:$0xff]  ;;  %v342_v9 = vpack.c.bf16 %v328_v4, %v326_v3  ;;  %v3150_v10 = vld [vmem:[%s3113_s13 + $0xe0] ss:$16 sps:$4 sm:$0xff]   ;;  %s3394_s30 = scalar_lea.vmem [#allocation7], %s2333_s24 }
  0x41   : > { %v345_v11 = vpack.c.bf16 %v333_v8, %v331_v7  ;;  %v3154_v12 = vld [vmem:[%s3113_s13 + $0xc4] ss:$16 sps:$4 sm:$0xff]   ;;  %v3158_v13 = vld [vmem:[%s3113_s13 + $0xc0] ss:$16 sps:$4 sm:$0xff]   ;;  %v3161_v14 = vld [vmem:[%s3113_s13 + $0xe8] ss:$16 sps:$4 sm:$0xff]  }
  0x42   : > { %769 = vmatpush1.bf16.msra.mxu0 %v2594_v26  ;;  %842 = vmatpush1.bf16.msra.mxu1 %v2595_v27  ;;  %v330_v15 = vld [vmem:[%s3797_s0 + $0x20] sm:$0xff]  ;;  %v3167_v16 = vld [vmem:[%s3113_s13 + $0xcc] ss:$16 sps:$4 sm:$0xff]   ;;  %v332_v17 = vld [vmem:[%s3797_s0 + $0x30] sm:$0xff]  ;;  %s3382_s26 = scalar_select %p968_p11, 0, 7 }
  0x43   : > { %770 = vmatprep.subr.bf16.mxu0 %v2596_v28  ;;  %843 = vmatprep.subr.bf16.mxu1 %v2598_v29  ;;  %v3175_v18 = vld [vmem:[%s3113_s13 + $0xa4] ss:$16 sps:$4 sm:$0xff]   ;;  %v3179_v19 = vld [vmem:[%s3113_s13 + $0xc8] ss:$16 sps:$4 sm:$0xff]   ;;  %v344_v22 = vpack.c.bf16 %v332_v17, %v330_v15  ;;  %v3190_v23 = vld [vmem:[%s3113_s13 + $0xa0] ss:$16 sps:$4 sm:$0xff]  }
  0x44   : > { %v335_v20 = vld [vmem:[%s3797_s0 + $0x48] sm:$0xff]  ;;  %v337_v21 = vld [vmem:[%s3797_s0 + $0x58] sm:$0xff]  ;;  %v3197_v25 = vld [vmem:[%s3113_s13 + $0x84] ss:$16 sps:$4 sm:$0xff]   ;;  %s2487_s21 = sshll.u32 %s3382_s26, 5  ;;  %s2438_s29 = sshll.u32 %s3382_s26, 3 }
  0x45   : > { %v3193_v24 = vld [vmem:[%s3113_s13 + $0xac] ss:$16 sps:$4 sm:$0xff]   ;;  %v347_v26 = vpack.c.bf16 %v337_v21, %v335_v20  ;;  %v3201_v27 = vld [vmem:[%s3113_s13 + $0xa8] ss:$16 sps:$4 sm:$0xff]   ;;  %v3208_v29 = vld [vmem:[%s3113_s13 + $0x80] ss:$16 sps:$4 sm:$0xff]   ;;  %s1249_s5 = scalar_lea.vmem %s3394_s30, %s2438_s29 [#allocation7] }
  0x46   : > { %771 = vmatpush1.bf16.msra.mxu0 %v2600_v30  ;;  %844 = vmatpush1.bf16.msra.mxu1 %v2601_v31  ;;  %v3204_v28 = vld [vmem:[%s3113_s13 + $0x8c] ss:$16 sps:$4 sm:$0xff]   ;;  %v334_v30 = vld [vmem:[%s3797_s0 + $0x40] sm:$0xff]  ;;  %v336_v31 = vld [vmem:[%s3797_s0 + $0x50] sm:$0xff]  ;;  %s972_s23 = scalar_lea.vmem [#allocation2], %s2487_s21 }
  0x47   : > { %772 = vmatprep.subr.bf16.mxu0 %v2602_v32  ;;  %845 = vmatprep.subr.bf16.mxu1 %v2604_v33  ;;  %v3219_v32 = vld [vmem:[%s3113_s13 + $0x64] ss:$16 sps:$4 sm:$0xff]   ;;  %v3223_v33 = vld [vmem:[%s3113_s13 + $0x88] ss:$16 sps:$4 sm:$0xff]   ;;  %v3272_v49 = vld [vmem:[%s3113_s13 + $0x20] ss:$16 sps:$4 sm:$0xff]  }
  0x48   : > { %v3263_v46 = vld [vmem:[%s3113_s13 + $0x24] ss:$16 sps:$4 sm:$0xff]   ;;  %s3433_s25 = scalar_select %p968_p11, 1, 6 }
  0x49   : > { %v3279_v51 = vld [vmem:[%s3113_s13 + $0x4] ss:$16 sps:$4 sm:$0xff]   ;;  %s3478_s10 = scalar_select %p968_p11, 2, 5 }
  0x4a   : > { %773 = vmatpush2.bf16.msra.mxu0 %v2606_v34  ;;  %846 = vmatpush2.bf16.msra.mxu1 %v2607_v35  ;;  %v339_v34 = vld [vmem:[%s3797_s0 + $0x68] sm:$0xff]  ;;  %v341_v35 = vld [vmem:[%s3797_s0 + $0x78] sm:$0xff]  ;;  %s2488_s6 = sshll.u32 %s3433_s25, 5  ;;  %s2444_s8 = sshll.u32 %s3433_s25, 3 }
  0x4b   : > { %774 = vmatprep.subr.bf16.mxu0 %v2608_v36  ;;  %847 = vmatprep.subr.bf16.mxu1 %v2610_v37  ;;  %v346_v36 = vpack.c.bf16 %v336_v31, %v334_v30  ;;  %v3234_v37 = vld [vmem:[%s3113_s13 + $0x60] ss:$16 sps:$4 sm:$0xff]   ;;  %s1254_s7 = scalar_lea.vmem [#allocation2], %s2488_s6  ;;  %s1371_s9 = scalar_lea.vmem %s3394_s30, %s2444_s8 [#allocation7] }
  0x4c   : > { %s2489_s11 = sshll.u32 %s3478_s10, 5  ;;  %s2450_s14 = sshll.u32 %s3478_s10, 3 }
  0x4d   : > { %s1376_s12 = scalar_lea.vmem [#allocation2], %s2489_s11 }
  0x4e   : > { %775 = vmatpush2.bf16.msra.mxu0 %v2612_v38  ;;  %848 = vmatpush2.bf16.msra.mxu1 %v2613_v39  ;;  %v3237_v38 = vld [vmem:[%s3113_s13 + $0x6c] ss:$16 sps:$4 sm:$0xff]   ;;  %v3241_v39 = vld [vmem:[%s3113_s13 + $0x44] ss:$16 sps:$4 sm:$0xff]   ;;  %s3529_s26 = scalar_select %p968_p11, 3, 4 }
  0x4f   : > { %776 = vmatprep.subr.bf16.mxu0 %v2614_v40  ;;  %849 = vmatprep.subr.bf16.mxu1 %v2616_v41  ;;  %v349_v40 = vpack.c.bf16 %v341_v35, %v339_v34  ;;  %v3245_v41 = vld [vmem:[%s3113_s13 + $0x68] ss:$16 sps:$4 sm:$0xff]  }
  0x50   : > { %s2490_s21 = sshll.u32 %s3529_s26, 5  ;;  %s2456_s24 = sshll.u32 %s3529_s26, 3 }
  0x51   : > { %s1615_s29 = scalar_lea.vmem %s3394_s30, %s2456_s24 [#allocation7] }
  0x52   : > { %777 = vmatpush2.bf16.msra.mxu0 %v2618_v42  ;;  %850 = vmatpush2.bf16.msra.mxu1 %v2619_v43  ;;  %v3248_v42 = vld [vmem:[%s3113_s13 + $0x4c] ss:$16 sps:$4 sm:$0xff]   ;;  %v3252_v43 = vld [vmem:[%s3113_s13 + $0x40] ss:$16 sps:$4 sm:$0xff]   ;;  %s3760_s24 = scalar_select %p968_p11, 7, 0 }
  0x53   : > { %778 = vmatprep.subr.bf16.mxu0 %v2620_v44  ;;  %851 = vmatprep.subr.bf16.mxu1 %v2622_v45  ;;  %v338_v44 = vld [vmem:[%s3797_s0 + $0x60] sm:$0xff]  ;;  %v340_v45 = vld [vmem:[%s3797_s0 + $0x70] sm:$0xff] }
  0x56   : > { %779 = vmatpush2.bf16.msra.mxu0 %v2624_v47  ;;  %852 = vmatpush2.bf16.msra.mxu1 %v2625_v48  ;;  %v3267_v47 = vld [vmem:[%s3113_s13 + $0x48] ss:$16 sps:$4 sm:$0xff]   ;;  %v348_v48 = vpack.c.bf16 %v340_v45, %v338_v44 }
  0x57   : > { %780 = vmatprep.subr.bf16.mxu0 %v2626_v50  ;;  %853 = vmatprep.subr.bf16.mxu1 %v2628_v52  ;;  %v3275_v50 = vld [vmem:[%s3113_s13 + $0x2c] ss:$16 sps:$4 sm:$0xff]   ;;  %v3283_v52 = vld [vmem:[%s3113_s13 + $0x28] ss:$16 sps:$4 sm:$0xff]  }
  0x5a   : > { %781 = vmatpush2.bf16.msra.mxu0 %v2630_v53  ;;  %854 = vmatpush2.bf16.msra.mxu1 %v2631_v54  ;;  %v3286_v53 = vld [vmem:[%s3113_s13 + $0xc] ss:$16 sps:$4 sm:$0xff]   ;;  %v3290_v54 = vld [vmem:[%s3113_s13] ss:$16 sps:$4 sm:$0xff]  }
  0x5b   : > { %782 = vmatprep.subr.bf16.mxu0 %v2632_v55  ;;  %855 = vmatprep.subr.bf16.mxu1 %v2634_v56  ;;  %v2941_v55 = vmov 0   ;;  %v3297_v56 = vld [vmem:[%s3113_s13 + $0x8] ss:$16 sps:$4 sm:$0xff]  }
  0x5e   : > { %783 = vmatpush2.bf16.msra.mxu0 %v2636_v57  ;;  %856 = vmatpush2.bf16.msra.mxu1 %v2637_v58  ;;  %v2942_v57 = vmov 0.0|0.0   ;;  %v416_v58 = vlaneseq }
  0x5f   : > { %784 = vmatprep.subr.bf16.mxu0 %v2638_v59  ;;  %857 = vmatprep.subr.bf16.mxu1 %v2640_v60 }
  0x60   : > { %v417_v59 = vshrl.u32 %v416_v58, 7 }
  0x62   : > { %785 = vmatpush2.bf16.msra.mxu0 %v2642_v61  ;;  %858 = vmatpush2.bf16.msra.mxu1 %v2643_v62  ;;  %v418_v60 = vsub.s32 0, %v417_v59  ;;  %v426_v61 = vsub.s32 2, %v417_v59  ;;  %v414_v62 = vld [vmem:[%s314_s15] sm:$0xf]  ;;  %s1493_s15 = scalar_lea.vmem %s3394_s30, %s2450_s14 [#allocation7] }
  0x63   : > { %786 = vmatprep.subr.bf16.mxu0 %v2644_v63  ;;  %859 = vmatprep.subr.bf16.mxu1 %v2646_v0  ;;  %v422_v63 = vsub.s32 1, %v417_v59  ;;  %v430_v0 = vsub.s32 3, %v417_v59  ;;  %s3752_s14 = scalar_select %p968_p11, 6, 1 }
  0x65   : > { %v3347_v3 = vrot.slane %v414_v62, %v422_v63  ;;  %v3349_v4 = vrot.slane %v414_v62, %v430_v0 }
  0x66   : > { %787 = vmatpush2.bf16.msra.mxu0 %v2648_v1  ;;  %860 = vmatpush2.bf16.msra.mxu1 %v2649_v2  ;;  %v3343_v1 = vrot.slane %v414_v62, %v418_v60  ;;  %v3345_v2 = vrot.slane %v414_v62, %v426_v61 }
  0x67   : > { %1138 = vmatprep.subr.bf16.mxu0 %v3138_v5  ;;  %1179 = vmatprep.subr.bf16.mxu1 %v3141_v6 }
  0x69   : > { %789 = vmatmul.mubr.bf16.vlgmr.msra.gmra.mxu0 %v342_v9  ;;  %862 = vmatmul.mubr.bf16.vlgmr.msra.gmra.mxu1 %v342_v9 }
  0x6a   : > { %1139 = vmatpush1.bf16.msra.mxu0 %v3150_v10  ;;  %798 = vmatprep.mubr.bf16.mxu0 %v345_v11 }
  0x6b   : > { %1140 = vmatprep.subr.bf16.mxu0 %v3154_v12  ;;  %871 = vmatprep.mubr.bf16.mxu1 %v345_v11 }
  0x6c   : > { %1180 = vmatpush1.bf16.msra.mxu1 %v3161_v14 }
  0x6d   : > { %1181 = vmatprep.subr.bf16.mxu1 %v3167_v16 }
  0x6e   : > { %1141 = vmatpush1.bf16.msra.mxu0 %v3158_v13 }
  0x6f   : > { %1142 = vmatprep.subr.bf16.mxu0 %v3175_v18 }
  0x70   : > { %1182 = vmatpush1.bf16.msra.mxu1 %v3179_v19 }
  0x71   : > { %799 = vmatmul.mubr.bf16.gmra.mxu0 %v344_v22  ;;  %872 = vmatmul.mubr.bf16.gmra.mxu1 %v344_v22 }
  0x72   : > { %1143 = vmatpush1.bf16.msra.mxu0 %v3190_v23  ;;  %1183 = vmatprep.subr.bf16.mxu1 %v3193_v24 }
  0x73   : > { %1144 = vmatprep.subr.bf16.mxu0 %v3197_v25  ;;  %808 = vmatprep.mubr.bf16.mxu0 %v347_v26 }
  0x74   : > { %881 = vmatprep.mubr.bf16.mxu1 %v347_v26  ;;  %1184 = vmatpush1.bf16.msra.mxu1 %v3201_v27 }
  0x75   : > { %1185 = vmatprep.subr.bf16.mxu1 %v3204_v28 }
  0x76   : > { %1145 = vmatpush1.bf16.msra.mxu0 %v3208_v29 }
  0x77   : > { %1146 = vmatprep.subr.bf16.mxu0 %v3219_v32 }
  0x78   : > { %1186 = vmatpush1.bf16.msra.mxu1 %v3223_v33 }
  0x79   : > { %809 = vmatmul.mubr.bf16.gmra.mxu0 %v346_v36  ;;  %882 = vmatmul.mubr.bf16.gmra.mxu1 %v346_v36 }
  0x7a   : > { %1147 = vmatpush1.bf16.msra.mxu0 %v3234_v37  ;;  %1187 = vmatprep.subr.bf16.mxu1 %v3237_v38 }
  0x7b   : > { %1148 = vmatprep.subr.bf16.mxu0 %v3241_v39  ;;  %818 = vmatprep.mubr.bf16.mxu0 %v349_v40 }
  0x7c   : > { %891 = vmatprep.mubr.bf16.mxu1 %v349_v40  ;;  %1188 = vmatpush1.bf16.msra.mxu1 %v3245_v41 }
  0x7d   : > { %1189 = vmatprep.subr.bf16.mxu1 %v3248_v42 }
  0x7e   : > { %1149 = vmatpush1.bf16.msra.mxu0 %v3252_v43 }
  0x7f   : > { %1150 = vmatprep.subr.bf16.mxu0 %v3263_v46 }
  0x80   : > { %1190 = vmatpush1.bf16.msra.mxu1 %v3267_v47 }
  0x81   : > { %819 = vmatmul.mubr.bf16.gmra.mxu0 %v348_v48  ;;  %892 = vmatmul.mubr.bf16.gmra.mxu1 %v348_v48 }
  0x82   : > { %1151 = vmatpush1.bf16.msra.mxu0 %v3272_v49  ;;  %1191 = vmatprep.subr.bf16.mxu1 %v3275_v50 }
  0x83   : > { %1152 = vmatprep.subr.bf16.mxu0 %v3279_v51  ;;  %1170 = vmatprep.mubr.bf16.mxu0 %v2941_v55 }
  0x84   : > { %1192 = vmatpush1.bf16.msra.mxu1 %v3283_v52  ;;  %1211 = vmatprep.mubr.bf16.mxu1 %v2941_v55 }
  0x85   : > { %1193 = vmatprep.subr.bf16.mxu1 %v3286_v53 }
  0x86   : > { %1153 = vmatpush1.bf16.msra.mxu0 %v3290_v54 }
  0x87   : > { %1260 = vmatprep.subr.bf16.mxu0 %v3138_v5 }
  0x88   : > { %1194 = vmatpush1.bf16.msra.mxu1 %v3297_v56 }
  0x89   : > { %1171 = vmatmul.mubr.bf16.vlgmr.msra.gmra.mxu0 %v2942_v57  ;;  %1301 = vmatprep.subr.bf16.mxu1 %v3141_v6 }
  0x8a   : > { %1261 = vmatpush1.bf16.msra.mxu0 %v3150_v10  ;;  %1292 = vmatprep.mubr.bf16.mxu0 %v2941_v55 }
  0x8b   : > { %1212 = vmatmul.mubr.bf16.vlgmr.msra.gmra.mxu1 %v2942_v57  ;;  %1262 = vmatprep.subr.bf16.mxu0 %v3154_v12 }
  0x8c   : > { %1302 = vmatpush1.bf16.msra.mxu1 %v3161_v14  ;;  %1333 = vmatprep.mubr.bf16.mxu1 %v2941_v55 }
  0x8d   : > { %1303 = vmatprep.subr.bf16.mxu1 %v3167_v16 }
  0x8e   : > { %1263 = vmatpush1.bf16.msra.mxu0 %v3158_v13 }
  0x8f   : > { %1264 = vmatprep.subr.bf16.mxu0 %v3175_v18 }
  0x90   : > { %1304 = vmatpush1.bf16.msra.mxu1 %v3179_v19 }
  0x91   : > { %1305 = vmatprep.subr.bf16.mxu1 %v3193_v24 }
  0x92   : > { %1265 = vmatpush1.bf16.msra.mxu0 %v3190_v23 }
  0x93   : > { %1266 = vmatprep.subr.bf16.mxu0 %v3197_v25 }
  0x94   : > { %1306 = vmatpush1.bf16.msra.mxu1 %v3201_v27 }
  0x95   : > { %1307 = vmatprep.subr.bf16.mxu1 %v3204_v28 }
  0x96   : > { %1267 = vmatpush1.bf16.msra.mxu0 %v3208_v29 }
  0x97   : > { %1268 = vmatprep.subr.bf16.mxu0 %v3219_v32 }
  0x98   : > { %1308 = vmatpush1.bf16.msra.mxu1 %v3223_v33 }
  0x99   : > { %1309 = vmatprep.subr.bf16.mxu1 %v3237_v38 }
  0x9a   : > { %1269 = vmatpush1.bf16.msra.mxu0 %v3234_v37 }
  0x9b   : > { %1270 = vmatprep.subr.bf16.mxu0 %v3241_v39 }
  0x9c   : > { %1310 = vmatpush1.bf16.msra.mxu1 %v3245_v41 }
  0x9d   : > { %1311 = vmatprep.subr.bf16.mxu1 %v3248_v42 }
  0x9e   : > { %1271 = vmatpush1.bf16.msra.mxu0 %v3252_v43 }
  0x9f   : > { %1272 = vmatprep.subr.bf16.mxu0 %v3263_v46 }
  0xa0   : > { %1312 = vmatpush1.bf16.msra.mxu1 %v3267_v47 }
  0xa1   : > { %1313 = vmatprep.subr.bf16.mxu1 %v3275_v50 }
  0xa2   : > { %1273 = vmatpush1.bf16.msra.mxu0 %v3272_v49 }
  0xa3   : > { %1274 = vmatprep.subr.bf16.mxu0 %v3279_v51 }
  0xa4   : > { %1314 = vmatpush1.bf16.msra.mxu1 %v3283_v52 }
  0xa5   : > { %1315 = vmatprep.subr.bf16.mxu1 %v3286_v53 }
  0xa6   : > { %1275 = vmatpush1.bf16.msra.mxu0 %v3290_v54 }
  0xa7   : > { %1382 = vmatprep.subr.bf16.mxu0 %v3138_v5 }
  0xa8   : > { %1316 = vmatpush1.bf16.msra.mxu1 %v3297_v56 }
  0xa9   : > { %1423 = vmatprep.subr.bf16.mxu1 %v3141_v6 }
 0x129   : > { %v790_v7 = vpop.f32.mrf.mxu0  ;;  %v863_v8 = vpop.f32.mrf.mxu1 }
 0x12a   : > { %v791_v9 = vadd.f32 %v790_v7, %v3343_v1  ;;  %v864_v11 = vadd.f32 %v863_v8, %v3345_v2 }
 0x12b   : > { %v792_v15 = vpop.f32.mrf.mxu0  ;;  %v865_v17 = vpop.f32.mrf.mxu1 }
 0x12c   : > { %902 = vst [vmem:[#allocation2] sm:$0xff] %v791_v9  ;;  %904 = vst [vmem:[#allocation2 + $0x10] sm:$0xff] %v864_v11  ;;  %v793_v20 = vadd.f32 %v792_v15, %v3347_v3  ;;  %v866_v21 = vadd.f32 %v865_v17, %v3349_v4 }
 0x12d   : > { %v794_v22 = vpop.f32.mrf.mxu0  ;;  %v867_v26 = vpop.f32.mrf.mxu1 }
 0x12e   : > { %903 = vst [vmem:[#allocation2 + $0x8] sm:$0xff] %v793_v20  ;;  %905 = vst [vmem:[#allocation2 + $0x18] sm:$0xff] %v866_v21  ;;  %v795_v30 = vadd.f32 %v794_v22, %v3343_v1  ;;  %v868_v31 = vadd.f32 %v867_v26, %v3345_v2 }
 0x12f   : > { %v796_v34 = vpop.f32.mrf.mxu0  ;;  %v869_v35 = vpop.f32.mrf.mxu1 }
 0x130   : > { %906 = vst [vmem:[#allocation2 + $0x20] sm:$0xff] %v795_v30  ;;  %908 = vst [vmem:[#allocation2 + $0x30] sm:$0xff] %v868_v31  ;;  %v797_v36 = vadd.f32 %v796_v34, %v3347_v3  ;;  %v870_v40 = vadd.f32 %v869_v35, %v3349_v4 }
 0x131   : > { %v800_v44 = vpop.f32.mrf.mxu0  ;;  %v873_v45 = vpop.f32.mrf.mxu1 }
 0x132   : > { %907 = vst [vmem:[#allocation2 + $0x28] sm:$0xff] %v797_v36  ;;  %909 = vst [vmem:[#allocation2 + $0x38] sm:$0xff] %v870_v40  ;;  %v801_v48 = vadd.f32 %v800_v44, %v3343_v1  ;;  %v874_v57 = vadd.f32 %v873_v45, %v3345_v2 }
 0x133   : > { %v802_v58 = vpop.f32.mrf.mxu0  ;;  %v875_v59 = vpop.f32.mrf.mxu1 }
 0x134   : > { %910 = vst [vmem:[#allocation2 + $0x40] sm:$0xff] %v801_v48  ;;  %912 = vst [vmem:[#allocation2 + $0x50] sm:$0xff] %v874_v57  ;;  %v803_v60 = vadd.f32 %v802_v58, %v3347_v3  ;;  %v876_v61 = vadd.f32 %v875_v59, %v3349_v4 }
 0x135   : > { %v804_v62 = vpop.f32.mrf.mxu0  ;;  %v877_v63 = vpop.f32.mrf.mxu1 }
 0x136   : > { %911 = vst [vmem:[#allocation2 + $0x48] sm:$0xff] %v803_v60  ;;  %913 = vst [vmem:[#allocation2 + $0x58] sm:$0xff] %v876_v61  ;;  %v805_v0 = vadd.f32 %v804_v62, %v3343_v1  ;;  %v878_v7 = vadd.f32 %v877_v63, %v3345_v2 }
 0x137   : > { %v806_v8 = vpop.f32.mrf.mxu0  ;;  %v879_v9 = vpop.f32.mrf.mxu1 }
 0x138   : > { %914 = vst [vmem:[#allocation2 + $0x60] sm:$0xff] %v805_v0  ;;  %916 = vst [vmem:[#allocation2 + $0x70] sm:$0xff] %v878_v7  ;;  %v807_v11 = vadd.f32 %v806_v8, %v3347_v3  ;;  %v880_v15 = vadd.f32 %v879_v9, %v3349_v4 }
 0x139   : > { %v810_v17 = vpop.f32.mrf.mxu0  ;;  %v883_v20 = vpop.f32.mrf.mxu1 }
 0x13a   : > { %915 = vst [vmem:[#allocation2 + $0x68] sm:$0xff] %v807_v11  ;;  %917 = vst [vmem:[#allocation2 + $0x78] sm:$0xff] %v880_v15  ;;  %v811_v21 = vadd.f32 %v810_v17, %v3343_v1  ;;  %v884_v22 = vadd.f32 %v883_v20, %v3345_v2 }
 0x13b   : > { %v812_v26 = vpop.f32.mrf.mxu0  ;;  %v885_v30 = vpop.f32.mrf.mxu1 }
 0x13c   : > { %918 = vst [vmem:[#allocation2 + $0x80] sm:$0xff] %v811_v21  ;;  %920 = vst [vmem:[#allocation2 + $0x90] sm:$0xff] %v884_v22  ;;  %v813_v31 = vadd.f32 %v812_v26, %v3347_v3  ;;  %v886_v34 = vadd.f32 %v885_v30, %v3349_v4 }
 0x13d   : > { %v814_v35 = vpop.f32.mrf.mxu0  ;;  %v887_v36 = vpop.f32.mrf.mxu1 }
 0x13e   : > { %919 = vst [vmem:[#allocation2 + $0x88] sm:$0xff] %v813_v31  ;;  %921 = vst [vmem:[#allocation2 + $0x98] sm:$0xff] %v886_v34  ;;  %v815_v40 = vadd.f32 %v814_v35, %v3343_v1  ;;  %v888_v44 = vadd.f32 %v887_v36, %v3345_v2 }
 0x13f   : > { %v816_v45 = vpop.f32.mrf.mxu0  ;;  %v889_v48 = vpop.f32.mrf.mxu1 }
 0x140   : > { %922 = vst [vmem:[#allocation2 + $0xa0] sm:$0xff] %v815_v40  ;;  %924 = vst [vmem:[#allocation2 + $0xb0] sm:$0xff] %v888_v44  ;;  %v817_v57 = vadd.f32 %v816_v45, %v3347_v3  ;;  %v890_v58 = vadd.f32 %v889_v48, %v3349_v4 }
 0x141   : > { %v820_v59 = vpop.f32.mrf.mxu0  ;;  %v893_v60 = vpop.f32.mrf.mxu1 }
 0x142   : > { %923 = vst [vmem:[#allocation2 + $0xa8] sm:$0xff] %v817_v57  ;;  %925 = vst [vmem:[#allocation2 + $0xb8] sm:$0xff] %v890_v58  ;;  %v821_v61 = vadd.f32 %v820_v59, %v3343_v1  ;;  %v894_v62 = vadd.f32 %v893_v60, %v3345_v2 }
 0x143   : > { %v822_v63 = vpop.f32.mrf.mxu0  ;;  %v895_v0 = vpop.f32.mrf.mxu1 }
 0x144   : > { %926 = vst [vmem:[#allocation2 + $0xc0] sm:$0xff] %v821_v61  ;;  %928 = vst [vmem:[#allocation2 + $0xd0] sm:$0xff] %v894_v62  ;;  %v823_v7 = vadd.f32 %v822_v63, %v3347_v3  ;;  %v896_v8 = vadd.f32 %v895_v0, %v3349_v4 }
 0x145   : > { %v824_v9 = vpop.f32.mrf.mxu0  ;;  %v897_v11 = vpop.f32.mrf.mxu1 }
 0x146   : > { %927 = vst [vmem:[#allocation2 + $0xc8] sm:$0xff] %v823_v7  ;;  %929 = vst [vmem:[#allocation2 + $0xd8] sm:$0xff] %v896_v8  ;;  %v825_v15 = vadd.f32 %v824_v9, %v3343_v1  ;;  %v898_v17 = vadd.f32 %v897_v11, %v3345_v2 }
 0x147   : > { %v826_v20 = vpop.f32.mrf.mxu0  ;;  %v899_v21 = vpop.f32.mrf.mxu1 }
 0x148   : > { %930 = vst [vmem:[#allocation2 + $0xe0] sm:$0xff] %v825_v15  ;;  %932 = vst [vmem:[#allocation2 + $0xf0] sm:$0xff] %v898_v17  ;;  %v827_v22 = vadd.f32 %v826_v20, %v3347_v3  ;;  %v900_v26 = vadd.f32 %v899_v21, %v3349_v4 }
 0x149   : > { %v1172_v30 = vpop.f32.mrf.mxu0 }
 0x14a   : > { %931 = vst [vmem:[#allocation2 + $0xe8] sm:$0xff] %v827_v22  ;;  %933 = vst [vmem:[#allocation2 + $0xf8] sm:$0xff] %v900_v26 }
 0x14b   : > { %v1174_v31 = vpop.f32.mrf.mxu0  ;;  %v1213_v34 = vpop.f32.mrf.mxu1 }
 0x14d   : > { %v1176_v35 = vpop.f32.mrf.mxu0  ;;  %v1215_v36 = vpop.f32.mrf.mxu1 }
 0x14f   : > { %v1177_v40 = vpop.f32.mrf.mxu0  ;;  %v1217_v2 = vpop.f32.mrf.mxu1 }
 0x151   : > { %v973_v1 = vld [vmem:[%s972_s23] sm:$0xff]  ;;  %v974_v45 = vld [vmem:[%s972_s23 + $0x8] sm:$0xff]  ;;  %v1218_v48 = vpop.f32.mrf.mxu1  ;;  %v976_v4 = vld [vmem:[%s972_s23 + $0x18] sm:$0xff] }
 0x152   : > { %v1220_v44 = vadd.f32 %v1172_v30, %v973_v1  ;;  %v1221_v58 = vadd.f32 %v1174_v31, %v974_v45  ;;  %v1223_v59 = vadd.f32 %v1215_v36, %v976_v4  ;;  %v975_v60 = vld [vmem:[%s972_s23 + $0x10] sm:$0xff]  ;;  %v1255_v36 = vld [vmem:[%s1254_s7] sm:$0xff]  ;;  %s1498_s23 = scalar_lea.vmem [#allocation2], %s2490_s21  ;;  %s2474_s21 = sshll.u32 %s3752_s14, 3 }
 0x153   : > { %v1222_v63 = vadd.f32 %v1213_v34, %v975_v60 }
 0x154   : > { %v2435_v57 = vmul.f32 -1.442695, %v1220_v44  ;;  %v2436_v3 = vmul.f32 -1.442695, %v1221_v58  ;;  %v2437_v61 = vmul.f32 -1.442695, %v1223_v59 }
 0x155   : > { %v1256_v44 = vld [vmem:[%s1254_s7 + $0x8] sm:$0xff] }
 0x156   : > { %2698 = vpow2.f32 %v2435_v57 }
 0x157   : > { %2700 = vpow2.f32 %v2436_v3 }
 0x158   : > { %2702 = vpow2.f32 %v2437_v61 }
 0x163   : > { %v2699_v62 = vpop.eup %2698 }
 0x164   : > { %v1227_v0 = vadd.f32 1.0, %v2699_v62  ;;  %v2701_v7 = vpop.eup %2700  ;;  %v1258_v62 = vld [vmem:[%s1254_s7 + $0x18] sm:$0xff] }
 0x165   : > { %v1233_v8 = vadd.f32 1.0, %v2701_v7  ;;  %v2703_v9 = vpop.eup %2702  ;;  %v1257_v7 = vld [vmem:[%s1254_s7 + $0x10] sm:$0xff] }
 0x166   : > { %2704 = vrcp.f32 %v1227_v0  ;;  %v1240_v20 = vadd.f32 1.0, %v2703_v9 }
 0x167   : > { %2706 = vtanh.f32 %v1222_v63 }
 0x168   : > { %2708 = vrcp.f32 %v1233_v8 }
 0x169   : > { %2710 = vrcp.f32 %v1240_v20 }
 0x173   : > { %v2705_v11 = vpop.eup %2704 }
 0x174   : > { %v2707_v15 = vpop.eup %2706 }
 0x175   : > { %v2709_v17 = vpop.eup %2708  ;;  %v1244_v22 = vmul.f32 %v2707_v15, %v2705_v11 }
 0x176   : > { %v1243_v21 = vmul.f32 0.0, %v2709_v17  ;;  %v2711_v30 = vpop.eup %2710 }
 0x178   : > { %v3389_v26 = vadd.f32 %v1244_v22, %v1243_v21 }
 0x17a   : > { %2712 = vtanh.f32 %v3389_v26 }
 0x187   : > { %v2713_v31 = vpop.eup %2712 }
 0x188   : > { %v1247_v34 = vmul.f32 %v2713_v31, %v2711_v30 }
 0x18a   : > { %1250 = vst [vmem:[%s1249_s5] sm:$0xff] %v1247_v34  ;;  %v1259_v35 = vpack.c.bf16 %v1247_v34, %v1247_v34  ;;  %s3637_s5 = scalar_select %p968_p11, 4, 3 }
 0x18c   : > { %1293 = vmatmul.mubr.bf16.vlgmr.msra.gmra.mxu0 %v1259_v35  ;;  %1334 = vmatmul.mubr.bf16.vlgmr.msra.gmra.mxu1 %v1259_v35  ;;  %s2491_s25 = sshll.u32 %s3637_s5, 5  ;;  %s2462_s7 = sshll.u32 %s3637_s5, 3 }
 0x18d   : > { %1383 = vmatpush1.bf16.msra.mxu0 %v3150_v10  ;;  %1424 = vmatpush1.bf16.msra.mxu1 %v3161_v14  ;;  %s1620_s6 = scalar_lea.vmem [#allocation2], %s2491_s25  ;;  %s1737_s8 = scalar_lea.vmem %s3394_s30, %s2462_s7 [#allocation7] }
 0x18e   : > { %1384 = vmatprep.subr.bf16.mxu0 %v3154_v12  ;;  %1425 = vmatprep.subr.bf16.mxu1 %v3167_v16  ;;  %s2480_s25 = sshll.u32 %s3760_s24, 3  ;;  %s2482_s7 = sshll.u32 (%p3018_p9), %s2928_s18, 3 }
 0x18f   : > { %1414 = vmatprep.mubr.bf16.mxu0 %v2941_v55  ;;  %1455 = vmatprep.mubr.bf16.mxu1 %v2941_v55 }
 0x191   : > { %1385 = vmatpush1.bf16.msra.mxu0 %v3158_v13  ;;  %1426 = vmatpush1.bf16.msra.mxu1 %v3179_v19 }
 0x192   : > { %1386 = vmatprep.subr.bf16.mxu0 %v3175_v18  ;;  %1427 = vmatprep.subr.bf16.mxu1 %v3193_v24 }
 0x195   : > { %1387 = vmatpush1.bf16.msra.mxu0 %v3190_v23  ;;  %1428 = vmatpush1.bf16.msra.mxu1 %v3201_v27 }
 0x196   : > { %1388 = vmatprep.subr.bf16.mxu0 %v3197_v25  ;;  %1429 = vmatprep.subr.bf16.mxu1 %v3204_v28 }
 0x199   : > { %1389 = vmatpush1.bf16.msra.mxu0 %v3208_v29  ;;  %1430 = vmatpush1.bf16.msra.mxu1 %v3223_v33 }
 0x19a   : > { %1390 = vmatprep.subr.bf16.mxu0 %v3219_v32  ;;  %1431 = vmatprep.subr.bf16.mxu1 %v3237_v38 }
 0x19d   : > { %1391 = vmatpush1.bf16.msra.mxu0 %v3234_v37  ;;  %1432 = vmatpush1.bf16.msra.mxu1 %v3245_v41 }
 0x19e   : > { %1392 = vmatprep.subr.bf16.mxu0 %v3241_v39  ;;  %1433 = vmatprep.subr.bf16.mxu1 %v3248_v42 }
 0x1a1   : > { %1393 = vmatpush1.bf16.msra.mxu0 %v3252_v43  ;;  %1434 = vmatpush1.bf16.msra.mxu1 %v3267_v47 }
 0x1a2   : > { %1394 = vmatprep.subr.bf16.mxu0 %v3263_v46  ;;  %1435 = vmatprep.subr.bf16.mxu1 %v3275_v50 }
 0x1a5   : > { %1395 = vmatpush1.bf16.msra.mxu0 %v3272_v49  ;;  %1436 = vmatpush1.bf16.msra.mxu1 %v3283_v52 }
 0x1a6   : > { %1396 = vmatprep.subr.bf16.mxu0 %v3279_v51  ;;  %1437 = vmatprep.subr.bf16.mxu1 %v3286_v53 }
 0x1a9   : > { %1397 = vmatpush1.bf16.msra.mxu0 %v3290_v54  ;;  %1438 = vmatpush1.bf16.msra.mxu1 %v3297_v56 }
 0x1aa   : > { %1504 = vmatprep.subr.bf16.mxu0 %v3138_v5  ;;  %1545 = vmatprep.subr.bf16.mxu1 %v3141_v6 }
 0x24c   : > { %v1294_v1 = vpop.f32.mrf.mxu0  ;;  %v1335_v40 = vpop.f32.mrf.mxu1 }
 0x24d   : > { %v1342_v2 = vadd.f32 %v1294_v1, %v1255_v36  ;;  %v1344_v9 = vadd.f32 %v1335_v40, %v1257_v7 }
 0x24e   : > { %v1296_v45 = vpop.f32.mrf.mxu0  ;;  %v1337_v48 = vpop.f32.mrf.mxu1 }
 0x24f   : > { %v2441_v57 = vmul.f32 -1.442695, %v1342_v2  ;;  %v1343_v58 = vadd.f32 %v1296_v45, %v1256_v44  ;;  %v1345_v63 = vadd.f32 %v1337_v48, %v1258_v62 }
 0x250   : > { %v1298_v3 = vpop.f32.mrf.mxu0  ;;  %v1339_v4 = vpop.f32.mrf.mxu1 }
 0x251   : > { %2714 = vpow2.f32 %v2441_v57  ;;  %v2442_v59 = vmul.f32 -1.442695, %v1343_v58  ;;  %v2443_v0 = vmul.f32 -1.442695, %v1345_v63  ;;  %v1378_v58 = vld [vmem:[%s1376_s12 + $0x8] sm:$0xff] }
 0x252   : > { %v1299_v60 = vpop.f32.mrf.mxu0  ;;  %v1340_v61 = vpop.f32.mrf.mxu1 }
 0x253   : > { %2716 = vpow2.f32 %v2442_v59 }
 0x254   : > { %2718 = vpow2.f32 %v2443_v0  ;;  %v1380_v0 = vld [vmem:[%s1376_s12 + $0x18] sm:$0xff] }
 0x25e   : > { %v2715_v8 = vpop.eup %2714 }
 0x25f   : > { %v1349_v11 = vadd.f32 1.0, %v2715_v8 }
 0x260   : > { %v2717_v15 = vpop.eup %2716 }
 0x261   : > { %2720 = vrcp.f32 %v1349_v11  ;;  %v1355_v17 = vadd.f32 1.0, %v2717_v15  ;;  %v2719_v20 = vpop.eup %2718 }
 0x262   : > { %2722 = vtanh.f32 %v1344_v9  ;;  %v1362_v31 = vadd.f32 1.0, %v2719_v20  ;;  %v1379_v9 = vld [vmem:[%s1376_s12 + $0x10] sm:$0xff] }
 0x263   : > { %2724 = vrcp.f32 %v1355_v17 }
 0x264   : > { %2726 = vrcp.f32 %v1362_v31 }
 0x26e   : > { %v2721_v21 = vpop.eup %2720 }
 0x26f   : > { %v2723_v22 = vpop.eup %2722 }
 0x270   : > { %v2725_v30 = vpop.eup %2724  ;;  %v1366_v34 = vmul.f32 %v2723_v22, %v2721_v21 }
 0x271   : > { %v1365_v35 = vmul.f32 %v2725_v30, %v3389_v26  ;;  %v2727_v1 = vpop.eup %2726  ;;  %v1377_v26 = vld [vmem:[%s1376_s12] sm:$0xff] }
 0x273   : > { %v3437_v36 = vadd.f32 %v1366_v34, %v1365_v35 }
 0x275   : > { %2728 = vtanh.f32 %v3437_v36 }
 0x282   : > { %v2729_v40 = vpop.eup %2728 }
 0x283   : > { %v1369_v2 = vmul.f32 %v2729_v40, %v2727_v1 }
 0x285   : > { %1372 = vst [vmem:[%s1371_s9] sm:$0xff] %v1369_v2  ;;  %v1381_v44 = vpack.c.bf16 %v1369_v2, %v1369_v2  ;;  %s3709_s9 = scalar_select %p968_p11, 5, 2 }
 0x287   : > { %1415 = vmatmul.mubr.bf16.vlgmr.msra.gmra.mxu0 %v1381_v44  ;;  %1456 = vmatmul.mubr.bf16.vlgmr.msra.gmra.mxu1 %v1381_v44  ;;  %s2492_s10 = sshll.u32 %s3709_s9, 5 }
 0x288   : > { %1505 = vmatpush1.bf16.msra.mxu0 %v3150_v10  ;;  %1546 = vmatpush1.bf16.msra.mxu1 %v3161_v14  ;;  %s1742_s11 = scalar_lea.vmem [#allocation2], %s2492_s10  ;;  %s2121_s10 = scalar_lea.vmem (%p3018_p9), %s3801_s4, %s2482_s7 }
 0x289   : > { %1506 = vmatprep.subr.bf16.mxu0 %v3154_v12  ;;  %1547 = vmatprep.subr.bf16.mxu1 %v3167_v16 }
 0x28a   : > { %1536 = vmatprep.mubr.bf16.mxu0 %v2941_v55  ;;  %1577 = vmatprep.mubr.bf16.mxu1 %v2941_v55 }
 0x28c   : > { %1507 = vmatpush1.bf16.msra.mxu0 %v3158_v13  ;;  %1548 = vmatpush1.bf16.msra.mxu1 %v3179_v19 }
 0x28d   : > { %1508 = vmatprep.subr.bf16.mxu0 %v3175_v18  ;;  %1549 = vmatprep.subr.bf16.mxu1 %v3193_v24 }
 0x290   : > { %1509 = vmatpush1.bf16.msra.mxu0 %v3190_v23  ;;  %1550 = vmatpush1.bf16.msra.mxu1 %v3201_v27 }
 0x291   : > { %1510 = vmatprep.subr.bf16.mxu0 %v3197_v25  ;;  %1551 = vmatprep.subr.bf16.mxu1 %v3204_v28 }
 0x294   : > { %1511 = vmatpush1.bf16.msra.mxu0 %v3208_v29  ;;  %1552 = vmatpush1.bf16.msra.mxu1 %v3223_v33 }
 0x295   : > { %1512 = vmatprep.subr.bf16.mxu0 %v3219_v32  ;;  %1553 = vmatprep.subr.bf16.mxu1 %v3237_v38 }
 0x298   : > { %1513 = vmatpush1.bf16.msra.mxu0 %v3234_v37  ;;  %1554 = vmatpush1.bf16.msra.mxu1 %v3245_v41 }
 0x299   : > { %1514 = vmatprep.subr.bf16.mxu0 %v3241_v39  ;;  %1555 = vmatprep.subr.bf16.mxu1 %v3248_v42 }
 0x29c   : > { %1515 = vmatpush1.bf16.msra.mxu0 %v3252_v43  ;;  %1556 = vmatpush1.bf16.msra.mxu1 %v3267_v47 }
 0x29d   : > { %1516 = vmatprep.subr.bf16.mxu0 %v3263_v46  ;;  %1557 = vmatprep.subr.bf16.mxu1 %v3275_v50 }
 0x2a0   : > { %1517 = vmatpush1.bf16.msra.mxu0 %v3272_v49  ;;  %1558 = vmatpush1.bf16.msra.mxu1 %v3283_v52 }
 0x2a1   : > { %1518 = vmatprep.subr.bf16.mxu0 %v3279_v51  ;;  %1559 = vmatprep.subr.bf16.mxu1 %v3286_v53 }
 0x2a4   : > { %1519 = vmatpush1.bf16.msra.mxu0 %v3290_v54  ;;  %1560 = vmatpush1.bf16.msra.mxu1 %v3297_v56 }
 0x2a5   : > { %1626 = vmatprep.subr.bf16.mxu0 %v3138_v5  ;;  %1667 = vmatprep.subr.bf16.mxu1 %v3141_v6 }
 0x347   : > { %v1416_v45 = vpop.f32.mrf.mxu0  ;;  %v1457_v48 = vpop.f32.mrf.mxu1 }
 0x348   : > { %v1464_v57 = vadd.f32 %v1416_v45, %v1377_v26  ;;  %v1466_v15 = vadd.f32 %v1457_v48, %v1379_v9 }
 0x349   : > { %v1418_v3 = vpop.f32.mrf.mxu0  ;;  %v1459_v4 = vpop.f32.mrf.mxu1 }
 0x34a   : > { %v2447_v59 = vmul.f32 -1.442695, %v1464_v57  ;;  %v1465_v60 = vadd.f32 %v1418_v3, %v1378_v58  ;;  %v1467_v7 = vadd.f32 %v1459_v4, %v1380_v0 }
 0x34b   : > { %v1420_v61 = vpop.f32.mrf.mxu0  ;;  %v1461_v62 = vpop.f32.mrf.mxu1 }
 0x34c   : > { %2730 = vpow2.f32 %v2447_v59  ;;  %v2448_v5 = vmul.f32 -1.442695, %v1465_v60  ;;  %v2449_v8 = vmul.f32 -1.442695, %v1467_v7 }
 0x34d   : > { %v1421_v6 = vpop.f32.mrf.mxu0  ;;  %v1462_v63 = vpop.f32.mrf.mxu1 }
 0x34e   : > { %2732 = vpow2.f32 %v2448_v5 }
 0x34f   : > { %2734 = vpow2.f32 %v2449_v8 }
 0x359   : > { %v2731_v11 = vpop.eup %2730 }
 0x35a   : > { %v1471_v17 = vadd.f32 1.0, %v2731_v11  ;;  %v3539_v11 = vld [vmem:[%s3113_s13 + $0xe0] ss:$16 sps:$4 sm:$0xff]  }
 0x35b   : > { %v2733_v20 = vpop.eup %2732 }
 0x35c   : > { %2736 = vrcp.f32 %v1471_v17  ;;  %v1477_v21 = vadd.f32 1.0, %v2733_v20  ;;  %v2735_v22 = vpop.eup %2734  ;;  %v3547_v17 = vld [vmem:[%s3113_s13 + $0xc4] ss:$16 sps:$4 sm:$0xff]   ;;  %v3551_v20 = vld [vmem:[%s3113_s13 + $0xcc] ss:$16 sps:$4 sm:$0xff]  }
 0x35d   : > { %2738 = vtanh.f32 %v1466_v15  ;;  %v1484_v35 = vadd.f32 1.0, %v2735_v22  ;;  %v3543_v15 = vld [vmem:[%s3113_s13 + $0xe8] ss:$16 sps:$4 sm:$0xff]  }
 0x35e   : > { %2740 = vrcp.f32 %v1477_v21  ;;  %v3557_v21 = vld [vmem:[%s3113_s13 + $0xc0] ss:$16 sps:$4 sm:$0xff]   ;;  %v3561_v22 = vld [vmem:[%s3113_s13 + $0xc8] ss:$16 sps:$4 sm:$0xff]  }
 0x35f   : > { %2742 = vrcp.f32 %v1484_v35  ;;  %v3577_v35 = vld [vmem:[%s3113_s13 + $0xa8] ss:$16 sps:$4 sm:$0xff]  }
 0x369   : > { %v2737_v30 = vpop.eup %2736 }
 0x36a   : > { %v2739_v31 = vpop.eup %2738 }
 0x36b   : > { %v2741_v34 = vpop.eup %2740  ;;  %v1488_v1 = vmul.f32 %v2739_v31, %v2737_v30  ;;  %v3565_v30 = vld [vmem:[%s3113_s13 + $0xa4] ss:$16 sps:$4 sm:$0xff]   ;;  %v3569_v31 = vld [vmem:[%s3113_s13 + $0xac] ss:$16 sps:$4 sm:$0xff]  }
 0x36c   : > { %v1487_v40 = vmul.f32 %v2741_v34, %v3437_v36  ;;  %v2743_v44 = vpop.eup %2742  ;;  %v3573_v34 = vld [vmem:[%s3113_s13 + $0xa0] ss:$16 sps:$4 sm:$0xff]  }
 0x36e   : > { %v3482_v2 = vadd.f32 %v1488_v1, %v1487_v40  ;;  %v3581_v1 = vld [vmem:[%s3113_s13 + $0x84] ss:$16 sps:$4 sm:$0xff]   ;;  %v3585_v40 = vld [vmem:[%s3113_s13 + $0x8c] ss:$16 sps:$4 sm:$0xff]  }
 0x370   : > { %2744 = vtanh.f32 %v3482_v2 }
 0x37d   : > { %v2745_v26 = vpop.eup %2744 }
 0x37e   : > { %v1491_v45 = vmul.f32 %v2745_v26, %v2743_v44  ;;  %v3593_v44 = vld [vmem:[%s3113_s13 + $0x88] ss:$16 sps:$4 sm:$0xff]   ;;  %v3597_v26 = vld [vmem:[%s3113_s13 + $0x64] ss:$16 sps:$4 sm:$0xff]  }
 0x380   : > { %1494 = vst [vmem:[%s1493_s15] sm:$0xff] %v1491_v45  ;;  %v1503_v48 = vpack.c.bf16 %v1491_v45, %v1491_v45  ;;  %v3601_v45 = vld [vmem:[%s3113_s13 + $0x6c] ss:$16 sps:$4 sm:$0xff]   ;;  %s2493_s15 = sshll.u32 %s3752_s14, 5 }
 0x381   : > { %s1864_s26 = scalar_lea.vmem [#allocation2], %s2493_s15 }
 0x382   : > { %1537 = vmatmul.mubr.bf16.vlgmr.msra.gmra.mxu0 %v1503_v48  ;;  %1578 = vmatmul.mubr.bf16.vlgmr.msra.gmra.mxu1 %v1503_v48  ;;  %v3605_v48 = vld [vmem:[%s3113_s13 + $0x60] ss:$16 sps:$4 sm:$0xff]  }
 0x383   : > { %1627 = vmatpush1.bf16.msra.mxu0 %v3150_v10  ;;  %1668 = vmatpush1.bf16.msra.mxu1 %v3161_v14  ;;  %v3520_v10 = vld [vmem:[%s3113_s13 + $0xe4] ss:$16 sps:$4 sm:$0xff]  }
 0x384   : > { %1628 = vmatprep.subr.bf16.mxu0 %v3154_v12  ;;  %1669 = vmatprep.subr.bf16.mxu1 %v3167_v16  ;;  %v3524_v12 = vld [vmem:[%s3113_s13 + $0xec] ss:$16 sps:$4 sm:$0xff]  }
 0x385   : > { %1658 = vmatprep.mubr.bf16.mxu0 %v2941_v55  ;;  %1699 = vmatprep.mubr.bf16.mxu1 %v2941_v55 }
 0x387   : > { %1629 = vmatpush1.bf16.msra.mxu0 %v3158_v13  ;;  %1670 = vmatpush1.bf16.msra.mxu1 %v3179_v19  ;;  %v1499_v13 = vld [vmem:[%s1498_s23] sm:$0xff]  ;;  %v1500_v19 = vld [vmem:[%s1498_s23 + $0x8] sm:$0xff] }
 0x388   : > { %1630 = vmatprep.subr.bf16.mxu0 %v3175_v18  ;;  %1671 = vmatprep.subr.bf16.mxu1 %v3193_v24 }
 0x38b   : > { %1631 = vmatpush1.bf16.msra.mxu0 %v3190_v23  ;;  %1672 = vmatpush1.bf16.msra.mxu1 %v3201_v27 }
 0x38c   : > { %1632 = vmatprep.subr.bf16.mxu0 %v3197_v25  ;;  %1673 = vmatprep.subr.bf16.mxu1 %v3204_v28 }
 0x38f   : > { %1633 = vmatpush1.bf16.msra.mxu0 %v3208_v29  ;;  %1674 = vmatpush1.bf16.msra.mxu1 %v3223_v33 }
 0x390   : > { %1634 = vmatprep.subr.bf16.mxu0 %v3219_v32  ;;  %1675 = vmatprep.subr.bf16.mxu1 %v3237_v38  ;;  %v1502_v38 = vld [vmem:[%s1498_s23 + $0x18] sm:$0xff] }
 0x393   : > { %1635 = vmatpush1.bf16.msra.mxu0 %v3234_v37  ;;  %1676 = vmatpush1.bf16.msra.mxu1 %v3245_v41 }
 0x394   : > { %1636 = vmatprep.subr.bf16.mxu0 %v3241_v39  ;;  %1677 = vmatprep.subr.bf16.mxu1 %v3248_v42  ;;  %v1501_v42 = vld [vmem:[%s1498_s23 + $0x10] sm:$0xff]  ;;  %s1981_s23 = scalar_lea.vmem %s3394_s30, %s2474_s21 [#allocation7] }
 0x397   : > { %1637 = vmatpush1.bf16.msra.mxu0 %v3252_v43  ;;  %1678 = vmatpush1.bf16.msra.mxu1 %v3267_v47 }
 0x398   : > { %1638 = vmatprep.subr.bf16.mxu0 %v3263_v46  ;;  %1679 = vmatprep.subr.bf16.mxu1 %v3275_v50 }
 0x39b   : > { %1639 = vmatpush1.bf16.msra.mxu0 %v3272_v49  ;;  %1680 = vmatpush1.bf16.msra.mxu1 %v3283_v52 }
 0x39c   : > { %1640 = vmatprep.subr.bf16.mxu0 %v3279_v51  ;;  %1681 = vmatprep.subr.bf16.mxu1 %v3286_v53 }
 0x39f   : > { %1641 = vmatpush1.bf16.msra.mxu0 %v3290_v54  ;;  %1682 = vmatpush1.bf16.msra.mxu1 %v3297_v56 }
 0x3a0   : > { %1748 = vmatprep.subr.bf16.mxu0 %v3520_v10  ;;  %1789 = vmatprep.subr.bf16.mxu1 %v3524_v12 }
 0x442   : > { %v1538_v14 = vpop.f32.mrf.mxu0  ;;  %v1579_v16 = vpop.f32.mrf.mxu1 }
 0x443   : > { %v1586_v18 = vadd.f32 %v1538_v14, %v1499_v13  ;;  %v1588_v36 = vadd.f32 %v1579_v16, %v1501_v42  ;;  %v3609_v13 = vld [vmem:[%s3113_s13 + $0x68] ss:$16 sps:$4 sm:$0xff]   ;;  %v3613_v14 = vld [vmem:[%s3113_s13 + $0x44] ss:$16 sps:$4 sm:$0xff]   ;;  %v3617_v16 = vld [vmem:[%s3113_s13 + $0x4c] ss:$16 sps:$4 sm:$0xff]  }
 0x444   : > { %v1540_v23 = vpop.f32.mrf.mxu0  ;;  %v1581_v24 = vpop.f32.mrf.mxu1 }
 0x445   : > { %v2453_v25 = vmul.f32 -1.442695, %v1586_v18  ;;  %v1587_v27 = vadd.f32 %v1540_v23, %v1500_v19  ;;  %v1589_v39 = vadd.f32 %v1581_v24, %v1502_v38  ;;  %v3621_v18 = vld [vmem:[%s3113_s13 + $0x40] ss:$16 sps:$4 sm:$0xff]  }
 0x446   : > { %v1542_v28 = vpop.f32.mrf.mxu0  ;;  %v1583_v29 = vpop.f32.mrf.mxu1 }
 0x447   : > { %2746 = vpow2.f32 %v2453_v25  ;;  %v2454_v32 = vmul.f32 -1.442695, %v1587_v27  ;;  %v2455_v41 = vmul.f32 -1.442695, %v1589_v39  ;;  %v1624_v28 = vld [vmem:[%s1620_s6 + $0x18] sm:$0xff] }
 0x448   : > { %v1543_v33 = vpop.f32.mrf.mxu0  ;;  %v1584_v37 = vpop.f32.mrf.mxu1 }
 0x449   : > { %2748 = vpow2.f32 %v2454_v32  ;;  %v1623_v33 = vld [vmem:[%s1620_s6 + $0x10] sm:$0xff] }
 0x44a   : > { %2750 = vpow2.f32 %v2455_v41 }
 0x454   : > { %v2747_v43 = vpop.eup %2746 }
 0x455   : > { %v1593_v57 = vadd.f32 1.0, %v2747_v43 }
 0x456   : > { %v2749_v58 = vpop.eup %2748 }
 0x457   : > { %2752 = vrcp.f32 %v1593_v57  ;;  %v1599_v3 = vadd.f32 1.0, %v2749_v58  ;;  %v2751_v4 = vpop.eup %2750 }
 0x458   : > { %2754 = vtanh.f32 %v1588_v36  ;;  %v1606_v62 = vadd.f32 1.0, %v2751_v4 }
 0x459   : > { %2756 = vrcp.f32 %v1599_v3 }
 0x45a   : > { %2758 = vrcp.f32 %v1606_v62 }
 0x464   : > { %v2753_v59 = vpop.eup %2752 }
 0x465   : > { %v2755_v60 = vpop.eup %2754 }
 0x466   : > { %v2757_v61 = vpop.eup %2756  ;;  %v1610_v5 = vmul.f32 %v2755_v60, %v2753_v59 }
 0x467   : > { %v1609_v6 = vmul.f32 %v2757_v61, %v3482_v2  ;;  %v2759_v0 = vpop.eup %2758  ;;  %v3589_v2 = vld [vmem:[%s3113_s13 + $0x80] ss:$16 sps:$4 sm:$0xff]  }
 0x469   : > { %v3533_v63 = vadd.f32 %v1610_v5, %v1609_v6 }
 0x46b   : > { %2760 = vtanh.f32 %v3533_v63 }
 0x478   : > { %v2761_v7 = vpop.eup %2760 }
 0x479   : > { %v1613_v8 = vmul.f32 %v2761_v7, %v2759_v0  ;;  %v3674_v0 = vld [vmem:[%s3113_s13 + $0x24] ss:$16 sps:$4 sm:$0xff]   ;;  %v3678_v7 = vld [vmem:[%s3113_s13 + $0x2c] ss:$16 sps:$4 sm:$0xff]  }
 0x47b   : > { %1616 = vst [vmem:[%s1615_s29] sm:$0xff] %v1613_v8  ;;  %v1625_v9 = vpack.c.bf16 %v1613_v8, %v1613_v8  ;;  %v3682_v8 = vld [vmem:[%s3113_s13 + $0x20] ss:$16 sps:$4 sm:$0xff]   ;;  %s2494_s29 = sshll.u32 %s3760_s24, 5 }
 0x47c   : > { %s1986_s5 = scalar_lea.vmem [#allocation2], %s2494_s29 }
 0x47d   : > { %1659 = vmatmul.mubr.bf16.vlgmr.msra.gmra.mxu0 %v1625_v9  ;;  %1700 = vmatmul.mubr.bf16.vlgmr.msra.gmra.mxu1 %v1625_v9  ;;  %v3686_v9 = vld [vmem:[%s3113_s13 + $0x28] ss:$16 sps:$4 sm:$0xff]  }
 0x47e   : > { %1749 = vmatpush1.bf16.msra.mxu0 %v3539_v11  ;;  %1790 = vmatpush1.bf16.msra.mxu1 %v3543_v15 }
 0x47f   : > { %1750 = vmatprep.subr.bf16.mxu0 %v3547_v17  ;;  %1791 = vmatprep.subr.bf16.mxu1 %v3551_v20 }
 0x480   : > { %1780 = vmatprep.mubr.bf16.mxu0 %v2941_v55  ;;  %1821 = vmatprep.mubr.bf16.mxu1 %v2941_v55 }
 0x482   : > { %1751 = vmatpush1.bf16.msra.mxu0 %v3557_v21  ;;  %1792 = vmatpush1.bf16.msra.mxu1 %v3561_v22 }
 0x483   : > { %1752 = vmatprep.subr.bf16.mxu0 %v3565_v30  ;;  %1793 = vmatprep.subr.bf16.mxu1 %v3569_v31 }
 0x486   : > { %1753 = vmatpush1.bf16.msra.mxu0 %v3573_v34  ;;  %1794 = vmatpush1.bf16.msra.mxu1 %v3577_v35 }
 0x487   : > { %1754 = vmatprep.subr.bf16.mxu0 %v3581_v1  ;;  %1795 = vmatprep.subr.bf16.mxu1 %v3585_v40 }
 0x48a   : > { %1755 = vmatpush1.bf16.msra.mxu0 %v3589_v2  ;;  %1796 = vmatpush1.bf16.msra.mxu1 %v3593_v44 }
 0x48b   : > { %1756 = vmatprep.subr.bf16.mxu0 %v3597_v26  ;;  %1797 = vmatprep.subr.bf16.mxu1 %v3601_v45 }
 0x48e   : > { %1757 = vmatpush1.bf16.msra.mxu0 %v3605_v48  ;;  %1798 = vmatpush1.bf16.msra.mxu1 %v3609_v13 }
 0x48f   : > { %1758 = vmatprep.subr.bf16.mxu0 %v3613_v14  ;;  %1799 = vmatprep.subr.bf16.mxu1 %v3617_v16 }
 0x492   : > { %1759 = vmatpush1.bf16.msra.mxu0 %v3621_v18  ;;  %1800 = vmatpush1.bf16.msra.mxu1 %v3267_v47 }
 0x493   : > { %1760 = vmatprep.subr.bf16.mxu0 %v3263_v46  ;;  %1801 = vmatprep.subr.bf16.mxu1 %v3275_v50  ;;  %v1621_v46 = vld [vmem:[%s1620_s6] sm:$0xff] }
 0x496   : > { %1761 = vmatpush1.bf16.msra.mxu0 %v3272_v49  ;;  %1802 = vmatpush1.bf16.msra.mxu1 %v3283_v52 }
 0x497   : > { %1762 = vmatprep.subr.bf16.mxu0 %v3279_v51  ;;  %1803 = vmatprep.subr.bf16.mxu1 %v3286_v53  ;;  %v1622_v51 = vld [vmem:[%s1620_s6 + $0x8] sm:$0xff]  ;;  %s2103_s6 = scalar_lea.vmem %s3394_s30, %s2480_s25 [#allocation7] }
 0x49a   : > { %1763 = vmatpush1.bf16.msra.mxu0 %v3290_v54  ;;  %1804 = vmatpush1.bf16.msra.mxu1 %v3297_v56 }
 0x49b   : > { %1870 = vmatprep.subr.bf16.mxu0 %v3520_v10  ;;  %1911 = vmatprep.subr.bf16.mxu1 %v3524_v12 }
 0x53d   : > { %v1660_v47 = vpop.f32.mrf.mxu0  ;;  %v1701_v49 = vpop.f32.mrf.mxu1 }
 0x53e   : > { %v1708_v50 = vadd.f32 %v1660_v47, %v1621_v46  ;;  %v1710_v38 = vadd.f32 %v1701_v49, %v1623_v33  ;;  %v3690_v46 = vld [vmem:[%s3113_s13 + $0x4] ss:$16 sps:$4 sm:$0xff]   ;;  %v3694_v47 = vld [vmem:[%s3113_s13 + $0xc] ss:$16 sps:$4 sm:$0xff]   ;;  %v3698_v49 = vld [vmem:[%s3113_s13] ss:$16 sps:$4 sm:$0xff]  }
 0x53f   : > { %v1662_v52 = vpop.f32.mrf.mxu0  ;;  %v1703_v53 = vpop.f32.mrf.mxu1 }
 0x540   : > { %v2459_v54 = vmul.f32 -1.442695, %v1708_v50  ;;  %v1709_v19 = vadd.f32 %v1662_v52, %v1622_v51  ;;  %v1711_v29 = vadd.f32 %v1703_v53, %v1624_v28  ;;  %v3702_v50 = vld [vmem:[%s3113_s13 + $0x8] ss:$16 sps:$4 sm:$0xff]   ;;  %v1743_v51 = vld [vmem:[%s1742_s11] sm:$0xff] }
 0x541   : > { %v1664_v56 = vpop.f32.mrf.mxu0  ;;  %v1705_v23 = vpop.f32.mrf.mxu1 }
 0x542   : > { %2762 = vpow2.f32 %v2459_v54  ;;  %v2460_v24 = vmul.f32 -1.442695, %v1709_v19  ;;  %v2461_v32 = vmul.f32 -1.442695, %v1711_v29  ;;  %v1744_v19 = vld [vmem:[%s1742_s11 + $0x8] sm:$0xff] }
 0x543   : > { %v1665_v25 = vpop.f32.mrf.mxu0  ;;  %v1706_v27 = vpop.f32.mrf.mxu1 }
 0x544   : > { %2764 = vpow2.f32 %v2460_v24 }
 0x545   : > { %2766 = vpow2.f32 %v2461_v32  ;;  %v1746_v32 = vld [vmem:[%s1742_s11 + $0x18] sm:$0xff] }
 0x54f   : > { %v2763_v37 = vpop.eup %2762 }
 0x550   : > { %v1715_v39 = vadd.f32 1.0, %v2763_v37 }
 0x551   : > { %v2765_v41 = vpop.eup %2764 }
 0x552   : > { %2768 = vrcp.f32 %v1715_v39  ;;  %v1721_v42 = vadd.f32 1.0, %v2765_v41  ;;  %v2767_v43 = vpop.eup %2766 }
 0x553   : > { %2770 = vtanh.f32 %v1710_v38  ;;  %v1728_v3 = vadd.f32 1.0, %v2767_v43  ;;  %v1745_v38 = vld [vmem:[%s1742_s11 + $0x10] sm:$0xff] }
 0x554   : > { %2772 = vrcp.f32 %v1721_v42 }
 0x555   : > { %2774 = vrcp.f32 %v1728_v3 }
 0x55f   : > { %v2769_v36 = vpop.eup %2768 }
 0x560   : > { %v2771_v57 = vpop.eup %2770 }
 0x561   : > { %v2773_v58 = vpop.eup %2772  ;;  %v1732_v4 = vmul.f32 %v2771_v57, %v2769_v36 }
 0x562   : > { %v1731_v59 = vmul.f32 %v2773_v58, %v3533_v63  ;;  %v2775_v61 = vpop.eup %2774  ;;  %v3670_v63 = vld [vmem:[%s3113_s13 + $0x48] ss:$16 sps:$4 sm:$0xff]   ;;  %s2468_s13 = sshll.u32 %s3709_s9, 3 }
 0x563   : > { %s1859_s12 = scalar_lea.vmem %s3394_s30, %s2468_s13 [#allocation7] }
 0x564   : > { %v3641_v60 = vadd.f32 %v1732_v4, %v1731_v59 }
 0x566   : > { %2776 = vtanh.f32 %v3641_v60 }
 0x573   : > { %v2777_v62 = vpop.eup %2776 }
 0x574   : > { %v1735_v5 = vmul.f32 %v2777_v62, %v2775_v61 }
 0x576   : > { %1738 = vst [vmem:[%s1737_s8] sm:$0xff] %v1735_v5  ;;  %v1747_v6 = vpack.c.bf16 %v1735_v5, %v1735_v5 }
 0x578   : > { %1781 = vmatmul.mubr.bf16.vlgmr.msra.gmra.mxu0 %v1747_v6  ;;  %1822 = vmatmul.mubr.bf16.vlgmr.msra.gmra.mxu1 %v1747_v6 }
 0x579   : > { %1871 = vmatpush1.bf16.msra.mxu0 %v3539_v11  ;;  %1912 = vmatpush1.bf16.msra.mxu1 %v3543_v15 }
 0x57a   : > { %1872 = vmatprep.subr.bf16.mxu0 %v3547_v17  ;;  %1913 = vmatprep.subr.bf16.mxu1 %v3551_v20 }
 0x57b   : > { %1902 = vmatprep.mubr.bf16.mxu0 %v2941_v55  ;;  %1943 = vmatprep.mubr.bf16.mxu1 %v2941_v55 }
 0x57d   : > { %1873 = vmatpush1.bf16.msra.mxu0 %v3557_v21  ;;  %1914 = vmatpush1.bf16.msra.mxu1 %v3561_v22 }
 0x57e   : > { %1874 = vmatprep.subr.bf16.mxu0 %v3565_v30  ;;  %1915 = vmatprep.subr.bf16.mxu1 %v3569_v31 }
 0x581   : > { %1875 = vmatpush1.bf16.msra.mxu0 %v3573_v34  ;;  %1916 = vmatpush1.bf16.msra.mxu1 %v3577_v35 }
 0x582   : > { %1876 = vmatprep.subr.bf16.mxu0 %v3581_v1  ;;  %1917 = vmatprep.subr.bf16.mxu1 %v3585_v40 }
 0x585   : > { %1877 = vmatpush1.bf16.msra.mxu0 %v3589_v2  ;;  %1918 = vmatpush1.bf16.msra.mxu1 %v3593_v44 }
 0x586   : > { %1878 = vmatprep.subr.bf16.mxu0 %v3597_v26  ;;  %1919 = vmatprep.subr.bf16.mxu1 %v3601_v45 }
 0x589   : > { %1879 = vmatpush1.bf16.msra.mxu0 %v3605_v48  ;;  %1920 = vmatpush1.bf16.msra.mxu1 %v3609_v13 }
 0x58a   : > { %1880 = vmatprep.subr.bf16.mxu0 %v3613_v14  ;;  %1921 = vmatprep.subr.bf16.mxu1 %v3617_v16 }
 0x58d   : > { %1881 = vmatpush1.bf16.msra.mxu0 %v3621_v18  ;;  %1922 = vmatpush1.bf16.msra.mxu1 %v3670_v63 }
 0x58e   : > { %1882 = vmatprep.subr.bf16.mxu0 %v3674_v0  ;;  %1923 = vmatprep.subr.bf16.mxu1 %v3678_v7 }
 0x591   : > { %1883 = vmatpush1.bf16.msra.mxu0 %v3682_v8  ;;  %1924 = vmatpush1.bf16.msra.mxu1 %v3686_v9 }
 0x592   : > { %1884 = vmatprep.subr.bf16.mxu0 %v3690_v46  ;;  %1925 = vmatprep.subr.bf16.mxu1 %v3694_v47 }
 0x595   : > { %1885 = vmatpush1.bf16.msra.mxu0 %v3698_v49  ;;  %1926 = vmatpush1.bf16.msra.mxu1 %v3702_v50 }
 0x596   : > { %1992 = vmatprep.subr.bf16.mxu0 %v3520_v10  ;;  %2033 = vmatprep.subr.bf16.mxu1 %v3524_v12 }
 0x638   : > { %v1782_v52 = vpop.f32.mrf.mxu0  ;;  %v1823_v53 = vpop.f32.mrf.mxu1 }
 0x639   : > { %v1830_v54 = vadd.f32 %v1782_v52, %v1743_v51  ;;  %v1832_v41 = vadd.f32 %v1823_v53, %v1745_v38 }
 0x63a   : > { %v1784_v56 = vpop.f32.mrf.mxu0  ;;  %v1825_v23 = vpop.f32.mrf.mxu1 }
 0x63b   : > { %v2465_v24 = vmul.f32 -1.442695, %v1830_v54  ;;  %v1831_v25 = vadd.f32 %v1784_v56, %v1744_v19  ;;  %v1833_v33 = vadd.f32 %v1825_v23, %v1746_v32  ;;  %v1987_v23 = vld [vmem:[%s1986_s5] sm:$0xff] }
 0x63c   : > { %v1786_v27 = vpop.f32.mrf.mxu0  ;;  %v1827_v28 = vpop.f32.mrf.mxu1 }
 0x63d   : > { %2778 = vpow2.f32 %v2465_v24  ;;  %v2466_v10 = vmul.f32 -1.442695, %v1831_v25  ;;  %v2467_v37 = vmul.f32 -1.442695, %v1833_v33  ;;  %v1988_v28 = vld [vmem:[%s1986_s5 + $0x8] sm:$0xff] }
 0x63e   : > { %v1787_v12 = vpop.f32.mrf.mxu0  ;;  %v1828_v29 = vpop.f32.mrf.mxu1 }
 0x63f   : > { %2780 = vpow2.f32 %v2466_v10 }
 0x640   : > { %2782 = vpow2.f32 %v2467_v37 }
 0x64a   : > { %v2779_v39 = vpop.eup %2778 }
 0x64b   : > { %v1837_v42 = vadd.f32 1.0, %v2779_v39 }
 0x64c   : > { %v2781_v43 = vpop.eup %2780 }
 0x64d   : > { %2784 = vrcp.f32 %v1837_v42  ;;  %v1843_v36 = vadd.f32 1.0, %v2781_v43  ;;  %v2783_v57 = vpop.eup %2782  ;;  %v1990_v42 = vld [vmem:[%s1986_s5 + $0x18] sm:$0xff] }
 0x64e   : > { %2786 = vtanh.f32 %v1832_v41  ;;  %v1850_v59 = vadd.f32 1.0, %v2783_v57  ;;  %v1989_v57 = vld [vmem:[%s1986_s5 + $0x10] sm:$0xff] }
 0x64f   : > { %2788 = vrcp.f32 %v1843_v36 }
 0x650   : > { %2790 = vrcp.f32 %v1850_v59 }
 0x65a   : > { %v2785_v58 = vpop.eup %2784 }
 0x65b   : > { %v2787_v3 = vpop.eup %2786 }
 0x65c   : > { %v2789_v4 = vpop.eup %2788  ;;  %v1854_v61 = vmul.f32 %v2787_v3, %v2785_v58 }
 0x65d   : > { %v1853_v62 = vmul.f32 %v2789_v4, %v3641_v60  ;;  %v2791_v6 = vpop.eup %2790 }
 0x65f   : > { %v3713_v5 = vadd.f32 %v1854_v61, %v1853_v62 }
 0x661   : > { %2792 = vtanh.f32 %v3713_v5 }
 0x66e   : > { %v2793_v51 = vpop.eup %2792 }
 0x66f   : > { %v1857_v52 = vmul.f32 %v2793_v51, %v2791_v6 }
 0x671   : > { %1860 = vst [vmem:[%s1859_s12] sm:$0xff] %v1857_v52  ;;  %v1869_v53 = vpack.c.bf16 %v1857_v52, %v1857_v52 }
 0x673   : > { %1903 = vmatmul.mubr.bf16.vlgmr.msra.gmra.mxu0 %v1869_v53  ;;  %1944 = vmatmul.mubr.bf16.vlgmr.msra.gmra.mxu1 %v1869_v53 }
 0x674   : > { %1993 = vmatpush1.bf16.msra.mxu0 %v3539_v11  ;;  %2034 = vmatpush1.bf16.msra.mxu1 %v3543_v15 }
 0x675   : > { %1994 = vmatprep.subr.bf16.mxu0 %v3547_v17  ;;  %2035 = vmatprep.subr.bf16.mxu1 %v3551_v20  ;;  %v1866_v20 = vld [vmem:[%s1864_s26 + $0x8] sm:$0xff] }
 0x676   : > { %2024 = vmatprep.mubr.bf16.mxu0 %v2941_v55  ;;  %2065 = vmatprep.mubr.bf16.mxu1 %v2941_v55  ;;  %v1865_v55 = vld [vmem:[%s1864_s26] sm:$0xff] }
 0x678   : > { %1995 = vmatpush1.bf16.msra.mxu0 %v3557_v21  ;;  %2036 = vmatpush1.bf16.msra.mxu1 %v3561_v22 }
 0x679   : > { %1996 = vmatprep.subr.bf16.mxu0 %v3565_v30  ;;  %2037 = vmatprep.subr.bf16.mxu1 %v3569_v31 }
 0x67c   : > { %1997 = vmatpush1.bf16.msra.mxu0 %v3573_v34  ;;  %2038 = vmatpush1.bf16.msra.mxu1 %v3577_v35 }
 0x67d   : > { %1998 = vmatprep.subr.bf16.mxu0 %v3581_v1  ;;  %2039 = vmatprep.subr.bf16.mxu1 %v3585_v40 }
 0x680   : > { %1999 = vmatpush1.bf16.msra.mxu0 %v3589_v2  ;;  %2040 = vmatpush1.bf16.msra.mxu1 %v3593_v44  ;;  %v1868_v44 = vld [vmem:[%s1864_s26 + $0x18] sm:$0xff] }
 0x681   : > { %2000 = vmatprep.subr.bf16.mxu0 %v3597_v26  ;;  %2041 = vmatprep.subr.bf16.mxu1 %v3601_v45 }
 0x684   : > { %2001 = vmatpush1.bf16.msra.mxu0 %v3605_v48  ;;  %2042 = vmatpush1.bf16.msra.mxu1 %v3609_v13  ;;  %v1867_v48 = vld [vmem:[%s1864_s26 + $0x10] sm:$0xff] }
 0x685   : > { %2002 = vmatprep.subr.bf16.mxu0 %v3613_v14  ;;  %2043 = vmatprep.subr.bf16.mxu1 %v3617_v16 }
 0x688   : > { %2003 = vmatpush1.bf16.msra.mxu0 %v3621_v18  ;;  %2044 = vmatpush1.bf16.msra.mxu1 %v3670_v63 }
 0x689   : > { %2004 = vmatprep.subr.bf16.mxu0 %v3674_v0  ;;  %2045 = vmatprep.subr.bf16.mxu1 %v3678_v7 }
 0x68c   : > { %2005 = vmatpush1.bf16.msra.mxu0 %v3682_v8  ;;  %2046 = vmatpush1.bf16.msra.mxu1 %v3686_v9 }
 0x68d   : > { %2006 = vmatprep.subr.bf16.mxu0 %v3690_v46  ;;  %2047 = vmatprep.subr.bf16.mxu1 %v3694_v47 }
 0x690   : > { %2007 = vmatpush1.bf16.msra.mxu0 %v3698_v49  ;;  %2048 = vmatpush1.bf16.msra.mxu1 %v3702_v50 }
 0x733   : > { %v1904_v11 = vpop.f32.mrf.mxu0  ;;  %v1945_v15 = vpop.f32.mrf.mxu1 }
 0x734   : > { %v1952_v17 = vadd.f32 %v1904_v11, %v1865_v55  ;;  %v1954_v14 = vadd.f32 %v1945_v15, %v1867_v48 }
 0x735   : > { %v1906_v21 = vpop.f32.mrf.mxu0  ;;  %v1947_v22 = vpop.f32.mrf.mxu1 }
 0x736   : > { %v2471_v30 = vmul.f32 -1.442695, %v1952_v17  ;;  %v1953_v31 = vadd.f32 %v1906_v21, %v1866_v20  ;;  %v1955_v26 = vadd.f32 %v1947_v22, %v1868_v44 }
 0x737   : > { %v1908_v34 = vpop.f32.mrf.mxu0  ;;  %v1949_v35 = vpop.f32.mrf.mxu1 }
 0x738   : > { %2794 = vpow2.f32 %v2471_v30  ;;  %v2472_v1 = vmul.f32 -1.442695, %v1953_v31  ;;  %v2473_v45 = vmul.f32 -1.442695, %v1955_v26 }
 0x739   : > { %v1909_v40 = vpop.f32.mrf.mxu0  ;;  %v1950_v2 = vpop.f32.mrf.mxu1 }
 0x73a   : > { %2796 = vpow2.f32 %v2472_v1 }
 0x73b   : > { %2798 = vpow2.f32 %v2473_v45 }
 0x745   : > { %v2795_v13 = vpop.eup %2794 }
 0x746   : > { %v1959_v16 = vadd.f32 1.0, %v2795_v13 }
 0x747   : > { %v2797_v18 = vpop.eup %2796 }
 0x748   : > { %2800 = vrcp.f32 %v1959_v16  ;;  %v1965_v60 = vadd.f32 1.0, %v2797_v18  ;;  %v2799_v63 = vpop.eup %2798 }
 0x749   : > { %2802 = vtanh.f32 %v1954_v14  ;;  %v1972_v9 = vadd.f32 1.0, %v2799_v63 }
 0x74a   : > { %2804 = vrcp.f32 %v1965_v60 }
 0x74b   : > { %2806 = vrcp.f32 %v1972_v9 }
 0x755   : > { %v2801_v0 = vpop.eup %2800 }
 0x756   : > { %v2803_v7 = vpop.eup %2802 }
 0x757   : > { %v2805_v8 = vpop.eup %2804  ;;  %v1976_v46 = vmul.f32 %v2803_v7, %v2801_v0 }
 0x758   : > { %v1975_v47 = vmul.f32 %v2805_v8, %v3713_v5  ;;  %v2807_v50 = vpop.eup %2806 }
 0x75a   : > { %v1977_v49 = vadd.f32 %v1976_v46, %v1975_v47 }
 0x75c   : > { %2808 = vtanh.f32 %v1977_v49 }
 0x769   : > { %v2809_v54 = vpop.eup %2808 }
 0x76a   : > { %v1979_v19 = vmul.f32 %v2809_v54, %v2807_v50 }
 0x76c   : > { %1982 = vst [vmem:[%s1981_s23] sm:$0xff] %v1979_v19  ;;  %v1991_v56 = vpack.c.bf16 %v1979_v19, %v1979_v19 }
 0x76e   : > { %2025 = vmatmul.mubr.bf16.vlgmr.msra.gmra.mxu0 %v1991_v56  ;;  %2066 = vmatmul.mubr.bf16.vlgmr.msra.gmra.mxu1 %v1991_v56 }
 0x82e   : > { %v2026_v24 = vpop.f32.mrf.mxu0  ;;  %v2067_v25 = vpop.f32.mrf.mxu1 }
 0x82f   : > { %v2074_v27 = vadd.f32 %v2026_v24, %v1987_v23  ;;  %v2076_v3 = vadd.f32 %v2067_v25, %v1989_v57 }
 0x830   : > { %v2028_v10 = vpop.f32.mrf.mxu0  ;;  %v2069_v12 = vpop.f32.mrf.mxu1 }
 0x831   : > { %v2477_v29 = vmul.f32 -1.442695, %v2074_v27  ;;  %v2075_v32 = vadd.f32 %v2028_v10, %v1988_v28  ;;  %v2077_v43 = vadd.f32 %v2069_v12, %v1990_v42 }
 0x832   : > { %v2030_v33 = vpop.f32.mrf.mxu0  ;;  %v2071_v37 = vpop.f32.mrf.mxu1 }
 0x833   : > { %2810 = vpow2.f32 %v2477_v29  ;;  %v2478_v38 = vmul.f32 -1.442695, %v2075_v32  ;;  %v2479_v36 = vmul.f32 -1.442695, %v2077_v43 }
 0x834   : > { %v2031_v39 = vpop.f32.mrf.mxu0  ;;  %v2072_v41 = vpop.f32.mrf.mxu1 }
 0x835   : > { %2812 = vpow2.f32 %v2478_v38 }
 0x836   : > { %2814 = vpow2.f32 %v2479_v36 }
 0x840   : > { %v2811_v58 = vpop.eup %2810 }
 0x841   : > { %v2081_v4 = vadd.f32 1.0, %v2811_v58 }
 0x842   : > { %v2813_v59 = vpop.eup %2812 }
 0x843   : > { %2816 = vrcp.f32 %v2081_v4  ;;  %v2087_v61 = vadd.f32 1.0, %v2813_v59  ;;  %v2815_v62 = vpop.eup %2814 }
 0x844   : > { %2818 = vtanh.f32 %v2076_v3  ;;  %v2094_v52 = vadd.f32 1.0, %v2815_v62 }
 0x845   : > { %2820 = vrcp.f32 %v2087_v61 }
 0x846   : > { %2822 = vrcp.f32 %v2094_v52 }
 0x850   : > { %v2817_v5 = vpop.eup %2816 }
 0x851   : > { %v2819_v6 = vpop.eup %2818 }
 0x852   : > { %v2821_v51 = vpop.eup %2820  ;;  %v2098_v53 = vmul.f32 %v2819_v6, %v2817_v5 }
 0x853   : > { %v2097_v55 = vmul.f32 %v2821_v51, %v1977_v49  ;;  %v2823_v15 = vpop.eup %2822 }
 0x855   : > { %v2099_v11 = vadd.f32 %v2098_v53, %v2097_v55 }
 0x857   : > { %2824 = vtanh.f32 %v2099_v11 }
 0x863   : > { %2113 = sbr.rel (!%p3018_p9) target bundleno = 2164 (0x874), region = 48 }
 0x864   : > { %v2825_v17 = vpop.eup %2824 }
 0x865   : > { %v2101_v20 = vmul.f32 %v2825_v17, %v2823_v15 }
 0x867   : > { %2104 = vst [vmem:[%s2103_s6] sm:$0xff] %v2101_v20 }
 0x86e   : > { %v2164_v21 = vld [vmem:[%s3394_s30] sm:$0xff]  ;;  %v2166_v22 = vld [vmem:[%s3394_s30 + $0x8] sm:$0xff]  ;;  %v2168_v30 = vld [vmem:[%s3394_s30 + $0x10] sm:$0xff] }
 0x86f   : > { %v2170_v31 = vld [vmem:[%s3394_s30 + $0x18] sm:$0xff]  ;;  %v2172_v34 = vld [vmem:[%s3394_s30 + $0x20] sm:$0xff]  ;;  %v2174_v35 = vld [vmem:[%s3394_s30 + $0x28] sm:$0xff]  ;;  %2165 = vst [vmem:[%s2121_s10] sm:$0xff] %v2164_v21 }
 0x870   : > { %2167 = vst [vmem:[%s2121_s10 + $0x10] sm:$0xff] %v2166_v22  ;;  %2169 = vst [vmem:[%s2121_s10 + $0x20] sm:$0xff] %v2168_v30  ;;  %v2176_v1 = vld [vmem:[%s3394_s30 + $0x30] sm:$0xff]  ;;  %v2178_v40 = vld [vmem:[%s3394_s30 + $0x38] sm:$0xff] }
 0x871   : > { %2171 = vst [vmem:[%s2121_s10 + $0x30] sm:$0xff] %v2170_v31  ;;  %2173 = vst [vmem:[%s2121_s10 + $0x40] sm:$0xff] %v2172_v34 }
 0x872   : > { %2175 = vst [vmem:[%s2121_s10 + $0x50] sm:$0xff] %v2174_v35  ;;  %2177 = vst [vmem:[%s2121_s10 + $0x60] sm:$0xff] %v2176_v1 }
 0x873   : > { %2179 = vst [vmem:[%s2121_s10 + $0x70] sm:$0xff] %v2178_v40 }
 0x874 PF: > { %s17_s20 = sadd.s32 1, %s2936_s20   ;;  %s3806_s15 = smov %s2920_s16 }
 0x875   : > { %p14_p9 = scmp.ge.s32.totalorder %s17_s20, 4   ;;  %s3807_s16 = smov %s2924_s17 }
 0x876   : > { %s3808_s17 = smov %s3016_s27  ;;  %s3809_s18 = smov %s2932_s19 }
 0x877   : > { %s3810_s19 = smov %s3812_s22  ;;  %16 = sbr.rel (!%p14_p9) target bundleno = 4 (0x4), region = 143 }
 0x87c   :  { %2195 = vsyncpa [#allocation6], 1 }
 0x87d   :  { %2197 = vsyncpa [#allocation6 + $0x1], 1 }

</bundles_post_ra>
